<compile_context>
chip_gen: v7x
topology: tpu7x:2x2x1
jax: 0.10.0
libtpu: 0.0.40
codegen_flags: <defaults>
</compile_context>

<pallas_src>
import functools
import math

import jax
import jax.numpy as jnp
from jax.experimental import pallas as pl
from jax.experimental.pallas import tpu as pltpu  # noqa: F401  (TPU backend)

# ----------------------------- configuration -------------------------------
B = 2                 # batch
C_IN = 3              # image channels
IMG = 16              # image spatial size
PATCH = 8             # patch size -> 2x2 grid -> 4 patches (+ CLS = 5 tokens)
WIDTH = 32            # transformer width (visual & text) == image_dim == text_dim
HEADS = 2
HEAD_DIM = WIDTH // HEADS
VOCAB = 64
CTX = 16              # total text length; chunk(2) -> caption 8, degradation 8
EXPANSION = 8         # SAE expansion factor -> hidden = 256
L1_COEFF = 0.001
N_PATCH = (IMG // PATCH) ** 2
VIS_SEQ = N_PATCH + 1
TXT_SEQ = CTX // 2
PATCH_DIM = C_IN * PATCH * PATCH

DOT_DTYPE = jnp.bfloat16  # MXU-native operand dtype on v5e/v6e/v7x (f32 accum)

BLOCK_KEYS = ("ln1_g", "ln1_b", "qkv_w", "qkv_b", "proj_w", "proj_b",
              "ln2_g", "ln2_b", "fc1_w", "fc1_b", "fc2_w", "fc2_b")


# ----------------------- in-kernel math helpers (on values) -----------------
def _mm(a, b):
    """a @ b with bf16 MXU operands, f32 accumulation."""
    return jnp.dot(a.astype(DOT_DTYPE), b.astype(DOT_DTYPE),
                   preferred_element_type=jnp.float32)


def _mm_bt(a, b):
    """a @ b.T without materializing the transpose (contract on rhs axis 1)."""
    return jax.lax.dot_general(
        a.astype(DOT_DTYPE), b.astype(DOT_DTYPE),
        dimension_numbers=(((1,), (1,)), ((), ())),
        preferred_element_type=jnp.float32)


def _ln(x, g, b, eps=1e-5):
    mu = jnp.mean(x, axis=-1, keepdims=True)
    var = jnp.mean((x - mu) ** 2, axis=-1, keepdims=True)
    return (x - mu) * jax.lax.rsqrt(var + eps) * g + b


def _l2norm(x):
    # F.normalize(x, dim=-1): x / max(||x||_2, 1e-12)
    nrm = jnp.sqrt(jnp.sum(x * x, axis=-1, keepdims=True))
    return x / jnp.maximum(nrm, 1e-12)


def _mha(q, k, v, *, causal):
    """Multi-head attention on VMEM values. q,k,v: (nb, seq, WIDTH) f32.

    Heads are unrolled statically; per-head output is accumulated with a
    lane mask so no lane-dim concatenation / 4-D transpose is needed.
    """
    nb, seq, width = q.shape
    scale = 1.0 / math.sqrt(HEAD_DIM)
    lane = jax.lax.broadcasted_iota(jnp.int32, (nb, seq, width), 2)
    out = jnp.zeros((nb, seq, width), jnp.float32)
    for h in range(HEADS):
        lo = h * HEAD_DIM
        qh = q[:, :, lo:lo + HEAD_DIM]
        kh = k[:, :, lo:lo + HEAD_DIM]
        s = jnp.einsum("bqd,bkd->bqk", qh, kh,
                       preferred_element_type=jnp.float32) * scale
        if causal:
            qi = jax.lax.broadcasted_iota(jnp.int32, s.shape, 1)
            ki = jax.lax.broadcasted_iota(jnp.int32, s.shape, 2)
            s = jnp.where(ki <= qi, s, -1e30)
        s = s - jnp.max(s, axis=-1, keepdims=True)
        p = jnp.exp(s)
        p = p / jnp.sum(p, axis=-1, keepdims=True)
        vh = jnp.where((lane >= lo) & (lane < lo + HEAD_DIM), v, 0.0)
        out = out + jnp.einsum("bqk,bkd->bqd", p, vh,
                               preferred_element_type=jnp.float32)
    return out


def _block(x2, bsz, seq,
           ln1_g, ln1_b, qkv_w, qkv_b, proj_w, proj_b,
           ln2_g, ln2_b, fc1_w, fc1_b, fc2_w, fc2_b, *, causal):
    """Pre-LN transformer block on a (bsz*seq, WIDTH) VMEM value."""
    h = _ln(x2, ln1_g, ln1_b)
    qkv = _mm(h, qkv_w) + qkv_b                               # (rows, 3W)
    q = qkv[:, 0 * WIDTH:1 * WIDTH].reshape(bsz, seq, WIDTH)
    k = qkv[:, 1 * WIDTH:2 * WIDTH].reshape(bsz, seq, WIDTH)
    v = qkv[:, 2 * WIDTH:3 * WIDTH].reshape(bsz, seq, WIDTH)
    a = _mha(q, k, v, causal=causal).reshape(bsz * seq, WIDTH)
    x2 = x2 + _mm(a, proj_w) + proj_b
    h = _ln(x2, ln2_g, ln2_b)
    h = jax.nn.gelu(_mm(h, fc1_w) + fc1_b, approximate=True)
    x2 = x2 + _mm(h, fc2_w) + fc2_b
    return x2


def _sae(feats, w_enc, b_enc, b_dec):
    """Tied-weight ReLU sparse autoencoder (encode + decode)."""
    xc = feats - b_dec
    learned = jnp.maximum(_mm(xc, w_enc) + b_enc, 0.0)
    recon = _mm_bt(learned, w_enc) + b_dec
    return learned, recon


# ------------------------------ fused kernels --------------------------------
def _image_branch_kernel(pp_ref, pw_ref, clspos_ref, lpre_g_ref, lpre_b_ref,
                         *refs):
    # refs layout:
    #   [ 0:12) visual block params        [12:24) controller block params
    #   [24:27) vis ln_post_g/b, vis proj  [27:30) ctrl ln_post_g/b, degra_proj
    #   [30:33) SAE W_enc, b_enc, b_dec
    #   [33:36) outputs: content, degra, l1
    vis_blk = [refs[i][...] for i in range(0, 12)]
    ctl_blk = [refs[i][...] for i in range(12, 24)]
    vpost_g, vpost_b, vproj = refs[24][...], refs[25][...], refs[26][...]
    cpost_g, cpost_b, dproj = refs[27][...], refs[28][...], refs[29][...]
    w_enc, b_enc, b_dec = refs[30][...], refs[31][...], refs[32][...]
    content_ref, degra_ref, l1_ref = refs[33], refs[34], refs[35]

    vis_seq, width = clspos_ref.shape
    bsz = pp_ref.shape[0] // vis_seq

    # patch embed (row 0 of each batch is a zero "patch" -> CLS slot);
    # clspos already holds pos with cls folded into token 0.
    x = _mm(pp_ref[...], pw_ref[...]).reshape(bsz, vis_seq, width)
    x = x + clspos_ref[...][None]
    x2 = _ln(x.reshape(bsz * vis_seq, width), lpre_g_ref[...], lpre_b_ref[...])

    # control branch: controller block output is added to the frozen visual
    # path; both blocks consume the same VMEM-resident x2.
    h_ctrl = _block(x2, bsz, vis_seq, *ctl_blk, causal=False)
    h_vis = _block(x2, bsz, vis_seq, *vis_blk, causal=False) + h_ctrl

    h_vis3 = h_vis.reshape(bsz, vis_seq, width)
    h_ctl3 = h_ctrl.reshape(bsz, vis_seq, width)

    # content features: ln_post -> proj -> L2 normalize (CLS token)
    content = _ln(h_vis3[:, 0, :], vpost_g, vpost_b)
    content = _mm(content, vproj)
    content_ref[...] = _l2norm(content)

    # degradation features: ln_post -> degra_proj -> tied SAE -> L2 normalize
    degra = _ln(h_ctl3[:, 0, :], cpost_g, cpost_b)
    degra = _mm(degra, dproj)
    learned, recon = _sae(degra, w_enc, b_enc, b_dec)
    degra_ref[...] = _l2norm(recon)

    # scalar L1 loss (mean over rows of per-row L1), reduced in-kernel.
    row_l1 = jnp.sum(jnp.abs(learned), axis=-1, keepdims=True)        # (bsz,1)
    l1_ref[...] = jnp.sum(row_l1, axis=0, keepdims=True) * (L1_COEFF / bsz)


def _text_branch_kernel(x_ref, onehot_ref, *refs):
    # refs layout:
    #   [ 0:12) text block params
    #   [12:15) ln_final_g, ln_final_b, text_projection
    #   [15:18) SAE W_enc, b_enc, b_dec
    #   [18:20) outputs: recon, l1
    blk = [refs[i][...] for i in range(0, 12)]
    lnf_g, lnf_b, tproj = refs[12][...], refs[13][...], refs[14][...]
    w_enc, b_enc, b_dec = refs[15][...], refs[16][...], refs[17][...]
    recon_ref, l1_ref = refs[18], refs[19]

    nb, seq = onehot_ref.shape           # caption rows + degradation rows
    width = x_ref.shape[-1]
    cap_rows = nb // 2                   # first half = caption batch

    x2 = _block(x_ref[...], nb, seq, *blk, causal=True)
    x2 = _ln(x2, lnf_g, lnf_b)
    x3 = x2.reshape(nb, seq, width)

    # EOT pooling via one-hot weighting (argmax done in wrapper glue).
    pooled = jnp.sum(x3 * onehot_ref[...][:, :, None], axis=1)        # (nb, W)
    feats = _l2norm(_mm(pooled, tproj))

    learned, recon = _sae(feats, w_enc, b_enc, b_dec)
    recon_ref[...] = recon               # raw reconstruction (no re-normalize)

    # L1 loss reported only for the caption half (matches reference forward).
    cap = learned[:cap_rows]
    row_l1 = jnp.sum(jnp.abs(cap), axis=-1, keepdims=True)
    l1_ref[...] = jnp.sum(row_l1, axis=0, keepdims=True) * (L1_COEFF / cap_rows)


# ------------------------------ branch wrappers ------------------------------
def _extract_patches_padded(image):
    """NCHW image -> (B*VIS_SEQ, C*P*P) with a zero row per batch at the CLS slot."""
    bsz, c, hh, ww = image.shape
    gh, gw = hh // PATCH, ww // PATCH
    x = image.reshape(bsz, c, gh, PATCH, gw, PATCH)
    x = x.transpose(0, 2, 4, 1, 3, 5).reshape(bsz, gh * gw, c * PATCH * PATCH)
    pad = jnp.zeros((bsz, 1, x.shape[-1]), x.dtype)
    return jnp.concatenate([pad, x], axis=1).reshape(bsz * (gh * gw + 1), -1)


def fused_image_branch(image, vis, ctrl, sae):
    bsz = image.shape[0]
    patches = _extract_patches_padded(image)
    cls_pos = vis["pos"].at[0:1, :].add(vis["cls"])   # fold CLS into pos row 0

    inputs = [patches, vis["patch_w"], cls_pos, vis["ln_pre_g"], vis["ln_pre_b"]]
    inputs += [vis["block"][k] for k in BLOCK_KEYS]
    inputs += [ctrl["block"][k] for k in BLOCK_KEYS]
    inputs += [vis["ln_post_g"], vis["ln_post_b"], vis["proj"]]
    inputs += [ctrl["ln_post_g"], ctrl["ln_post_b"], ctrl["degra_proj"]]
    inputs += [sae["W_enc"], sae["b_enc"], sae["b_dec"]]

    content, degra, l1 = pl.pallas_call(
        _image_branch_kernel,
        out_shape=(jax.ShapeDtypeStruct((bsz, WIDTH), jnp.float32),
                   jax.ShapeDtypeStruct((bsz, WIDTH), jnp.float32),
                   jax.ShapeDtypeStruct((1, 1), jnp.float32)),
    )(*inputs)
    return content, degra, l1[0, 0]


def fused_text_branch(text_tokens, txt, sae):
    caption, degradation = jnp.split(text_tokens, 2, axis=-1)
    toks = jnp.concatenate([caption, degradation], axis=0)       # (2B, TXT_SEQ)
    nb = toks.shape[0]

    # glue: embedding gather, positional add, EOT one-hot (CLIP argmax pooling)
    x = txt["tok_emb"][toks] + txt["pos"][None]                  # (2B, S, W)
    eot = jnp.argmax(toks, axis=-1)
    onehot = jax.nn.one_hot(eot, TXT_SEQ, dtype=jnp.float32)     # (2B, S)

    inputs = [x.reshape(nb * TXT_SEQ, WIDTH), onehot]
    inputs += [txt["block"][k] for k in BLOCK_KEYS]
    inputs += [txt["ln_final_g"], txt["ln_final_b"], txt["text_projection"]]
    inputs += [sae["W_enc"], sae["b_enc"], sae["b_dec"]]

    recon, l1 = pl.pallas_call(
        _text_branch_kernel,
        out_shape=(jax.ShapeDtypeStruct((nb, WIDTH), jnp.float32),
                   jax.ShapeDtypeStruct((1, 1), jnp.float32)),
    )(*inputs)
    half = nb // 2
    return recon[:half], recon[half:], l1[0, 0]


# --------------------------------- forward -----------------------------------
def daclip_forward(params, image, text):
    # image branch (encode_image(control=True, normalize=True))
    image_features, image_degra_features, degra_l1 = fused_image_branch(
        image, params["visual"], params["controller"], params["degra_sae"])

    # caption + degradation text branches, batched into one kernel
    text_features, text_degra_features, text_l1 = fused_text_branch(
        text, params["text"], params["text_sae"])

    return {
        "image_features": image_features,
        "text_features": text_features,
        "image_degra_features": image_degra_features,
        "text_degra_features": text_degra_features,
        "logit_scale": jnp.exp(params["logit_scale"]),
        "sae_losses": {
            "text_l1_loss": text_l1,
            "degra_l1_loss": degra_l1,
            # reference forward never assigns recon_loss; it stays 0.0
            "recon_loss": jnp.float32(0.0),
        },
    }


# -------------------------------- parameters ---------------------------------
def init_params(key):
    keys = iter(jax.random.split(key, 64))

    def nrm(shape, scale=0.02):
        return (scale * jax.random.normal(next(keys), shape)).astype(jnp.float32)

    def ones(shape):
        return jnp.ones(shape, jnp.float32)

    def zeros(shape):
        return jnp.zeros(shape, jnp.float32)

    def block_params():
        return dict(
            ln1_g=ones((1, WIDTH)), ln1_b=zeros((1, WIDTH)),
            qkv_w=nrm((WIDTH, 3 * WIDTH)), qkv_b=zeros((1, 3 * WIDTH)),
            proj_w=nrm((WIDTH, WIDTH)), proj_b=zeros((1, WIDTH)),
            ln2_g=ones((1, WIDTH)), ln2_b=zeros((1, WIDTH)),
            fc1_w=nrm((WIDTH, 4 * WIDTH)), fc1_b=zeros((1, 4 * WIDTH)),
            fc2_w=nrm((4 * WIDTH, WIDTH)), fc2_b=zeros((1, WIDTH)),
        )

    def sae_params(d):
        return dict(
            W_enc=nrm((d, d * EXPANSION)),
            b_enc=zeros((1, d * EXPANSION)),
            b_dec=zeros((1, d)),          # geometric-median init (zeros)
        )

    visual = dict(
        patch_w=nrm((PATCH_DIM, WIDTH)),
        cls=nrm((1, WIDTH)),
        pos=nrm((VIS_SEQ, WIDTH)),
        ln_pre_g=ones((1, WIDTH)), ln_pre_b=zeros((1, WIDTH)),
        block=block_params(),
        ln_post_g=ones((1, WIDTH)), ln_post_b=zeros((1, WIDTH)),
        proj=nrm((WIDTH, WIDTH)),
    )
    controller = dict(
        block=block_params(),
        ln_post_g=ones((1, WIDTH)), ln_post_b=zeros((1, WIDTH)),
        degra_proj=nrm((WIDTH, WIDTH)),
    )
    text = dict(
        tok_emb=nrm((VOCAB, WIDTH)),
        pos=nrm((TXT_SEQ, WIDTH)),
        block=block_params(),
        ln_final_g=ones((1, WIDTH)), ln_final_b=zeros((1, WIDTH)),
        text_projection=nrm((WIDTH, WIDTH)),
    )
    return dict(
        visual=visual,
        controller=controller,
        text=text,
        text_sae=sae_params(WIDTH),
        degra_sae=sae_params(WIDTH),
        logit_scale=jnp.float32(math.log(1.0 / 0.07)),
    )


# ----------------------------------- main -------------------------------------
if __name__ == "__main__":
    root = jax.random.PRNGKey(0)
    k_params, k_img, k_txt = jax.random.split(root, 3)

    params = init_params(k_params)
    image = jax.random.normal(k_img, (B, C_IN, IMG, IMG), jnp.float32)  # NCHW
    text = jax.random.randint(k_txt, (B, CTX), 1, VOCAB, dtype=jnp.int32)

    out = jax.jit(daclip_forward)(params, image, text)
    jax.block_until_ready(out)

    assert out["image_features"].shape == (B, WIDTH)
    assert out["text_features"].shape == (B, WIDTH)
    assert out["image_degra_features"].shape == (B, WIDTH)
    assert out["text_degra_features"].shape == (B, WIDTH)
    assert out["sae_losses"]["text_l1_loss"].shape == ()
    assert out["sae_losses"]["degra_l1_loss"].shape == ()
    print("KERNEL_OK")
</pallas_src>

<mosaic_0001>
module attributes {stable_mosaic.version = 11 : i64} {
  func.func @_image_branch_kernel(%arg0: memref<10x192xf32, #tpu.memory_space<vmem>>, %arg1: memref<192x32xf32, #tpu.memory_space<vmem>>, %arg2: memref<5x32xf32, #tpu.memory_space<vmem>>, %arg3: memref<1x32xf32, #tpu.memory_space<vmem>>, %arg4: memref<1x32xf32, #tpu.memory_space<vmem>>, %arg5: memref<1x32xf32, #tpu.memory_space<vmem>>, %arg6: memref<1x32xf32, #tpu.memory_space<vmem>>, %arg7: memref<32x96xf32, #tpu.memory_space<vmem>>, %arg8: memref<1x96xf32, #tpu.memory_space<vmem>>, %arg9: memref<32x32xf32, #tpu.memory_space<vmem>>, %arg10: memref<1x32xf32, #tpu.memory_space<vmem>>, %arg11: memref<1x32xf32, #tpu.memory_space<vmem>>, %arg12: memref<1x32xf32, #tpu.memory_space<vmem>>, %arg13: memref<32x128xf32, #tpu.memory_space<vmem>>, %arg14: memref<1x128xf32, #tpu.memory_space<vmem>>, %arg15: memref<128x32xf32, #tpu.memory_space<vmem>>, %arg16: memref<1x32xf32, #tpu.memory_space<vmem>>, %arg17: memref<1x32xf32, #tpu.memory_space<vmem>>, %arg18: memref<1x32xf32, #tpu.memory_space<vmem>>, %arg19: memref<32x96xf32, #tpu.memory_space<vmem>>, %arg20: memref<1x96xf32, #tpu.memory_space<vmem>>, %arg21: memref<32x32xf32, #tpu.memory_space<vmem>>, %arg22: memref<1x32xf32, #tpu.memory_space<vmem>>, %arg23: memref<1x32xf32, #tpu.memory_space<vmem>>, %arg24: memref<1x32xf32, #tpu.memory_space<vmem>>, %arg25: memref<32x128xf32, #tpu.memory_space<vmem>>, %arg26: memref<1x128xf32, #tpu.memory_space<vmem>>, %arg27: memref<128x32xf32, #tpu.memory_space<vmem>>, %arg28: memref<1x32xf32, #tpu.memory_space<vmem>>, %arg29: memref<1x32xf32, #tpu.memory_space<vmem>>, %arg30: memref<1x32xf32, #tpu.memory_space<vmem>>, %arg31: memref<32x32xf32, #tpu.memory_space<vmem>>, %arg32: memref<1x32xf32, #tpu.memory_space<vmem>>, %arg33: memref<1x32xf32, #tpu.memory_space<vmem>>, %arg34: memref<32x32xf32, #tpu.memory_space<vmem>>, %arg35: memref<32x256xf32, #tpu.memory_space<vmem>>, %arg36: memref<1x256xf32, #tpu.memory_space<vmem>>, %arg37: memref<1x32xf32, #tpu.memory_space<vmem>>, %arg38: memref<2x32xf32, #tpu.memory_space<vmem>>, %arg39: memref<2x32xf32, #tpu.memory_space<vmem>>, %arg40: memref<1x1xf32, #tpu.memory_space<vmem>>) attributes {dimension_semantics = [], scalar_prefetch = 0 : i64, scratch_operands = 0 : i64, tpu.core_type = #tpu.core_type<tc>} {
    %c0 = arith.constant 0 : index
    %c0_0 = arith.constant 0 : index
    %0 = vector.load %arg5[%c0, %c0_0] : memref<1x32xf32, #tpu.memory_space<vmem>>, vector<1x32xf32>
    %c0_1 = arith.constant 0 : index
    %c0_2 = arith.constant 0 : index
    %1 = vector.load %arg6[%c0_1, %c0_2] : memref<1x32xf32, #tpu.memory_space<vmem>>, vector<1x32xf32>
    %c0_3 = arith.constant 0 : index
    %c0_4 = arith.constant 0 : index
    %2 = vector.load %arg7[%c0_3, %c0_4] : memref<32x96xf32, #tpu.memory_space<vmem>>, vector<32x96xf32>
    %c0_5 = arith.constant 0 : index
    %c0_6 = arith.constant 0 : index
    %3 = vector.load %arg8[%c0_5, %c0_6] : memref<1x96xf32, #tpu.memory_space<vmem>>, vector<1x96xf32>
    %c0_7 = arith.constant 0 : index
    %c0_8 = arith.constant 0 : index
    %4 = vector.load %arg9[%c0_7, %c0_8] : memref<32x32xf32, #tpu.memory_space<vmem>>, vector<32x32xf32>
    %c0_9 = arith.constant 0 : index
    %c0_10 = arith.constant 0 : index
    %5 = vector.load %arg10[%c0_9, %c0_10] : memref<1x32xf32, #tpu.memory_space<vmem>>, vector<1x32xf32>
    %c0_11 = arith.constant 0 : index
    %c0_12 = arith.constant 0 : index
    %6 = vector.load %arg11[%c0_11, %c0_12] : memref<1x32xf32, #tpu.memory_space<vmem>>, vector<1x32xf32>
    %c0_13 = arith.constant 0 : index
    %c0_14 = arith.constant 0 : index
    %7 = vector.load %arg12[%c0_13, %c0_14] : memref<1x32xf32, #tpu.memory_space<vmem>>, vector<1x32xf32>
    %c0_15 = arith.constant 0 : index
    %c0_16 = arith.constant 0 : index
    %8 = vector.load %arg13[%c0_15, %c0_16] : memref<32x128xf32, #tpu.memory_space<vmem>>, vector<32x128xf32>
    %c0_17 = arith.constant 0 : index
    %c0_18 = arith.constant 0 : index
    %9 = vector.load %arg14[%c0_17, %c0_18] : memref<1x128xf32, #tpu.memory_space<vmem>>, vector<1x128xf32>
    %c0_19 = arith.constant 0 : index
    %c0_20 = arith.constant 0 : index
    %10 = vector.load %arg15[%c0_19, %c0_20] : memref<128x32xf32, #tpu.memory_space<vmem>>, vector<128x32xf32>
    %c0_21 = arith.constant 0 : index
    %c0_22 = arith.constant 0 : index
    %11 = vector.load %arg16[%c0_21, %c0_22] : memref<1x32xf32, #tpu.memory_space<vmem>>, vector<1x32xf32>
    %c0_23 = arith.constant 0 : index
    %c0_24 = arith.constant 0 : index
    %12 = vector.load %arg17[%c0_23, %c0_24] : memref<1x32xf32, #tpu.memory_space<vmem>>, vector<1x32xf32>
    %c0_25 = arith.constant 0 : index
    %c0_26 = arith.constant 0 : index
    %13 = vector.load %arg18[%c0_25, %c0_26] : memref<1x32xf32, #tpu.memory_space<vmem>>, vector<1x32xf32>
    %c0_27 = arith.constant 0 : index
    %c0_28 = arith.constant 0 : index
    %14 = vector.load %arg19[%c0_27, %c0_28] : memref<32x96xf32, #tpu.memory_space<vmem>>, vector<32x96xf32>
    %c0_29 = arith.constant 0 : index
    %c0_30 = arith.constant 0 : index
    %15 = vector.load %arg20[%c0_29, %c0_30] : memref<1x96xf32, #tpu.memory_space<vmem>>, vector<1x96xf32>
    %c0_31 = arith.constant 0 : index
    %c0_32 = arith.constant 0 : index
    %16 = vector.load %arg21[%c0_31, %c0_32] : memref<32x32xf32, #tpu.memory_space<vmem>>, vector<32x32xf32>
    %c0_33 = arith.constant 0 : index
    %c0_34 = arith.constant 0 : index
    %17 = vector.load %arg22[%c0_33, %c0_34] : memref<1x32xf32, #tpu.memory_space<vmem>>, vector<1x32xf32>
    %c0_35 = arith.constant 0 : index
    %c0_36 = arith.constant 0 : index
    %18 = vector.load %arg23[%c0_35, %c0_36] : memref<1x32xf32, #tpu.memory_space<vmem>>, vector<1x32xf32>
    %c0_37 = arith.constant 0 : index
    %c0_38 = arith.constant 0 : index
    %19 = vector.load %arg24[%c0_37, %c0_38] : memref<1x32xf32, #tpu.memory_space<vmem>>, vector<1x32xf32>
    %c0_39 = arith.constant 0 : index
    %c0_40 = arith.constant 0 : index
    %20 = vector.load %arg25[%c0_39, %c0_40] : memref<32x128xf32, #tpu.memory_space<vmem>>, vector<32x128xf32>
    %c0_41 = arith.constant 0 : index
    %c0_42 = arith.constant 0 : index
    %21 = vector.load %arg26[%c0_41, %c0_42] : memref<1x128xf32, #tpu.memory_space<vmem>>, vector<1x128xf32>
    %c0_43 = arith.constant 0 : index
    %c0_44 = arith.constant 0 : index
    %22 = vector.load %arg27[%c0_43, %c0_44] : memref<128x32xf32, #tpu.memory_space<vmem>>, vector<128x32xf32>
    %c0_45 = arith.constant 0 : index
    %c0_46 = arith.constant 0 : index
    %23 = vector.load %arg28[%c0_45, %c0_46] : memref<1x32xf32, #tpu.memory_space<vmem>>, vector<1x32xf32>
    %c0_47 = arith.constant 0 : index
    %c0_48 = arith.constant 0 : index
    %24 = vector.load %arg29[%c0_47, %c0_48] : memref<1x32xf32, #tpu.memory_space<vmem>>, vector<1x32xf32>
    %c0_49 = arith.constant 0 : index
    %c0_50 = arith.constant 0 : index
    %25 = vector.load %arg30[%c0_49, %c0_50] : memref<1x32xf32, #tpu.memory_space<vmem>>, vector<1x32xf32>
    %c0_51 = arith.constant 0 : index
    %c0_52 = arith.constant 0 : index
    %26 = vector.load %arg31[%c0_51, %c0_52] : memref<32x32xf32, #tpu.memory_space<vmem>>, vector<32x32xf32>
    %c0_53 = arith.constant 0 : index
    %c0_54 = arith.constant 0 : index
    %27 = vector.load %arg32[%c0_53, %c0_54] : memref<1x32xf32, #tpu.memory_space<vmem>>, vector<1x32xf32>
    %c0_55 = arith.constant 0 : index
    %c0_56 = arith.constant 0 : index
    %28 = vector.load %arg33[%c0_55, %c0_56] : memref<1x32xf32, #tpu.memory_space<vmem>>, vector<1x32xf32>
    %c0_57 = arith.constant 0 : index
    %c0_58 = arith.constant 0 : index
    %29 = vector.load %arg34[%c0_57, %c0_58] : memref<32x32xf32, #tpu.memory_space<vmem>>, vector<32x32xf32>
    %c0_59 = arith.constant 0 : index
    %c0_60 = arith.constant 0 : index
    %30 = vector.load %arg35[%c0_59, %c0_60] : memref<32x256xf32, #tpu.memory_space<vmem>>, vector<32x256xf32>
    %c0_61 = arith.constant 0 : index
    %c0_62 = arith.constant 0 : index
    %31 = vector.load %arg36[%c0_61, %c0_62] : memref<1x256xf32, #tpu.memory_space<vmem>>, vector<1x256xf32>
    %c0_63 = arith.constant 0 : index
    %c0_64 = arith.constant 0 : index
    %32 = vector.load %arg37[%c0_63, %c0_64] : memref<1x32xf32, #tpu.memory_space<vmem>>, vector<1x32xf32>
    %c0_65 = arith.constant 0 : index
    %c0_66 = arith.constant 0 : index
    %33 = vector.load %arg0[%c0_65, %c0_66] : memref<10x192xf32, #tpu.memory_space<vmem>>, vector<10x192xf32>
    %c0_67 = arith.constant 0 : index
    %c0_68 = arith.constant 0 : index
    %34 = vector.load %arg1[%c0_67, %c0_68] : memref<192x32xf32, #tpu.memory_space<vmem>>, vector<192x32xf32>
    %35 = arith.truncf %33 : vector<10x192xf32> to vector<10x192xbf16>
    %36 = arith.truncf %34 : vector<192x32xf32> to vector<192x32xbf16>
    %cst = arith.constant dense<0.000000e+00> : vector<10x32xf32>
    %37 = tpu.matmul %35, %36, %cst {dimension_numbers = #tpu.dot_dimension_numbers<[1], [0], [0], [1], [0, 0, 1, 1], [], []>} : vector<10x192xbf16>, vector<192x32xbf16>, vector<10x32xf32> -> vector<10x32xf32>
    %38 = vector.shape_cast %37 : vector<10x32xf32> to vector<2x5x32xf32>
    %c0_69 = arith.constant 0 : index
    %c0_70 = arith.constant 0 : index
    %39 = vector.load %arg2[%c0_69, %c0_70] : memref<5x32xf32, #tpu.memory_space<vmem>>, vector<5x32xf32>
    %40 = vector.shape_cast %39 : vector<5x32xf32> to vector<1x5x32xf32>
    %41 = vector.broadcast %40 : vector<1x5x32xf32> to vector<2x5x32xf32>
    %42 = arith.addf %38, %41 : vector<2x5x32xf32>
    %43 = vector.shape_cast %42 : vector<2x5x32xf32> to vector<10x32xf32>
    %c0_71 = arith.constant 0 : index
    %c0_72 = arith.constant 0 : index
    %44 = vector.load %arg3[%c0_71, %c0_72] : memref<1x32xf32, #tpu.memory_space<vmem>>, vector<1x32xf32>
    %c0_73 = arith.constant 0 : index
    %c0_74 = arith.constant 0 : index
    %45 = vector.load %arg4[%c0_73, %c0_74] : memref<1x32xf32, #tpu.memory_space<vmem>>, vector<1x32xf32>
    %cst_75 = arith.constant dense<0.000000e+00> : vector<10xf32>
    %46 = vector.multi_reduction <add>, %43, %cst_75 [1] : vector<10x32xf32> to vector<10xf32>
    %47 = vector.shape_cast %46 : vector<10xf32> to vector<10x1xf32>
    %cst_76 = arith.constant 3.200000e+01 : f32
    %48 = vector.broadcast %cst_76 : f32 to vector<10x1xf32>
    %49 = arith.divf %47, %48 : vector<10x1xf32>
    %50 = vector.broadcast %49 : vector<10x1xf32> to vector<10x32xf32>
    %51 = arith.subf %43, %50 : vector<10x32xf32>
    %52 = arith.mulf %51, %51 : vector<10x32xf32>
    %cst_77 = arith.constant dense<0.000000e+00> : vector<10xf32>
    %53 = vector.multi_reduction <add>, %52, %cst_77 [1] : vector<10x32xf32> to vector<10xf32>
    %54 = vector.shape_cast %53 : vector<10xf32> to vector<10x1xf32>
    %cst_78 = arith.constant 3.200000e+01 : f32
    %55 = vector.broadcast %cst_78 : f32 to vector<10x1xf32>
    %56 = arith.divf %54, %55 : vector<10x1xf32>
    %57 = vector.broadcast %49 : vector<10x1xf32> to vector<10x32xf32>
    %58 = arith.subf %43, %57 : vector<10x32xf32>
    %cst_79 = arith.constant 9.99999974E-6 : f32
    %59 = vector.broadcast %cst_79 : f32 to vector<10x1xf32>
    %60 = arith.addf %56, %59 : vector<10x1xf32>
    %61 = math.rsqrt %60 : vector<10x1xf32>
    %62 = vector.broadcast %61 : vector<10x1xf32> to vector<10x32xf32>
    %63 = arith.mulf %58, %62 : vector<10x32xf32>
    %64 = vector.broadcast %44 : vector<1x32xf32> to vector<10x32xf32>
    %65 = arith.mulf %63, %64 : vector<10x32xf32>
    %66 = vector.broadcast %45 : vector<1x32xf32> to vector<10x32xf32>
    %67 = arith.addf %65, %66 : vector<10x32xf32>
    %cst_80 = arith.constant dense<0.000000e+00> : vector<10xf32>
    %68 = vector.multi_reduction <add>, %67, %cst_80 [1] : vector<10x32xf32> to vector<10xf32>
    %69 = vector.shape_cast %68 : vector<10xf32> to vector<10x1xf32>
    %cst_81 = arith.constant 3.200000e+01 : f32
    %70 = vector.broadcast %cst_81 : f32 to vector<10x1xf32>
    %71 = arith.divf %69, %70 : vector<10x1xf32>
    %72 = vector.broadcast %71 : vector<10x1xf32> to vector<10x32xf32>
    %73 = arith.subf %67, %72 : vector<10x32xf32>
    %74 = arith.mulf %73, %73 : vector<10x32xf32>
    %cst_82 = arith.constant dense<0.000000e+00> : vector<10xf32>
    %75 = vector.multi_reduction <add>, %74, %cst_82 [1] : vector<10x32xf32> to vector<10xf32>
    %76 = vector.shape_cast %75 : vector<10xf32> to vector<10x1xf32>
    %cst_83 = arith.constant 3.200000e+01 : f32
    %77 = vector.broadcast %cst_83 : f32 to vector<10x1xf32>
    %78 = arith.divf %76, %77 : vector<10x1xf32>
    %79 = vector.broadcast %71 : vector<10x1xf32> to vector<10x32xf32>
    %80 = arith.subf %67, %79 : vector<10x32xf32>
    %cst_84 = arith.constant 9.99999974E-6 : f32
    %81 = vector.broadcast %cst_84 : f32 to vector<10x1xf32>
    %82 = arith.addf %78, %81 : vector<10x1xf32>
    %83 = math.rsqrt %82 : vector<10x1xf32>
    %84 = vector.broadcast %83 : vector<10x1xf32> to vector<10x32xf32>
    %85 = arith.mulf %80, %84 : vector<10x32xf32>
    %86 = vector.broadcast %12 : vector<1x32xf32> to vector<10x32xf32>
    %87 = arith.mulf %85, %86 : vector<10x32xf32>
    %88 = vector.broadcast %13 : vector<1x32xf32> to vector<10x32xf32>
    %89 = arith.addf %87, %88 : vector<10x32xf32>
    %90 = arith.truncf %89 : vector<10x32xf32> to vector<10x32xbf16>
    %91 = arith.truncf %14 : vector<32x96xf32> to vector<32x96xbf16>
    %cst_85 = arith.constant dense<0.000000e+00> : vector<10x96xf32>
    %92 = tpu.matmul %90, %91, %cst_85 {dimension_numbers = #tpu.dot_dimension_numbers<[1], [0], [0], [1], [0, 0, 1, 1], [], []>} : vector<10x32xbf16>, vector<32x96xbf16>, vector<10x96xf32> -> vector<10x96xf32>
    %93 = vector.broadcast %15 : vector<1x96xf32> to vector<10x96xf32>
    %94 = arith.addf %92, %93 : vector<10x96xf32>
    %95 = vector.extract_strided_slice %94 {offsets = [0, 0], sizes = [10, 32], strides = [1, 1]} : vector<10x96xf32> to vector<10x32xf32>
    %96 = vector.shape_cast %95 : vector<10x32xf32> to vector<2x5x32xf32>
    %97 = vector.extract_strided_slice %94 {offsets = [0, 32], sizes = [10, 32], strides = [1, 1]} : vector<10x96xf32> to vector<10x32xf32>
    %98 = vector.shape_cast %97 : vector<10x32xf32> to vector<2x5x32xf32>
    %99 = vector.extract_strided_slice %94 {offsets = [0, 64], sizes = [10, 32], strides = [1, 1]} : vector<10x96xf32> to vector<10x32xf32>
    %100 = vector.shape_cast %99 : vector<10x32xf32> to vector<2x5x32xf32>
    %101 = tpu.iota {dimensions = array<i32: 2>} : vector<2x5x32xi32>
    %cst_86 = arith.constant 0.000000e+00 : f32
    %102 = vector.broadcast %cst_86 : f32 to vector<2x5x32xf32>
    %103 = vector.extract_strided_slice %96 {offsets = [0, 0, 0], sizes = [2, 5, 16], strides = [1, 1, 1]} : vector<2x5x32xf32> to vector<2x5x16xf32>
    %104 = vector.extract_strided_slice %98 {offsets = [0, 0, 0], sizes = [2, 5, 16], strides = [1, 1, 1]} : vector<2x5x32xf32> to vector<2x5x16xf32>
    "tpu.trace_start"() <{level = 10 : i32, message = "bqd,bkd->bqk"}> : () -> ()
    %cst_87 = arith.constant dense<0.000000e+00> : vector<2x5x5xf32>
    %105 = tpu.matmul %103, %104, %cst_87 {dimension_numbers = #tpu.dot_dimension_numbers<[2], [2], [1], [1], [0, 0, 0, 1, 1, 1], [0], [0]>} : vector<2x5x16xf32>, vector<2x5x16xf32>, vector<2x5x5xf32> -> vector<2x5x5xf32>
    "tpu.trace_stop"() : () -> ()
    %cst_88 = arith.constant 2.500000e-01 : f32
    %106 = vector.broadcast %cst_88 : f32 to vector<2x5x5xf32>
    %107 = arith.mulf %105, %106 : vector<2x5x5xf32>
    %cst_89 = arith.constant dense<0xFF800000> : vector<2x5xf32>
    %108 = vector.multi_reduction <maximumf>, %107, %cst_89 [2] : vector<2x5x5xf32> to vector<2x5xf32>
    %109 = vector.shape_cast %108 : vector<2x5xf32> to vector<2x5x1xf32>
    %110 = vector.broadcast %109 : vector<2x5x1xf32> to vector<2x5x5xf32>
    %111 = arith.subf %107, %110 : vector<2x5x5xf32>
    %112 = math.exp %111 : vector<2x5x5xf32>
    %cst_90 = arith.constant dense<0.000000e+00> : vector<2x5xf32>
    %113 = vector.multi_reduction <add>, %112, %cst_90 [2] : vector<2x5x5xf32> to vector<2x5xf32>
    %114 = vector.shape_cast %113 : vector<2x5xf32> to vector<2x5x1xf32>
    %115 = vector.broadcast %114 : vector<2x5x1xf32> to vector<2x5x5xf32>
    %116 = arith.divf %112, %115 : vector<2x5x5xf32>
    %c0_i32 = arith.constant 0 : i32
    %117 = vector.broadcast %c0_i32 : i32 to vector<2x5x32xi32>
    %118 = arith.cmpi sge, %101, %117 : vector<2x5x32xi32>
    %c16_i32 = arith.constant 16 : i32
    %119 = vector.broadcast %c16_i32 : i32 to vector<2x5x32xi32>
    %120 = arith.cmpi slt, %101, %119 : vector<2x5x32xi32>
    %121 = arith.andi %118, %120 : vector<2x5x32xi1>
    %cst_91 = arith.constant 0.000000e+00 : f32
    %122 = vector.broadcast %cst_91 : f32 to vector<2x5x32xf32>
    %123 = arith.select %121, %100, %122 : vector<2x5x32xi1>, vector<2x5x32xf32>
    "tpu.trace_start"() <{level = 10 : i32, message = "bqk,bkd->bqd"}> : () -> ()
    %cst_92 = arith.constant dense<0.000000e+00> : vector<2x5x32xf32>
    %124 = tpu.matmul %116, %123, %cst_92 {dimension_numbers = #tpu.dot_dimension_numbers<[2], [1], [1], [2], [0, 0, 0, 1, 1, 2], [0], [0]>} : vector<2x5x5xf32>, vector<2x5x32xf32>, vector<2x5x32xf32> -> vector<2x5x32xf32>
    "tpu.trace_stop"() : () -> ()
    %125 = arith.addf %102, %124 : vector<2x5x32xf32>
    %126 = vector.extract_strided_slice %96 {offsets = [0, 0, 16], sizes = [2, 5, 16], strides = [1, 1, 1]} : vector<2x5x32xf32> to vector<2x5x16xf32>
    %127 = vector.extract_strided_slice %98 {offsets = [0, 0, 16], sizes = [2, 5, 16], strides = [1, 1, 1]} : vector<2x5x32xf32> to vector<2x5x16xf32>
    "tpu.trace_start"() <{level = 10 : i32, message = "bqd,bkd->bqk"}> : () -> ()
    %cst_93 = arith.constant dense<0.000000e+00> : vector<2x5x5xf32>
    %128 = tpu.matmul %126, %127, %cst_93 {dimension_numbers = #tpu.dot_dimension_numbers<[2], [2], [1], [1], [0, 0, 0, 1, 1, 1], [0], [0]>} : vector<2x5x16xf32>, vector<2x5x16xf32>, vector<2x5x5xf32> -> vector<2x5x5xf32>
    "tpu.trace_stop"() : () -> ()
    %cst_94 = arith.constant 2.500000e-01 : f32
    %129 = vector.broadcast %cst_94 : f32 to vector<2x5x5xf32>
    %130 = arith.mulf %128, %129 : vector<2x5x5xf32>
    %cst_95 = arith.constant dense<0xFF800000> : vector<2x5xf32>
    %131 = vector.multi_reduction <maximumf>, %130, %cst_95 [2] : vector<2x5x5xf32> to vector<2x5xf32>
    %132 = vector.shape_cast %131 : vector<2x5xf32> to vector<2x5x1xf32>
    %133 = vector.broadcast %132 : vector<2x5x1xf32> to vector<2x5x5xf32>
    %134 = arith.subf %130, %133 : vector<2x5x5xf32>
    %135 = math.exp %134 : vector<2x5x5xf32>
    %cst_96 = arith.constant dense<0.000000e+00> : vector<2x5xf32>
    %136 = vector.multi_reduction <add>, %135, %cst_96 [2] : vector<2x5x5xf32> to vector<2x5xf32>
    %137 = vector.shape_cast %136 : vector<2x5xf32> to vector<2x5x1xf32>
    %138 = vector.broadcast %137 : vector<2x5x1xf32> to vector<2x5x5xf32>
    %139 = arith.divf %135, %138 : vector<2x5x5xf32>
    %c16_i32_97 = arith.constant 16 : i32
    %140 = vector.broadcast %c16_i32_97 : i32 to vector<2x5x32xi32>
    %141 = arith.cmpi sge, %101, %140 : vector<2x5x32xi32>
    %c32_i32 = arith.constant 32 : i32
    %142 = vector.broadcast %c32_i32 : i32 to vector<2x5x32xi32>
    %143 = arith.cmpi slt, %101, %142 : vector<2x5x32xi32>
    %144 = arith.andi %141, %143 : vector<2x5x32xi1>
    %cst_98 = arith.constant 0.000000e+00 : f32
    %145 = vector.broadcast %cst_98 : f32 to vector<2x5x32xf32>
    %146 = arith.select %144, %100, %145 : vector<2x5x32xi1>, vector<2x5x32xf32>
    "tpu.trace_start"() <{level = 10 : i32, message = "bqk,bkd->bqd"}> : () -> ()
    %cst_99 = arith.constant dense<0.000000e+00> : vector<2x5x32xf32>
    %147 = tpu.matmul %139, %146, %cst_99 {dimension_numbers = #tpu.dot_dimension_numbers<[2], [1], [1], [2], [0, 0, 0, 1, 1, 2], [0], [0]>} : vector<2x5x5xf32>, vector<2x5x32xf32>, vector<2x5x32xf32> -> vector<2x5x32xf32>
    "tpu.trace_stop"() : () -> ()
    %148 = arith.addf %125, %147 : vector<2x5x32xf32>
    %149 = vector.shape_cast %148 : vector<2x5x32xf32> to vector<10x32xf32>
    %150 = arith.truncf %149 : vector<10x32xf32> to vector<10x32xbf16>
    %151 = arith.truncf %16 : vector<32x32xf32> to vector<32x32xbf16>
    %cst_100 = arith.constant dense<0.000000e+00> : vector<10x32xf32>
    %152 = tpu.matmul %150, %151, %cst_100 {dimension_numbers = #tpu.dot_dimension_numbers<[1], [0], [0], [1], [0, 0, 1, 1], [], []>} : vector<10x32xbf16>, vector<32x32xbf16>, vector<10x32xf32> -> vector<10x32xf32>
    %153 = arith.addf %67, %152 : vector<10x32xf32>
    %154 = vector.broadcast %17 : vector<1x32xf32> to vector<10x32xf32>
    %155 = arith.addf %153, %154 : vector<10x32xf32>
    %cst_101 = arith.constant dense<0.000000e+00> : vector<10xf32>
    %156 = vector.multi_reduction <add>, %155, %cst_101 [1] : vector<10x32xf32> to vector<10xf32>
    %157 = vector.shape_cast %156 : vector<10xf32> to vector<10x1xf32>
    %cst_102 = arith.constant 3.200000e+01 : f32
    %158 = vector.broadcast %cst_102 : f32 to vector<10x1xf32>
    %159 = arith.divf %157, %158 : vector<10x1xf32>
    %160 = vector.broadcast %159 : vector<10x1xf32> to vector<10x32xf32>
    %161 = arith.subf %155, %160 : vector<10x32xf32>
    %162 = arith.mulf %161, %161 : vector<10x32xf32>
    %cst_103 = arith.constant dense<0.000000e+00> : vector<10xf32>
    %163 = vector.multi_reduction <add>, %162, %cst_103 [1] : vector<10x32xf32> to vector<10xf32>
    %164 = vector.shape_cast %163 : vector<10xf32> to vector<10x1xf32>
    %cst_104 = arith.constant 3.200000e+01 : f32
    %165 = vector.broadcast %cst_104 : f32 to vector<10x1xf32>
    %166 = arith.divf %164, %165 : vector<10x1xf32>
    %167 = vector.broadcast %159 : vector<10x1xf32> to vector<10x32xf32>
    %168 = arith.subf %155, %167 : vector<10x32xf32>
    %cst_105 = arith.constant 9.99999974E-6 : f32
    %169 = vector.broadcast %cst_105 : f32 to vector<10x1xf32>
    %170 = arith.addf %166, %169 : vector<10x1xf32>
    %171 = math.rsqrt %170 : vector<10x1xf32>
    %172 = vector.broadcast %171 : vector<10x1xf32> to vector<10x32xf32>
    %173 = arith.mulf %168, %172 : vector<10x32xf32>
    %174 = vector.broadcast %18 : vector<1x32xf32> to vector<10x32xf32>
    %175 = arith.mulf %173, %174 : vector<10x32xf32>
    %176 = vector.broadcast %19 : vector<1x32xf32> to vector<10x32xf32>
    %177 = arith.addf %175, %176 : vector<10x32xf32>
    %178 = arith.truncf %177 : vector<10x32xf32> to vector<10x32xbf16>
    %179 = arith.truncf %20 : vector<32x128xf32> to vector<32x128xbf16>
    %cst_106 = arith.constant dense<0.000000e+00> : vector<10x128xf32>
    %180 = tpu.matmul %178, %179, %cst_106 {dimension_numbers = #tpu.dot_dimension_numbers<[1], [0], [0], [1], [0, 0, 1, 1], [], []>} : vector<10x32xbf16>, vector<32x128xbf16>, vector<10x128xf32> -> vector<10x128xf32>
    %181 = vector.broadcast %21 : vector<1x128xf32> to vector<10x128xf32>
    %182 = arith.addf %180, %181 : vector<10x128xf32>
    %183 = arith.mulf %182, %182 : vector<10x128xf32>
    %184 = arith.mulf %182, %183 : vector<10x128xf32>
    %cst_107 = arith.constant 4.471500e-02 : f32
    %185 = vector.broadcast %cst_107 : f32 to vector<10x128xf32>
    %186 = arith.mulf %185, %184 : vector<10x128xf32>
    %187 = arith.addf %182, %186 : vector<10x128xf32>
    %cst_108 = arith.constant 0.797884583 : f32
    %188 = vector.broadcast %cst_108 : f32 to vector<10x128xf32>
    %189 = arith.mulf %188, %187 : vector<10x128xf32>
    %190 = math.tanh %189 : vector<10x128xf32>
    %cst_109 = arith.constant 1.000000e+00 : f32
    %191 = vector.broadcast %cst_109 : f32 to vector<10x128xf32>
    %192 = arith.addf %191, %190 : vector<10x128xf32>
    %cst_110 = arith.constant 5.000000e-01 : f32
    %193 = vector.broadcast %cst_110 : f32 to vector<10x128xf32>
    %194 = arith.mulf %193, %192 : vector<10x128xf32>
    %195 = arith.mulf %182, %194 : vector<10x128xf32>
    %196 = arith.truncf %195 : vector<10x128xf32> to vector<10x128xbf16>
    %197 = arith.truncf %22 : vector<128x32xf32> to vector<128x32xbf16>
    %cst_111 = arith.constant dense<0.000000e+00> : vector<10x32xf32>
    %198 = tpu.matmul %196, %197, %cst_111 {dimension_numbers = #tpu.dot_dimension_numbers<[1], [0], [0], [1], [0, 0, 1, 1], [], []>} : vector<10x128xbf16>, vector<128x32xbf16>, vector<10x32xf32> -> vector<10x32xf32>
    %199 = arith.addf %155, %198 : vector<10x32xf32>
    %200 = vector.broadcast %23 : vector<1x32xf32> to vector<10x32xf32>
    %201 = arith.addf %199, %200 : vector<10x32xf32>
    %cst_112 = arith.constant dense<0.000000e+00> : vector<10xf32>
    %202 = vector.multi_reduction <add>, %67, %cst_112 [1] : vector<10x32xf32> to vector<10xf32>
    %203 = vector.shape_cast %202 : vector<10xf32> to vector<10x1xf32>
    %cst_113 = arith.constant 3.200000e+01 : f32
    %204 = vector.broadcast %cst_113 : f32 to vector<10x1xf32>
    %205 = arith.divf %203, %204 : vector<10x1xf32>
    %206 = vector.broadcast %205 : vector<10x1xf32> to vector<10x32xf32>
    %207 = arith.subf %67, %206 : vector<10x32xf32>
    %208 = arith.mulf %207, %207 : vector<10x32xf32>
    %cst_114 = arith.constant dense<0.000000e+00> : vector<10xf32>
    %209 = vector.multi_reduction <add>, %208, %cst_114 [1] : vector<10x32xf32> to vector<10xf32>
    %210 = vector.shape_cast %209 : vector<10xf32> to vector<10x1xf32>
    %cst_115 = arith.constant 3.200000e+01 : f32
    %211 = vector.broadcast %cst_115 : f32 to vector<10x1xf32>
    %212 = arith.divf %210, %211 : vector<10x1xf32>
    %213 = vector.broadcast %205 : vector<10x1xf32> to vector<10x32xf32>
    %214 = arith.subf %67, %213 : vector<10x32xf32>
    %cst_116 = arith.constant 9.99999974E-6 : f32
    %215 = vector.broadcast %cst_116 : f32 to vector<10x1xf32>
    %216 = arith.addf %212, %215 : vector<10x1xf32>
    %217 = math.rsqrt %216 : vector<10x1xf32>
    %218 = vector.broadcast %217 : vector<10x1xf32> to vector<10x32xf32>
    %219 = arith.mulf %214, %218 : vector<10x32xf32>
    %220 = vector.broadcast %0 : vector<1x32xf32> to vector<10x32xf32>
    %221 = arith.mulf %219, %220 : vector<10x32xf32>
    %222 = vector.broadcast %1 : vector<1x32xf32> to vector<10x32xf32>
    %223 = arith.addf %221, %222 : vector<10x32xf32>
    %224 = arith.truncf %223 : vector<10x32xf32> to vector<10x32xbf16>
    %225 = arith.truncf %2 : vector<32x96xf32> to vector<32x96xbf16>
    %cst_117 = arith.constant dense<0.000000e+00> : vector<10x96xf32>
    %226 = tpu.matmul %224, %225, %cst_117 {dimension_numbers = #tpu.dot_dimension_numbers<[1], [0], [0], [1], [0, 0, 1, 1], [], []>} : vector<10x32xbf16>, vector<32x96xbf16>, vector<10x96xf32> -> vector<10x96xf32>
    %227 = vector.broadcast %3 : vector<1x96xf32> to vector<10x96xf32>
    %228 = arith.addf %226, %227 : vector<10x96xf32>
    %229 = vector.extract_strided_slice %228 {offsets = [0, 0], sizes = [10, 32], strides = [1, 1]} : vector<10x96xf32> to vector<10x32xf32>
    %230 = vector.shape_cast %229 : vector<10x32xf32> to vector<2x5x32xf32>
    %231 = vector.extract_strided_slice %228 {offsets = [0, 32], sizes = [10, 32], strides = [1, 1]} : vector<10x96xf32> to vector<10x32xf32>
    %232 = vector.shape_cast %231 : vector<10x32xf32> to vector<2x5x32xf32>
    %233 = vector.extract_strided_slice %228 {offsets = [0, 64], sizes = [10, 32], strides = [1, 1]} : vector<10x96xf32> to vector<10x32xf32>
    %234 = vector.shape_cast %233 : vector<10x32xf32> to vector<2x5x32xf32>
    %235 = tpu.iota {dimensions = array<i32: 2>} : vector<2x5x32xi32>
    %cst_118 = arith.constant 0.000000e+00 : f32
    %236 = vector.broadcast %cst_118 : f32 to vector<2x5x32xf32>
    %237 = vector.extract_strided_slice %230 {offsets = [0, 0, 0], sizes = [2, 5, 16], strides = [1, 1, 1]} : vector<2x5x32xf32> to vector<2x5x16xf32>
    %238 = vector.extract_strided_slice %232 {offsets = [0, 0, 0], sizes = [2, 5, 16], strides = [1, 1, 1]} : vector<2x5x32xf32> to vector<2x5x16xf32>
    "tpu.trace_start"() <{level = 10 : i32, message = "bqd,bkd->bqk"}> : () -> ()
    %cst_119 = arith.constant dense<0.000000e+00> : vector<2x5x5xf32>
    %239 = tpu.matmul %237, %238, %cst_119 {dimension_numbers = #tpu.dot_dimension_numbers<[2], [2], [1], [1], [0, 0, 0, 1, 1, 1], [0], [0]>} : vector<2x5x16xf32>, vector<2x5x16xf32>, vector<2x5x5xf32> -> vector<2x5x5xf32>
    "tpu.trace_stop"() : () -> ()
    %cst_120 = arith.constant 2.500000e-01 : f32
    %240 = vector.broadcast %cst_120 : f32 to vector<2x5x5xf32>
    %241 = arith.mulf %239, %240 : vector<2x5x5xf32>
    %cst_121 = arith.constant dense<0xFF800000> : vector<2x5xf32>
    %242 = vector.multi_reduction <maximumf>, %241, %cst_121 [2] : vector<2x5x5xf32> to vector<2x5xf32>
    %243 = vector.shape_cast %242 : vector<2x5xf32> to vector<2x5x1xf32>
    %244 = vector.broadcast %243 : vector<2x5x1xf32> to vector<2x5x5xf32>
    %245 = arith.subf %241, %244 : vector<2x5x5xf32>
    %246 = math.exp %245 : vector<2x5x5xf32>
    %cst_122 = arith.constant dense<0.000000e+00> : vector<2x5xf32>
    %247 = vector.multi_reduction <add>, %246, %cst_122 [2] : vector<2x5x5xf32> to vector<2x5xf32>
    %248 = vector.shape_cast %247 : vector<2x5xf32> to vector<2x5x1xf32>
    %249 = vector.broadcast %248 : vector<2x5x1xf32> to vector<2x5x5xf32>
    %250 = arith.divf %246, %249 : vector<2x5x5xf32>
    %c0_i32_123 = arith.constant 0 : i32
    %251 = vector.broadcast %c0_i32_123 : i32 to vector<2x5x32xi32>
    %252 = arith.cmpi sge, %235, %251 : vector<2x5x32xi32>
    %c16_i32_124 = arith.constant 16 : i32
    %253 = vector.broadcast %c16_i32_124 : i32 to vector<2x5x32xi32>
    %254 = arith.cmpi slt, %235, %253 : vector<2x5x32xi32>
    %255 = arith.andi %252, %254 : vector<2x5x32xi1>
    %cst_125 = arith.constant 0.000000e+00 : f32
    %256 = vector.broadcast %cst_125 : f32 to vector<2x5x32xf32>
    %257 = arith.select %255, %234, %256 : vector<2x5x32xi1>, vector<2x5x32xf32>
    "tpu.trace_start"() <{level = 10 : i32, message = "bqk,bkd->bqd"}> : () -> ()
    %cst_126 = arith.constant dense<0.000000e+00> : vector<2x5x32xf32>
    %258 = tpu.matmul %250, %257, %cst_126 {dimension_numbers = #tpu.dot_dimension_numbers<[2], [1], [1], [2], [0, 0, 0, 1, 1, 2], [0], [0]>} : vector<2x5x5xf32>, vector<2x5x32xf32>, vector<2x5x32xf32> -> vector<2x5x32xf32>
    "tpu.trace_stop"() : () -> ()
    %259 = arith.addf %236, %258 : vector<2x5x32xf32>
    %260 = vector.extract_strided_slice %230 {offsets = [0, 0, 16], sizes = [2, 5, 16], strides = [1, 1, 1]} : vector<2x5x32xf32> to vector<2x5x16xf32>
    %261 = vector.extract_strided_slice %232 {offsets = [0, 0, 16], sizes = [2, 5, 16], strides = [1, 1, 1]} : vector<2x5x32xf32> to vector<2x5x16xf32>
    "tpu.trace_start"() <{level = 10 : i32, message = "bqd,bkd->bqk"}> : () -> ()
    %cst_127 = arith.constant dense<0.000000e+00> : vector<2x5x5xf32>
    %262 = tpu.matmul %260, %261, %cst_127 {dimension_numbers = #tpu.dot_dimension_numbers<[2], [2], [1], [1], [0, 0, 0, 1, 1, 1], [0], [0]>} : vector<2x5x16xf32>, vector<2x5x16xf32>, vector<2x5x5xf32> -> vector<2x5x5xf32>
    "tpu.trace_stop"() : () -> ()
    %cst_128 = arith.constant 2.500000e-01 : f32
    %263 = vector.broadcast %cst_128 : f32 to vector<2x5x5xf32>
    %264 = arith.mulf %262, %263 : vector<2x5x5xf32>
    %cst_129 = arith.constant dense<0xFF800000> : vector<2x5xf32>
    %265 = vector.multi_reduction <maximumf>, %264, %cst_129 [2] : vector<2x5x5xf32> to vector<2x5xf32>
    %266 = vector.shape_cast %265 : vector<2x5xf32> to vector<2x5x1xf32>
    %267 = vector.broadcast %266 : vector<2x5x1xf32> to vector<2x5x5xf32>
    %268 = arith.subf %264, %267 : vector<2x5x5xf32>
    %269 = math.exp %268 : vector<2x5x5xf32>
    %cst_130 = arith.constant dense<0.000000e+00> : vector<2x5xf32>
    %270 = vector.multi_reduction <add>, %269, %cst_130 [2] : vector<2x5x5xf32> to vector<2x5xf32>
    %271 = vector.shape_cast %270 : vector<2x5xf32> to vector<2x5x1xf32>
    %272 = vector.broadcast %271 : vector<2x5x1xf32> to vector<2x5x5xf32>
    %273 = arith.divf %269, %272 : vector<2x5x5xf32>
    %c16_i32_131 = arith.constant 16 : i32
    %274 = vector.broadcast %c16_i32_131 : i32 to vector<2x5x32xi32>
    %275 = arith.cmpi sge, %235, %274 : vector<2x5x32xi32>
    %c32_i32_132 = arith.constant 32 : i32
    %276 = vector.broadcast %c32_i32_132 : i32 to vector<2x5x32xi32>
    %277 = arith.cmpi slt, %235, %276 : vector<2x5x32xi32>
    %278 = arith.andi %275, %277 : vector<2x5x32xi1>
    %cst_133 = arith.constant 0.000000e+00 : f32
    %279 = vector.broadcast %cst_133 : f32 to vector<2x5x32xf32>
    %280 = arith.select %278, %234, %279 : vector<2x5x32xi1>, vector<2x5x32xf32>
    "tpu.trace_start"() <{level = 10 : i32, message = "bqk,bkd->bqd"}> : () -> ()
    %cst_134 = arith.constant dense<0.000000e+00> : vector<2x5x32xf32>
    %281 = tpu.matmul %273, %280, %cst_134 {dimension_numbers = #tpu.dot_dimension_numbers<[2], [1], [1], [2], [0, 0, 0, 1, 1, 2], [0], [0]>} : vector<2x5x5xf32>, vector<2x5x32xf32>, vector<2x5x32xf32> -> vector<2x5x32xf32>
    "tpu.trace_stop"() : () -> ()
    %282 = arith.addf %259, %281 : vector<2x5x32xf32>
    %283 = vector.shape_cast %282 : vector<2x5x32xf32> to vector<10x32xf32>
    %284 = arith.truncf %283 : vector<10x32xf32> to vector<10x32xbf16>
    %285 = arith.truncf %4 : vector<32x32xf32> to vector<32x32xbf16>
    %cst_135 = arith.constant dense<0.000000e+00> : vector<10x32xf32>
    %286 = tpu.matmul %284, %285, %cst_135 {dimension_numbers = #tpu.dot_dimension_numbers<[1], [0], [0], [1], [0, 0, 1, 1], [], []>} : vector<10x32xbf16>, vector<32x32xbf16>, vector<10x32xf32> -> vector<10x32xf32>
    %287 = arith.addf %67, %286 : vector<10x32xf32>
    %288 = vector.broadcast %5 : vector<1x32xf32> to vector<10x32xf32>
    %289 = arith.addf %287, %288 : vector<10x32xf32>
    %cst_136 = arith.constant dense<0.000000e+00> : vector<10xf32>
    %290 = vector.multi_reduction <add>, %289, %cst_136 [1] : vector<10x32xf32> to vector<10xf32>
    %291 = vector.shape_cast %290 : vector<10xf32> to vector<10x1xf32>
    %cst_137 = arith.constant 3.200000e+01 : f32
    %292 = vector.broadcast %cst_137 : f32 to vector<10x1xf32>
    %293 = arith.divf %291, %292 : vector<10x1xf32>
    %294 = vector.broadcast %293 : vector<10x1xf32> to vector<10x32xf32>
    %295 = arith.subf %289, %294 : vector<10x32xf32>
    %296 = arith.mulf %295, %295 : vector<10x32xf32>
    %cst_138 = arith.constant dense<0.000000e+00> : vector<10xf32>
    %297 = vector.multi_reduction <add>, %296, %cst_138 [1] : vector<10x32xf32> to vector<10xf32>
    %298 = vector.shape_cast %297 : vector<10xf32> to vector<10x1xf32>
    %cst_139 = arith.constant 3.200000e+01 : f32
    %299 = vector.broadcast %cst_139 : f32 to vector<10x1xf32>
    %300 = arith.divf %298, %299 : vector<10x1xf32>
    %301 = vector.broadcast %293 : vector<10x1xf32> to vector<10x32xf32>
    %302 = arith.subf %289, %301 : vector<10x32xf32>
    %cst_140 = arith.constant 9.99999974E-6 : f32
    %303 = vector.broadcast %cst_140 : f32 to vector<10x1xf32>
    %304 = arith.addf %300, %303 : vector<10x1xf32>
    %305 = math.rsqrt %304 : vector<10x1xf32>
    %306 = vector.broadcast %305 : vector<10x1xf32> to vector<10x32xf32>
    %307 = arith.mulf %302, %306 : vector<10x32xf32>
    %308 = vector.broadcast %6 : vector<1x32xf32> to vector<10x32xf32>
    %309 = arith.mulf %307, %308 : vector<10x32xf32>
    %310 = vector.broadcast %7 : vector<1x32xf32> to vector<10x32xf32>
    %311 = arith.addf %309, %310 : vector<10x32xf32>
    %312 = arith.truncf %311 : vector<10x32xf32> to vector<10x32xbf16>
    %313 = arith.truncf %8 : vector<32x128xf32> to vector<32x128xbf16>
    %cst_141 = arith.constant dense<0.000000e+00> : vector<10x128xf32>
    %314 = tpu.matmul %312, %313, %cst_141 {dimension_numbers = #tpu.dot_dimension_numbers<[1], [0], [0], [1], [0, 0, 1, 1], [], []>} : vector<10x32xbf16>, vector<32x128xbf16>, vector<10x128xf32> -> vector<10x128xf32>
    %315 = vector.broadcast %9 : vector<1x128xf32> to vector<10x128xf32>
    %316 = arith.addf %314, %315 : vector<10x128xf32>
    %317 = arith.mulf %316, %316 : vector<10x128xf32>
    %318 = arith.mulf %316, %317 : vector<10x128xf32>
    %cst_142 = arith.constant 4.471500e-02 : f32
    %319 = vector.broadcast %cst_142 : f32 to vector<10x128xf32>
    %320 = arith.mulf %319, %318 : vector<10x128xf32>
    %321 = arith.addf %316, %320 : vector<10x128xf32>
    %cst_143 = arith.constant 0.797884583 : f32
    %322 = vector.broadcast %cst_143 : f32 to vector<10x128xf32>
    %323 = arith.mulf %322, %321 : vector<10x128xf32>
    %324 = math.tanh %323 : vector<10x128xf32>
    %cst_144 = arith.constant 1.000000e+00 : f32
    %325 = vector.broadcast %cst_144 : f32 to vector<10x128xf32>
    %326 = arith.addf %325, %324 : vector<10x128xf32>
    %cst_145 = arith.constant 5.000000e-01 : f32
    %327 = vector.broadcast %cst_145 : f32 to vector<10x128xf32>
    %328 = arith.mulf %327, %326 : vector<10x128xf32>
    %329 = arith.mulf %316, %328 : vector<10x128xf32>
    %330 = arith.truncf %329 : vector<10x128xf32> to vector<10x128xbf16>
    %331 = arith.truncf %10 : vector<128x32xf32> to vector<128x32xbf16>
    %cst_146 = arith.constant dense<0.000000e+00> : vector<10x32xf32>
    %332 = tpu.matmul %330, %331, %cst_146 {dimension_numbers = #tpu.dot_dimension_numbers<[1], [0], [0], [1], [0, 0, 1, 1], [], []>} : vector<10x128xbf16>, vector<128x32xbf16>, vector<10x32xf32> -> vector<10x32xf32>
    %333 = arith.addf %289, %332 : vector<10x32xf32>
    %334 = vector.broadcast %11 : vector<1x32xf32> to vector<10x32xf32>
    %335 = arith.addf %333, %334 : vector<10x32xf32>
    %336 = arith.addf %335, %201 : vector<10x32xf32>
    %337 = vector.shape_cast %336 : vector<10x32xf32> to vector<2x5x32xf32>
    %338 = vector.shape_cast %201 : vector<10x32xf32> to vector<2x5x32xf32>
    %339 = vector.extract_strided_slice %337 {offsets = [0, 0, 0], sizes = [2, 1, 32], strides = [1, 1, 1]} : vector<2x5x32xf32> to vector<2x1x32xf32>
    %340 = vector.shape_cast %339 : vector<2x1x32xf32> to vector<2x32xf32>
    %cst_147 = arith.constant dense<0.000000e+00> : vector<2xf32>
    %341 = vector.multi_reduction <add>, %340, %cst_147 [1] : vector<2x32xf32> to vector<2xf32>
    %342 = vector.shape_cast %341 : vector<2xf32> to vector<2x1xf32>
    %cst_148 = arith.constant 3.200000e+01 : f32
    %343 = vector.broadcast %cst_148 : f32 to vector<2x1xf32>
    %344 = arith.divf %342, %343 : vector<2x1xf32>
    %345 = vector.broadcast %344 : vector<2x1xf32> to vector<2x32xf32>
    %346 = arith.subf %340, %345 : vector<2x32xf32>
    %347 = arith.mulf %346, %346 : vector<2x32xf32>
    %cst_149 = arith.constant dense<0.000000e+00> : vector<2xf32>
    %348 = vector.multi_reduction <add>, %347, %cst_149 [1] : vector<2x32xf32> to vector<2xf32>
    %349 = vector.shape_cast %348 : vector<2xf32> to vector<2x1xf32>
    %cst_150 = arith.constant 3.200000e+01 : f32
    %350 = vector.broadcast %cst_150 : f32 to vector<2x1xf32>
    %351 = arith.divf %349, %350 : vector<2x1xf32>
    %352 = vector.broadcast %344 : vector<2x1xf32> to vector<2x32xf32>
    %353 = arith.subf %340, %352 : vector<2x32xf32>
    %cst_151 = arith.constant 9.99999974E-6 : f32
    %354 = vector.broadcast %cst_151 : f32 to vector<2x1xf32>
    %355 = arith.addf %351, %354 : vector<2x1xf32>
    %356 = math.rsqrt %355 : vector<2x1xf32>
    %357 = vector.broadcast %356 : vector<2x1xf32> to vector<2x32xf32>
    %358 = arith.mulf %353, %357 : vector<2x32xf32>
    %359 = vector.broadcast %24 : vector<1x32xf32> to vector<2x32xf32>
    %360 = arith.mulf %358, %359 : vector<2x32xf32>
    %361 = vector.broadcast %25 : vector<1x32xf32> to vector<2x32xf32>
    %362 = arith.addf %360, %361 : vector<2x32xf32>
    %363 = arith.truncf %362 : vector<2x32xf32> to vector<2x32xbf16>
    %364 = arith.truncf %26 : vector<32x32xf32> to vector<32x32xbf16>
    %cst_152 = arith.constant dense<0.000000e+00> : vector<2x32xf32>
    %365 = tpu.matmul %363, %364, %cst_152 {dimension_numbers = #tpu.dot_dimension_numbers<[1], [0], [0], [1], [0, 0, 1, 1], [], []>} : vector<2x32xbf16>, vector<32x32xbf16>, vector<2x32xf32> -> vector<2x32xf32>
    %366 = arith.mulf %365, %365 : vector<2x32xf32>
    %cst_153 = arith.constant dense<0.000000e+00> : vector<2xf32>
    %367 = vector.multi_reduction <add>, %366, %cst_153 [1] : vector<2x32xf32> to vector<2xf32>
    %368 = vector.shape_cast %367 : vector<2xf32> to vector<2x1xf32>
    %369 = math.sqrt %368 : vector<2x1xf32>
    %cst_154 = arith.constant 9.99999996E-13 : f32
    %370 = vector.broadcast %cst_154 : f32 to vector<2x1xf32>
    %371 = arith.maximumf %369, %370 : vector<2x1xf32>
    %372 = vector.broadcast %371 : vector<2x1xf32> to vector<2x32xf32>
    %373 = arith.divf %365, %372 : vector<2x32xf32>
    %c0_155 = arith.constant 0 : index
    %c0_156 = arith.constant 0 : index
    %374 = vector.load %arg38[%c0_155, %c0_156] : memref<2x32xf32, #tpu.memory_space<vmem>>, vector<2x32xf32>
    tpu.vector_store %arg38[%c0_155, %c0_156], %373 {strides = array<i32>} : memref<2x32xf32, #tpu.memory_space<vmem>>, vector<2x32xf32>,
    %375 = vector.extract_strided_slice %338 {offsets = [0, 0, 0], sizes = [2, 1, 32], strides = [1, 1, 1]} : vector<2x5x32xf32> to vector<2x1x32xf32>
    %376 = vector.shape_cast %375 : vector<2x1x32xf32> to vector<2x32xf32>
    %cst_157 = arith.constant dense<0.000000e+00> : vector<2xf32>
    %377 = vector.multi_reduction <add>, %376, %cst_157 [1] : vector<2x32xf32> to vector<2xf32>
    %378 = vector.shape_cast %377 : vector<2xf32> to vector<2x1xf32>
    %cst_158 = arith.constant 3.200000e+01 : f32
    %379 = vector.broadcast %cst_158 : f32 to vector<2x1xf32>
    %380 = arith.divf %378, %379 : vector<2x1xf32>
    %381 = vector.broadcast %380 : vector<2x1xf32> to vector<2x32xf32>
    %382 = arith.subf %376, %381 : vector<2x32xf32>
    %383 = arith.mulf %382, %382 : vector<2x32xf32>
    %cst_159 = arith.constant dense<0.000000e+00> : vector<2xf32>
    %384 = vector.multi_reduction <add>, %383, %cst_159 [1] : vector<2x32xf32> to vector<2xf32>
    %385 = vector.shape_cast %384 : vector<2xf32> to vector<2x1xf32>
    %cst_160 = arith.constant 3.200000e+01 : f32
    %386 = vector.broadcast %cst_160 : f32 to vector<2x1xf32>
    %387 = arith.divf %385, %386 : vector<2x1xf32>
    %388 = vector.broadcast %380 : vector<2x1xf32> to vector<2x32xf32>
    %389 = arith.subf %376, %388 : vector<2x32xf32>
    %cst_161 = arith.constant 9.99999974E-6 : f32
    %390 = vector.broadcast %cst_161 : f32 to vector<2x1xf32>
    %391 = arith.addf %387, %390 : vector<2x1xf32>
    %392 = math.rsqrt %391 : vector<2x1xf32>
    %393 = vector.broadcast %392 : vector<2x1xf32> to vector<2x32xf32>
    %394 = arith.mulf %389, %393 : vector<2x32xf32>
    %395 = vector.broadcast %27 : vector<1x32xf32> to vector<2x32xf32>
    %396 = arith.mulf %394, %395 : vector<2x32xf32>
    %397 = vector.broadcast %28 : vector<1x32xf32> to vector<2x32xf32>
    %398 = arith.addf %396, %397 : vector<2x32xf32>
    %399 = arith.truncf %398 : vector<2x32xf32> to vector<2x32xbf16>
    %400 = arith.truncf %29 : vector<32x32xf32> to vector<32x32xbf16>
    %cst_162 = arith.constant dense<0.000000e+00> : vector<2x32xf32>
    %401 = tpu.matmul %399, %400, %cst_162 {dimension_numbers = #tpu.dot_dimension_numbers<[1], [0], [0], [1], [0, 0, 1, 1], [], []>} : vector<2x32xbf16>, vector<32x32xbf16>, vector<2x32xf32> -> vector<2x32xf32>
    %402 = vector.broadcast %32 : vector<1x32xf32> to vector<2x32xf32>
    %403 = arith.subf %401, %402 : vector<2x32xf32>
    %404 = arith.truncf %403 : vector<2x32xf32> to vector<2x32xbf16>
    %405 = arith.truncf %30 : vector<32x256xf32> to vector<32x256xbf16>
    %cst_163 = arith.constant dense<0.000000e+00> : vector<2x256xf32>
    %406 = tpu.matmul %404, %405, %cst_163 {dimension_numbers = #tpu.dot_dimension_numbers<[1], [0], [0], [1], [0, 0, 1, 1], [], []>} : vector<2x32xbf16>, vector<32x256xbf16>, vector<2x256xf32> -> vector<2x256xf32>
    %407 = vector.broadcast %31 : vector<1x256xf32> to vector<2x256xf32>
    %408 = arith.addf %406, %407 : vector<2x256xf32>
    %cst_164 = arith.constant 0.000000e+00 : f32
    %409 = vector.broadcast %cst_164 : f32 to vector<2x256xf32>
    %410 = arith.maximumf %408, %409 : vector<2x256xf32>
    %411 = arith.truncf %410 : vector<2x256xf32> to vector<2x256xbf16>
    %412 = arith.truncf %30 : vector<32x256xf32> to vector<32x256xbf16>
    %cst_165 = arith.constant dense<0.000000e+00> : vector<2x32xf32>
    %413 = tpu.matmul %411, %412, %cst_165 {dimension_numbers = #tpu.dot_dimension_numbers<[1], [1], [0], [0], [0, 0, 1, 0], [], []>} : vector<2x256xbf16>, vector<32x256xbf16>, vector<2x32xf32> -> vector<2x32xf32>
    %414 = vector.broadcast %32 : vector<1x32xf32> to vector<2x32xf32>
    %415 = arith.addf %413, %414 : vector<2x32xf32>
    %416 = arith.mulf %415, %415 : vector<2x32xf32>
    %cst_166 = arith.constant dense<0.000000e+00> : vector<2xf32>
    %417 = vector.multi_reduction <add>, %416, %cst_166 [1] : vector<2x32xf32> to vector<2xf32>
    %418 = vector.shape_cast %417 : vector<2xf32> to vector<2x1xf32>
    %419 = math.sqrt %418 : vector<2x1xf32>
    %cst_167 = arith.constant 9.99999996E-13 : f32
    %420 = vector.broadcast %cst_167 : f32 to vector<2x1xf32>
    %421 = arith.maximumf %419, %420 : vector<2x1xf32>
    %422 = vector.broadcast %421 : vector<2x1xf32> to vector<2x32xf32>
    %423 = arith.divf %415, %422 : vector<2x32xf32>
    %c0_168 = arith.constant 0 : index
    %c0_169 = arith.constant 0 : index
    %424 = vector.load %arg39[%c0_168, %c0_169] : memref<2x32xf32, #tpu.memory_space<vmem>>, vector<2x32xf32>
    tpu.vector_store %arg39[%c0_168, %c0_169], %423 {strides = array<i32>} : memref<2x32xf32, #tpu.memory_space<vmem>>, vector<2x32xf32>,
    %425 = math.absf %410 : vector<2x256xf32>
    %cst_170 = arith.constant dense<0.000000e+00> : vector<2xf32>
    %426 = vector.multi_reduction <add>, %425, %cst_170 [1] : vector<2x256xf32> to vector<2xf32>
    %427 = vector.shape_cast %426 : vector<2xf32> to vector<2x1xf32>
    %cst_171 = arith.constant dense<0.000000e+00> : vector<1xf32>
    %428 = vector.multi_reduction <add>, %427, %cst_171 [0] : vector<2x1xf32> to vector<1xf32>
    %429 = vector.shape_cast %428 : vector<1xf32> to vector<1x1xf32>
    %cst_172 = arith.constant 5.000000e-04 : f32
    %430 = vector.broadcast %cst_172 : f32 to vector<1x1xf32>
    %431 = arith.mulf %429, %430 : vector<1x1xf32>
    %c0_173 = arith.constant 0 : index
    %c0_174 = arith.constant 0 : index
    %432 = vector.load %arg40[%c0_173, %c0_174] : memref<1x1xf32, #tpu.memory_space<vmem>>, vector<1x1xf32>
    tpu.vector_store %arg40[%c0_173, %c0_174], %431 {strides = array<i32>} : memref<1x1xf32, #tpu.memory_space<vmem>>, vector<1x1xf32>,
    return
  }
}

module attributes {stable_mosaic.version = 11 : i64} {
  func.func @_text_branch_kernel(%arg0: memref<32x32xf32, #tpu.memory_space<vmem>>, %arg1: memref<4x8xf32, #tpu.memory_space<vmem>>, %arg2: memref<1x32xf32, #tpu.memory_space<vmem>>, %arg3: memref<1x32xf32, #tpu.memory_space<vmem>>, %arg4: memref<32x96xf32, #tpu.memory_space<vmem>>, %arg5: memref<1x96xf32, #tpu.memory_space<vmem>>, %arg6: memref<32x32xf32, #tpu.memory_space<vmem>>, %arg7: memref<1x32xf32, #tpu.memory_space<vmem>>, %arg8: memref<1x32xf32, #tpu.memory_space<vmem>>, %arg9: memref<1x32xf32, #tpu.memory_space<vmem>>, %arg10: memref<32x128xf32, #tpu.memory_space<vmem>>, %arg11: memref<1x128xf32, #tpu.memory_space<vmem>>, %arg12: memref<128x32xf32, #tpu.memory_space<vmem>>, %arg13: memref<1x32xf32, #tpu.memory_space<vmem>>, %arg14: memref<1x32xf32, #tpu.memory_space<vmem>>, %arg15: memref<1x32xf32, #tpu.memory_space<vmem>>, %arg16: memref<32x32xf32, #tpu.memory_space<vmem>>, %arg17: memref<32x256xf32, #tpu.memory_space<vmem>>, %arg18: memref<1x256xf32, #tpu.memory_space<vmem>>, %arg19: memref<1x32xf32, #tpu.memory_space<vmem>>, %arg20: memref<4x32xf32, #tpu.memory_space<vmem>>, %arg21: memref<1x1xf32, #tpu.memory_space<vmem>>) attributes {dimension_semantics = [], scalar_prefetch = 0 : i64, scratch_operands = 0 : i64, tpu.core_type = #tpu.core_type<tc>} {
    %c0 = arith.constant 0 : index
    %c0_0 = arith.constant 0 : index
    %0 = vector.load %arg2[%c0, %c0_0] : memref<1x32xf32, #tpu.memory_space<vmem>>, vector<1x32xf32>
    %c0_1 = arith.constant 0 : index
    %c0_2 = arith.constant 0 : index
    %1 = vector.load %arg3[%c0_1, %c0_2] : memref<1x32xf32, #tpu.memory_space<vmem>>, vector<1x32xf32>
    %c0_3 = arith.constant 0 : index
    %c0_4 = arith.constant 0 : index
    %2 = vector.load %arg4[%c0_3, %c0_4] : memref<32x96xf32, #tpu.memory_space<vmem>>, vector<32x96xf32>
    %c0_5 = arith.constant 0 : index
    %c0_6 = arith.constant 0 : index
    %3 = vector.load %arg5[%c0_5, %c0_6] : memref<1x96xf32, #tpu.memory_space<vmem>>, vector<1x96xf32>
    %c0_7 = arith.constant 0 : index
    %c0_8 = arith.constant 0 : index
    %4 = vector.load %arg6[%c0_7, %c0_8] : memref<32x32xf32, #tpu.memory_space<vmem>>, vector<32x32xf32>
    %c0_9 = arith.constant 0 : index
    %c0_10 = arith.constant 0 : index
    %5 = vector.load %arg7[%c0_9, %c0_10] : memref<1x32xf32, #tpu.memory_space<vmem>>, vector<1x32xf32>
    %c0_11 = arith.constant 0 : index
    %c0_12 = arith.constant 0 : index
    %6 = vector.load %arg8[%c0_11, %c0_12] : memref<1x32xf32, #tpu.memory_space<vmem>>, vector<1x32xf32>
    %c0_13 = arith.constant 0 : index
    %c0_14 = arith.constant 0 : index
    %7 = vector.load %arg9[%c0_13, %c0_14] : memref<1x32xf32, #tpu.memory_space<vmem>>, vector<1x32xf32>
    %c0_15 = arith.constant 0 : index
    %c0_16 = arith.constant 0 : index
    %8 = vector.load %arg10[%c0_15, %c0_16] : memref<32x128xf32, #tpu.memory_space<vmem>>, vector<32x128xf32>
    %c0_17 = arith.constant 0 : index
    %c0_18 = arith.constant 0 : index
    %9 = vector.load %arg11[%c0_17, %c0_18] : memref<1x128xf32, #tpu.memory_space<vmem>>, vector<1x128xf32>
    %c0_19 = arith.constant 0 : index
    %c0_20 = arith.constant 0 : index
    %10 = vector.load %arg12[%c0_19, %c0_20] : memref<128x32xf32, #tpu.memory_space<vmem>>, vector<128x32xf32>
    %c0_21 = arith.constant 0 : index
    %c0_22 = arith.constant 0 : index
    %11 = vector.load %arg13[%c0_21, %c0_22] : memref<1x32xf32, #tpu.memory_space<vmem>>, vector<1x32xf32>
    %c0_23 = arith.constant 0 : index
    %c0_24 = arith.constant 0 : index
    %12 = vector.load %arg14[%c0_23, %c0_24] : memref<1x32xf32, #tpu.memory_space<vmem>>, vector<1x32xf32>
    %c0_25 = arith.constant 0 : index
    %c0_26 = arith.constant 0 : index
    %13 = vector.load %arg15[%c0_25, %c0_26] : memref<1x32xf32, #tpu.memory_space<vmem>>, vector<1x32xf32>
    %c0_27 = arith.constant 0 : index
    %c0_28 = arith.constant 0 : index
    %14 = vector.load %arg16[%c0_27, %c0_28] : memref<32x32xf32, #tpu.memory_space<vmem>>, vector<32x32xf32>
    %c0_29 = arith.constant 0 : index
    %c0_30 = arith.constant 0 : index
    %15 = vector.load %arg17[%c0_29, %c0_30] : memref<32x256xf32, #tpu.memory_space<vmem>>, vector<32x256xf32>
    %c0_31 = arith.constant 0 : index
    %c0_32 = arith.constant 0 : index
    %16 = vector.load %arg18[%c0_31, %c0_32] : memref<1x256xf32, #tpu.memory_space<vmem>>, vector<1x256xf32>
    %c0_33 = arith.constant 0 : index
    %c0_34 = arith.constant 0 : index
    %17 = vector.load %arg19[%c0_33, %c0_34] : memref<1x32xf32, #tpu.memory_space<vmem>>, vector<1x32xf32>
    %c0_35 = arith.constant 0 : index
    %c0_36 = arith.constant 0 : index
    %18 = vector.load %arg0[%c0_35, %c0_36] : memref<32x32xf32, #tpu.memory_space<vmem>>, vector<32x32xf32>
    %cst = arith.constant dense<0.000000e+00> : vector<32xf32>
    %19 = vector.multi_reduction <add>, %18, %cst [1] : vector<32x32xf32> to vector<32xf32>
    %20 = vector.shape_cast %19 : vector<32xf32> to vector<32x1xf32>
    %cst_37 = arith.constant 3.200000e+01 : f32
    %21 = vector.broadcast %cst_37 : f32 to vector<32x1xf32>
    %22 = arith.divf %20, %21 : vector<32x1xf32>
    %23 = vector.broadcast %22 : vector<32x1xf32> to vector<32x32xf32>
    %24 = arith.subf %18, %23 : vector<32x32xf32>
    %25 = arith.mulf %24, %24 : vector<32x32xf32>
    %cst_38 = arith.constant dense<0.000000e+00> : vector<32xf32>
    %26 = vector.multi_reduction <add>, %25, %cst_38 [1] : vector<32x32xf32> to vector<32xf32>
    %27 = vector.shape_cast %26 : vector<32xf32> to vector<32x1xf32>
    %cst_39 = arith.constant 3.200000e+01 : f32
    %28 = vector.broadcast %cst_39 : f32 to vector<32x1xf32>
    %29 = arith.divf %27, %28 : vector<32x1xf32>
    %30 = vector.broadcast %22 : vector<32x1xf32> to vector<32x32xf32>
    %31 = arith.subf %18, %30 : vector<32x32xf32>
    %cst_40 = arith.constant 9.99999974E-6 : f32
    %32 = vector.broadcast %cst_40 : f32 to vector<32x1xf32>
    %33 = arith.addf %29, %32 : vector<32x1xf32>
    %34 = math.rsqrt %33 : vector<32x1xf32>
    %35 = vector.broadcast %34 : vector<32x1xf32> to vector<32x32xf32>
    %36 = arith.mulf %31, %35 : vector<32x32xf32>
    %37 = vector.broadcast %0 : vector<1x32xf32> to vector<32x32xf32>
    %38 = arith.mulf %36, %37 : vector<32x32xf32>
    %39 = vector.broadcast %1 : vector<1x32xf32> to vector<32x32xf32>
    %40 = arith.addf %38, %39 : vector<32x32xf32>
    %41 = arith.truncf %40 : vector<32x32xf32> to vector<32x32xbf16>
    %42 = arith.truncf %2 : vector<32x96xf32> to vector<32x96xbf16>
    %cst_41 = arith.constant dense<0.000000e+00> : vector<32x96xf32>
    %43 = tpu.matmul %41, %42, %cst_41 {dimension_numbers = #tpu.dot_dimension_numbers<[1], [0], [0], [1], [0, 0, 1, 1], [], []>} : vector<32x32xbf16>, vector<32x96xbf16>, vector<32x96xf32> -> vector<32x96xf32>
    %44 = vector.broadcast %3 : vector<1x96xf32> to vector<32x96xf32>
    %45 = arith.addf %43, %44 : vector<32x96xf32>
    %46 = vector.extract_strided_slice %45 {offsets = [0, 0], sizes = [32, 32], strides = [1, 1]} : vector<32x96xf32> to vector<32x32xf32>
    %47 = vector.shape_cast %46 : vector<32x32xf32> to vector<4x8x32xf32>
    %48 = vector.extract_strided_slice %45 {offsets = [0, 32], sizes = [32, 32], strides = [1, 1]} : vector<32x96xf32> to vector<32x32xf32>
    %49 = vector.shape_cast %48 : vector<32x32xf32> to vector<4x8x32xf32>
    %50 = vector.extract_strided_slice %45 {offsets = [0, 64], sizes = [32, 32], strides = [1, 1]} : vector<32x96xf32> to vector<32x32xf32>
    %51 = vector.shape_cast %50 : vector<32x32xf32> to vector<4x8x32xf32>
    %52 = tpu.iota {dimensions = array<i32: 2>} : vector<4x8x32xi32>
    %cst_42 = arith.constant 0.000000e+00 : f32
    %53 = vector.broadcast %cst_42 : f32 to vector<4x8x32xf32>
    %54 = vector.extract_strided_slice %47 {offsets = [0, 0, 0], sizes = [4, 8, 16], strides = [1, 1, 1]} : vector<4x8x32xf32> to vector<4x8x16xf32>
    %55 = vector.extract_strided_slice %49 {offsets = [0, 0, 0], sizes = [4, 8, 16], strides = [1, 1, 1]} : vector<4x8x32xf32> to vector<4x8x16xf32>
    "tpu.trace_start"() <{level = 10 : i32, message = "bqd,bkd->bqk"}> : () -> ()
    %cst_43 = arith.constant dense<0.000000e+00> : vector<4x8x8xf32>
    %56 = tpu.matmul %54, %55, %cst_43 {dimension_numbers = #tpu.dot_dimension_numbers<[2], [2], [1], [1], [0, 0, 0, 1, 1, 1], [0], [0]>} : vector<4x8x16xf32>, vector<4x8x16xf32>, vector<4x8x8xf32> -> vector<4x8x8xf32>
    "tpu.trace_stop"() : () -> ()
    %cst_44 = arith.constant 2.500000e-01 : f32
    %57 = vector.broadcast %cst_44 : f32 to vector<4x8x8xf32>
    %58 = arith.mulf %56, %57 : vector<4x8x8xf32>
    %59 = tpu.iota {dimensions = array<i32: 1>} : vector<4x8x8xi32>
    %60 = tpu.iota {dimensions = array<i32: 2>} : vector<4x8x8xi32>
    %61 = arith.cmpi sle, %60, %59 : vector<4x8x8xi32>
    %cst_45 = arith.constant -1.000000e+30 : f32
    %62 = vector.broadcast %cst_45 : f32 to vector<4x8x8xf32>
    %63 = arith.select %61, %58, %62 : vector<4x8x8xi1>, vector<4x8x8xf32>
    %cst_46 = arith.constant dense<0xFF800000> : vector<4x8xf32>
    %64 = vector.multi_reduction <maximumf>, %63, %cst_46 [2] : vector<4x8x8xf32> to vector<4x8xf32>
    %65 = vector.shape_cast %64 : vector<4x8xf32> to vector<4x8x1xf32>
    %66 = vector.broadcast %65 : vector<4x8x1xf32> to vector<4x8x8xf32>
    %67 = arith.subf %63, %66 : vector<4x8x8xf32>
    %68 = math.exp %67 : vector<4x8x8xf32>
    %cst_47 = arith.constant dense<0.000000e+00> : vector<4x8xf32>
    %69 = vector.multi_reduction <add>, %68, %cst_47 [2] : vector<4x8x8xf32> to vector<4x8xf32>
    %70 = vector.shape_cast %69 : vector<4x8xf32> to vector<4x8x1xf32>
    %71 = vector.broadcast %70 : vector<4x8x1xf32> to vector<4x8x8xf32>
    %72 = arith.divf %68, %71 : vector<4x8x8xf32>
    %c0_i32 = arith.constant 0 : i32
    %73 = vector.broadcast %c0_i32 : i32 to vector<4x8x32xi32>
    %74 = arith.cmpi sge, %52, %73 : vector<4x8x32xi32>
    %c16_i32 = arith.constant 16 : i32
    %75 = vector.broadcast %c16_i32 : i32 to vector<4x8x32xi32>
    %76 = arith.cmpi slt, %52, %75 : vector<4x8x32xi32>
    %77 = arith.andi %74, %76 : vector<4x8x32xi1>
    %cst_48 = arith.constant 0.000000e+00 : f32
    %78 = vector.broadcast %cst_48 : f32 to vector<4x8x32xf32>
    %79 = arith.select %77, %51, %78 : vector<4x8x32xi1>, vector<4x8x32xf32>
    "tpu.trace_start"() <{level = 10 : i32, message = "bqk,bkd->bqd"}> : () -> ()
    %cst_49 = arith.constant dense<0.000000e+00> : vector<4x8x32xf32>
    %80 = tpu.matmul %72, %79, %cst_49 {dimension_numbers = #tpu.dot_dimension_numbers<[2], [1], [1], [2], [0, 0, 0, 1, 1, 2], [0], [0]>} : vector<4x8x8xf32>, vector<4x8x32xf32>, vector<4x8x32xf32> -> vector<4x8x32xf32>
    "tpu.trace_stop"() : () -> ()
    %81 = arith.addf %53, %80 : vector<4x8x32xf32>
    %82 = vector.extract_strided_slice %47 {offsets = [0, 0, 16], sizes = [4, 8, 16], strides = [1, 1, 1]} : vector<4x8x32xf32> to vector<4x8x16xf32>
    %83 = vector.extract_strided_slice %49 {offsets = [0, 0, 16], sizes = [4, 8, 16], strides = [1, 1, 1]} : vector<4x8x32xf32> to vector<4x8x16xf32>
    "tpu.trace_start"() <{level = 10 : i32, message = "bqd,bkd->bqk"}> : () -> ()
    %cst_50 = arith.constant dense<0.000000e+00> : vector<4x8x8xf32>
    %84 = tpu.matmul %82, %83, %cst_50 {dimension_numbers = #tpu.dot_dimension_numbers<[2], [2], [1], [1], [0, 0, 0, 1, 1, 1], [0], [0]>} : vector<4x8x16xf32>, vector<4x8x16xf32>, vector<4x8x8xf32> -> vector<4x8x8xf32>
    "tpu.trace_stop"() : () -> ()
    %cst_51 = arith.constant 2.500000e-01 : f32
    %85 = vector.broadcast %cst_51 : f32 to vector<4x8x8xf32>
    %86 = arith.mulf %84, %85 : vector<4x8x8xf32>
    %87 = tpu.iota {dimensions = array<i32: 1>} : vector<4x8x8xi32>
    %88 = tpu.iota {dimensions = array<i32: 2>} : vector<4x8x8xi32>
    %89 = arith.cmpi sle, %88, %87 : vector<4x8x8xi32>
    %cst_52 = arith.constant -1.000000e+30 : f32
    %90 = vector.broadcast %cst_52 : f32 to vector<4x8x8xf32>
    %91 = arith.select %89, %86, %90 : vector<4x8x8xi1>, vector<4x8x8xf32>
    %cst_53 = arith.constant dense<0xFF800000> : vector<4x8xf32>
    %92 = vector.multi_reduction <maximumf>, %91, %cst_53 [2] : vector<4x8x8xf32> to vector<4x8xf32>
    %93 = vector.shape_cast %92 : vector<4x8xf32> to vector<4x8x1xf32>
    %94 = vector.broadcast %93 : vector<4x8x1xf32> to vector<4x8x8xf32>
    %95 = arith.subf %91, %94 : vector<4x8x8xf32>
    %96 = math.exp %95 : vector<4x8x8xf32>
    %cst_54 = arith.constant dense<0.000000e+00> : vector<4x8xf32>
    %97 = vector.multi_reduction <add>, %96, %cst_54 [2] : vector<4x8x8xf32> to vector<4x8xf32>
    %98 = vector.shape_cast %97 : vector<4x8xf32> to vector<4x8x1xf32>
    %99 = vector.broadcast %98 : vector<4x8x1xf32> to vector<4x8x8xf32>
    %100 = arith.divf %96, %99 : vector<4x8x8xf32>
    %c16_i32_55 = arith.constant 16 : i32
    %101 = vector.broadcast %c16_i32_55 : i32 to vector<4x8x32xi32>
    %102 = arith.cmpi sge, %52, %101 : vector<4x8x32xi32>
    %c32_i32 = arith.constant 32 : i32
    %103 = vector.broadcast %c32_i32 : i32 to vector<4x8x32xi32>
    %104 = arith.cmpi slt, %52, %103 : vector<4x8x32xi32>
    %105 = arith.andi %102, %104 : vector<4x8x32xi1>
    %cst_56 = arith.constant 0.000000e+00 : f32
    %106 = vector.broadcast %cst_56 : f32 to vector<4x8x32xf32>
    %107 = arith.select %105, %51, %106 : vector<4x8x32xi1>, vector<4x8x32xf32>
    "tpu.trace_start"() <{level = 10 : i32, message = "bqk,bkd->bqd"}> : () -> ()
    %cst_57 = arith.constant dense<0.000000e+00> : vector<4x8x32xf32>
    %108 = tpu.matmul %100, %107, %cst_57 {dimension_numbers = #tpu.dot_dimension_numbers<[2], [1], [1], [2], [0, 0, 0, 1, 1, 2], [0], [0]>} : vector<4x8x8xf32>, vector<4x8x32xf32>, vector<4x8x32xf32> -> vector<4x8x32xf32>
    "tpu.trace_stop"() : () -> ()
    %109 = arith.addf %81, %108 : vector<4x8x32xf32>
    %110 = vector.shape_cast %109 : vector<4x8x32xf32> to vector<32x32xf32>
    %111 = arith.truncf %110 : vector<32x32xf32> to vector<32x32xbf16>
    %112 = arith.truncf %4 : vector<32x32xf32> to vector<32x32xbf16>
    %cst_58 = arith.constant dense<0.000000e+00> : vector<32x32xf32>
    %113 = tpu.matmul %111, %112, %cst_58 {dimension_numbers = #tpu.dot_dimension_numbers<[1], [0], [0], [1], [0, 0, 1, 1], [], []>} : vector<32x32xbf16>, vector<32x32xbf16>, vector<32x32xf32> -> vector<32x32xf32>
    %114 = arith.addf %18, %113 : vector<32x32xf32>
    %115 = vector.broadcast %5 : vector<1x32xf32> to vector<32x32xf32>
    %116 = arith.addf %114, %115 : vector<32x32xf32>
    %cst_59 = arith.constant dense<0.000000e+00> : vector<32xf32>
    %117 = vector.multi_reduction <add>, %116, %cst_59 [1] : vector<32x32xf32> to vector<32xf32>
    %118 = vector.shape_cast %117 : vector<32xf32> to vector<32x1xf32>
    %cst_60 = arith.constant 3.200000e+01 : f32
    %119 = vector.broadcast %cst_60 : f32 to vector<32x1xf32>
    %120 = arith.divf %118, %119 : vector<32x1xf32>
    %121 = vector.broadcast %120 : vector<32x1xf32> to vector<32x32xf32>
    %122 = arith.subf %116, %121 : vector<32x32xf32>
    %123 = arith.mulf %122, %122 : vector<32x32xf32>
    %cst_61 = arith.constant dense<0.000000e+00> : vector<32xf32>
    %124 = vector.multi_reduction <add>, %123, %cst_61 [1] : vector<32x32xf32> to vector<32xf32>
    %125 = vector.shape_cast %124 : vector<32xf32> to vector<32x1xf32>
    %cst_62 = arith.constant 3.200000e+01 : f32
    %126 = vector.broadcast %cst_62 : f32 to vector<32x1xf32>
    %127 = arith.divf %125, %126 : vector<32x1xf32>
    %128 = vector.broadcast %120 : vector<32x1xf32> to vector<32x32xf32>
    %129 = arith.subf %116, %128 : vector<32x32xf32>
    %cst_63 = arith.constant 9.99999974E-6 : f32
    %130 = vector.broadcast %cst_63 : f32 to vector<32x1xf32>
    %131 = arith.addf %127, %130 : vector<32x1xf32>
    %132 = math.rsqrt %131 : vector<32x1xf32>
    %133 = vector.broadcast %132 : vector<32x1xf32> to vector<32x32xf32>
    %134 = arith.mulf %129, %133 : vector<32x32xf32>
    %135 = vector.broadcast %6 : vector<1x32xf32> to vector<32x32xf32>
    %136 = arith.mulf %134, %135 : vector<32x32xf32>
    %137 = vector.broadcast %7 : vector<1x32xf32> to vector<32x32xf32>
    %138 = arith.addf %136, %137 : vector<32x32xf32>
    %139 = arith.truncf %138 : vector<32x32xf32> to vector<32x32xbf16>
    %140 = arith.truncf %8 : vector<32x128xf32> to vector<32x128xbf16>
    %cst_64 = arith.constant dense<0.000000e+00> : vector<32x128xf32>
    %141 = tpu.matmul %139, %140, %cst_64 {dimension_numbers = #tpu.dot_dimension_numbers<[1], [0], [0], [1], [0, 0, 1, 1], [], []>} : vector<32x32xbf16>, vector<32x128xbf16>, vector<32x128xf32> -> vector<32x128xf32>
    %142 = vector.broadcast %9 : vector<1x128xf32> to vector<32x128xf32>
    %143 = arith.addf %141, %142 : vector<32x128xf32>
    %144 = arith.mulf %143, %143 : vector<32x128xf32>
    %145 = arith.mulf %143, %144 : vector<32x128xf32>
    %cst_65 = arith.constant 4.471500e-02 : f32
    %146 = vector.broadcast %cst_65 : f32 to vector<32x128xf32>
    %147 = arith.mulf %146, %145 : vector<32x128xf32>
    %148 = arith.addf %143, %147 : vector<32x128xf32>
    %cst_66 = arith.constant 0.797884583 : f32
    %149 = vector.broadcast %cst_66 : f32 to vector<32x128xf32>
    %150 = arith.mulf %149, %148 : vector<32x128xf32>
    %151 = math.tanh %150 : vector<32x128xf32>
    %cst_67 = arith.constant 1.000000e+00 : f32
    %152 = vector.broadcast %cst_67 : f32 to vector<32x128xf32>
    %153 = arith.addf %152, %151 : vector<32x128xf32>
    %cst_68 = arith.constant 5.000000e-01 : f32
    %154 = vector.broadcast %cst_68 : f32 to vector<32x128xf32>
    %155 = arith.mulf %154, %153 : vector<32x128xf32>
    %156 = arith.mulf %143, %155 : vector<32x128xf32>
    %157 = arith.truncf %156 : vector<32x128xf32> to vector<32x128xbf16>
    %158 = arith.truncf %10 : vector<128x32xf32> to vector<128x32xbf16>
    %cst_69 = arith.constant dense<0.000000e+00> : vector<32x32xf32>
    %159 = tpu.matmul %157, %158, %cst_69 {dimension_numbers = #tpu.dot_dimension_numbers<[1], [0], [0], [1], [0, 0, 1, 1], [], []>} : vector<32x128xbf16>, vector<128x32xbf16>, vector<32x32xf32> -> vector<32x32xf32>
    %160 = arith.addf %116, %159 : vector<32x32xf32>
    %161 = vector.broadcast %11 : vector<1x32xf32> to vector<32x32xf32>
    %162 = arith.addf %160, %161 : vector<32x32xf32>
    %cst_70 = arith.constant dense<0.000000e+00> : vector<32xf32>
    %163 = vector.multi_reduction <add>, %162, %cst_70 [1] : vector<32x32xf32> to vector<32xf32>
    %164 = vector.shape_cast %163 : vector<32xf32> to vector<32x1xf32>
    %cst_71 = arith.constant 3.200000e+01 : f32
    %165 = vector.broadcast %cst_71 : f32 to vector<32x1xf32>
    %166 = arith.divf %164, %165 : vector<32x1xf32>
    %167 = vector.broadcast %166 : vector<32x1xf32> to vector<32x32xf32>
    %168 = arith.subf %162, %167 : vector<32x32xf32>
    %169 = arith.mulf %168, %168 : vector<32x32xf32>
    %cst_72 = arith.constant dense<0.000000e+00> : vector<32xf32>
    %170 = vector.multi_reduction <add>, %169, %cst_72 [1] : vector<32x32xf32> to vector<32xf32>
    %171 = vector.shape_cast %170 : vector<32xf32> to vector<32x1xf32>
    %cst_73 = arith.constant 3.200000e+01 : f32
    %172 = vector.broadcast %cst_73 : f32 to vector<32x1xf32>
    %173 = arith.divf %171, %172 : vector<32x1xf32>
    %174 = vector.broadcast %166 : vector<32x1xf32> to vector<32x32xf32>
    %175 = arith.subf %162, %174 : vector<32x32xf32>
    %cst_74 = arith.constant 9.99999974E-6 : f32
    %176 = vector.broadcast %cst_74 : f32 to vector<32x1xf32>
    %177 = arith.addf %173, %176 : vector<32x1xf32>
    %178 = math.rsqrt %177 : vector<32x1xf32>
    %179 = vector.broadcast %178 : vector<32x1xf32> to vector<32x32xf32>
    %180 = arith.mulf %175, %179 : vector<32x32xf32>
    %181 = vector.broadcast %12 : vector<1x32xf32> to vector<32x32xf32>
    %182 = arith.mulf %180, %181 : vector<32x32xf32>
    %183 = vector.broadcast %13 : vector<1x32xf32> to vector<32x32xf32>
    %184 = arith.addf %182, %183 : vector<32x32xf32>
    %185 = vector.shape_cast %184 : vector<32x32xf32> to vector<4x8x32xf32>
    %c0_75 = arith.constant 0 : index
    %c0_76 = arith.constant 0 : index
    %186 = vector.load %arg1[%c0_75, %c0_76] : memref<4x8xf32, #tpu.memory_space<vmem>>, vector<4x8xf32>
    %187 = vector.shape_cast %186 : vector<4x8xf32> to vector<4x8x1xf32>
    %188 = vector.broadcast %187 : vector<4x8x1xf32> to vector<4x8x32xf32>
    %189 = arith.mulf %185, %188 : vector<4x8x32xf32>
    %cst_77 = arith.constant dense<0.000000e+00> : vector<4x32xf32>
    %190 = vector.multi_reduction <add>, %189, %cst_77 [1] : vector<4x8x32xf32> to vector<4x32xf32>
    %191 = arith.truncf %190 : vector<4x32xf32> to vector<4x32xbf16>
    %192 = arith.truncf %14 : vector<32x32xf32> to vector<32x32xbf16>
    %cst_78 = arith.constant dense<0.000000e+00> : vector<4x32xf32>
    %193 = tpu.matmul %191, %192, %cst_78 {dimension_numbers = #tpu.dot_dimension_numbers<[1], [0], [0], [1], [0, 0, 1, 1], [], []>} : vector<4x32xbf16>, vector<32x32xbf16>, vector<4x32xf32> -> vector<4x32xf32>
    %194 = arith.mulf %193, %193 : vector<4x32xf32>
    %cst_79 = arith.constant dense<0.000000e+00> : vector<4xf32>
    %195 = vector.multi_reduction <add>, %194, %cst_79 [1] : vector<4x32xf32> to vector<4xf32>
    %196 = vector.shape_cast %195 : vector<4xf32> to vector<4x1xf32>
    %197 = math.sqrt %196 : vector<4x1xf32>
    %cst_80 = arith.constant 9.99999996E-13 : f32
    %198 = vector.broadcast %cst_80 : f32 to vector<4x1xf32>
    %199 = arith.maximumf %197, %198 : vector<4x1xf32>
    %200 = vector.broadcast %199 : vector<4x1xf32> to vector<4x32xf32>
    %201 = arith.divf %193, %200 : vector<4x32xf32>
    %202 = vector.broadcast %17 : vector<1x32xf32> to vector<4x32xf32>
    %203 = arith.subf %201, %202 : vector<4x32xf32>
    %204 = arith.truncf %203 : vector<4x32xf32> to vector<4x32xbf16>
    %205 = arith.truncf %15 : vector<32x256xf32> to vector<32x256xbf16>
    %cst_81 = arith.constant dense<0.000000e+00> : vector<4x256xf32>
    %206 = tpu.matmul %204, %205, %cst_81 {dimension_numbers = #tpu.dot_dimension_numbers<[1], [0], [0], [1], [0, 0, 1, 1], [], []>} : vector<4x32xbf16>, vector<32x256xbf16>, vector<4x256xf32> -> vector<4x256xf32>
    %207 = vector.broadcast %16 : vector<1x256xf32> to vector<4x256xf32>
    %208 = arith.addf %206, %207 : vector<4x256xf32>
    %cst_82 = arith.constant 0.000000e+00 : f32
    %209 = vector.broadcast %cst_82 : f32 to vector<4x256xf32>
    %210 = arith.maximumf %208, %209 : vector<4x256xf32>
    %211 = arith.truncf %210 : vector<4x256xf32> to vector<4x256xbf16>
    %212 = arith.truncf %15 : vector<32x256xf32> to vector<32x256xbf16>
    %cst_83 = arith.constant dense<0.000000e+00> : vector<4x32xf32>
    %213 = tpu.matmul %211, %212, %cst_83 {dimension_numbers = #tpu.dot_dimension_numbers<[1], [1], [0], [0], [0, 0, 1, 0], [], []>} : vector<4x256xbf16>, vector<32x256xbf16>, vector<4x32xf32> -> vector<4x32xf32>
    %214 = vector.broadcast %17 : vector<1x32xf32> to vector<4x32xf32>
    %215 = arith.addf %213, %214 : vector<4x32xf32>
    %c0_84 = arith.constant 0 : index
    %c0_85 = arith.constant 0 : index
    %216 = vector.load %arg20[%c0_84, %c0_85] : memref<4x32xf32, #tpu.memory_space<vmem>>, vector<4x32xf32>
    tpu.vector_store %arg20[%c0_84, %c0_85], %215 {strides = array<i32>} : memref<4x32xf32, #tpu.memory_space<vmem>>, vector<4x32xf32>,
    %217 = vector.extract_strided_slice %210 {offsets = [0, 0], sizes = [2, 256], strides = [1, 1]} : vector<4x256xf32> to vector<2x256xf32>
    %218 = math.absf %217 : vector<2x256xf32>
    %cst_86 = arith.constant dense<0.000000e+00> : vector<2xf32>
    %219 = vector.multi_reduction <add>, %218, %cst_86 [1] : vector<2x256xf32> to vector<2xf32>
    %220 = vector.shape_cast %219 : vector<2xf32> to vector<2x1xf32>
    %cst_87 = arith.constant dense<0.000000e+00> : vector<1xf32>
    %221 = vector.multi_reduction <add>, %220, %cst_87 [0] : vector<2x1xf32> to vector<1xf32>
    %222 = vector.shape_cast %221 : vector<1xf32> to vector<1x1xf32>
    %cst_88 = arith.constant 5.000000e-04 : f32
    %223 = vector.broadcast %cst_88 : f32 to vector<1x1xf32>
    %224 = arith.mulf %222, %223 : vector<1x1xf32>
    %c0_89 = arith.constant 0 : index
    %c0_90 = arith.constant 0 : index
    %225 = vector.load %arg21[%c0_89, %c0_90] : memref<1x1xf32, #tpu.memory_space<vmem>>, vector<1x1xf32>
    tpu.vector_store %arg21[%c0_89, %c0_90], %224 {strides = array<i32>} : memref<1x1xf32, #tpu.memory_space<vmem>>, vector<1x1xf32>,
    return
  }
}

</mosaic_0001>

<bundles_post_ra>
// kernel: daclip_forward.3
= control target key start
LH: loop header
LB: loop body
LE: loop exit
PB: predicated region body
PF: predicated region fallthrough
CT: control target
= control target key end

     0   :  { %s3216_s0 = inlined_call_operand.vmem [shape: f32[32,32], index: 0, kind: input, shape index: {}]   ;;  %s3217_s1 = inlined_call_operand.vmem [shape: f32[4,8], index: 1, kind: input, shape index: {}]   ;;  %s3218_s2 = inlined_call_operand.vmem [shape: f32[1,32], index: 2, kind: input, shape index: {}]   ;;  %s3219_s3 = inlined_call_operand.vmem [shape: f32[1,32], index: 3, kind: input, shape index: {}]   ;;  %s3220_s4 = inlined_call_operand.vmem [shape: f32[32,96], index: 4, kind: input, shape index: {}]   ;;  %s3221_s5 = inlined_call_operand.vmem [shape: f32[1,96], index: 5, kind: input, shape index: {}]   ;;  %s3222_s6 = inlined_call_operand.vmem [shape: f32[32,32], index: 6, kind: input, shape index: {}]   ;;  %s3223_s7 = inlined_call_operand.vmem [shape: f32[1,32], index: 7, kind: input, shape index: {}]   ;;  %s3224_s8 = inlined_call_operand.vmem [shape: f32[1,32], index: 8, kind: input, shape index: {}]   ;;  %s3225_s9 = inlined_call_operand.vmem [shape: f32[1,32], index: 9, kind: input, shape index: {}]   ;;  %s3226_s10 = inlined_call_operand.vmem [shape: f32[32,128], index: 10, kind: input, shape index: {}]   ;;  %s3227_s11 = inlined_call_operand.vmem [shape: f32[1,128], index: 11, kind: input, shape index: {}]   ;;  %s3228_s12 = inlined_call_operand.vmem [shape: f32[128,32], index: 12, kind: input, shape index: {}]   ;;  %s3229_s13 = inlined_call_operand.vmem [shape: f32[1,32], index: 13, kind: input, shape index: {}]   ;;  %s3230_s14 = inlined_call_operand.vmem [shape: f32[1,32], index: 14, kind: input, shape index: {}]   ;;  %s3231_s15 = inlined_call_operand.vmem [shape: f32[1,32], index: 15, kind: input, shape index: {}]   ;;  %s3232_s16 = inlined_call_operand.vmem [shape: f32[32,32], index: 16, kind: input, shape index: {}]   ;;  %s3233_s17 = inlined_call_operand.vmem [shape: f32[32,256], index: 17, kind: input, shape index: {}]   ;;  %s3234_s18 = inlined_call_operand.vmem [shape: f32[1,256], index: 18, kind: input, shape index: {}]   ;;  %s3235_s19 = inlined_call_operand.vmem [shape: f32[1,32], index: 19, kind: input, shape index: {}]   ;;  %s3236_s20 = inlined_call_operand.vmem [shape: f32[4,32], index: 20, kind: output, shape index: {0}]   ;;  %s3237_s21 = inlined_call_operand.hbm [shape: f32[1,1], index: 21, kind: output, shape index: {1}]  }
   0x1   :  { %3240 = sst [smem:[#allocation5_spill]] %s3216_s0 }
   0x2   :  { %3241 = sst [smem:[#allocation6_spill]] %s3217_s1 }
   0x3   :  { %3242 = sst [smem:[#allocation7_spill]] %s3218_s2 }
   0x4   :  { %3243 = sst [smem:[#allocation8_spill]] %s3219_s3 }
   0x5   :  { %3244 = sst [smem:[#allocation9_spill]] %s3220_s4 }
   0x6   :  { %3245 = sst [smem:[#allocation10_spill]] %s3221_s5 }
   0x7   :  { %s3246_s26 = sld [smem:[#allocation5_spill]]  ;;  %vm125_vm0 = vcmask 261120  }
   0xd   :  { %v2753_v0 = vld [vmem:[%s3246_s26] sm:$0xff]  ;;  %v2758_v1 = vld [vmem:[%s3246_s26 + $0x10] sm:$0xff]  ;;  %v2763_v2 = vld [vmem:[%s3246_s26 + $0x8] sm:$0xff] }
   0xe   :  { %v126_v3 = vsel %vm125_vm0, %v2753_v0, 0.0  ;;  %v132_v4 = vsel %vm125_vm0, %v2758_v1, 0.0  ;;  %v2772_v5 = vld [vmem:[%s3246_s26 + $0x18] sm:$0xff] }
   0xf   :  { %27 = vsyncpa [#allocation3], 0  ;;  %127 = vadd.xlane.f32.xlu0 %v126_v3  ;;  %133 = vadd.xlane.f32.xlu1 %v132_v4  ;;  %v129_v6 = vsel %vm125_vm0, %v2763_v2, 0.0  ;;  %v135_v7 = vsel %vm125_vm0, %v2772_v5, 0.0  ;;  %s3247_s22 = sld [smem:[#allocation9_spill]]  ;;  %s3248_s28 = sld [smem:[#allocation7_spill]] }
  0x10   :  { %s3249_s4 = sld [smem:[#allocation8_spill]]  ;;  %vm2633_vm1 = vmmov 0   ;;  %s2634_s23 = smov 96   ;;  %vm269_vm2 = vcmask 130048   ;;  %vm586_vm4 = vcmask 64512   ;;  %vm2071_vm9 = vcmask 1041409  }
  0x11   :  { %s2635_s1 = smov 80   ;;  %s2636_s24 = smov 112   ;;  %vm2073_vm10 = vcmask 1042434   ;;  %vm2075_vm11 = vcmask 1043459   ;;  %vm2122_vm12 = vcmask 257024   ;;  %vm2250_vm15 = vcmask 1041408  }
  0x12   :  { %s2637_s2 = smov 64   ;;  %s3255_s25 = sld [smem:[#allocation6_spill]] }
  0x13   :  { %130 = vadd.xlane.f32.xlu0 %v129_v6  ;;  %136 = vadd.xlane.f32.xlu1 %v135_v7  ;;  %v2632_v6 = vmov 0.0  }
  0x14   :  { %2400 = vmatprep.subr.mxu1 %v2632_v6  ;;  %2402 = vmatprep.mubr.msk.f32.mxu1 %vm2633_vm1, %v2632_v6 }
  0x15   :  { %v71_v28 = vld [vmem:[%s3247_s22] sm:$0xff]  ;;  %v72_v29 = vld [vmem:[%s3247_s22 + $0x8] sm:$0xff]  ;;  %v73_v31 = vld [vmem:[%s3247_s22 + $0x10] sm:$0xff] }
  0x16   :  { %v201_v30 = vpack.c.bf16 %v72_v29, %v71_v28  ;;  %v74_v32 = vld [vmem:[%s3247_s22 + $0x18] sm:$0xff]  ;;  %v2284_v48 = vld [vmem:[%s3248_s28] ss:$0 sm:$0xff]  ;;  %s3250_s22 = sld [smem:[#allocation10_spill]] }
  0x17   :  { %v202_v33 = vpack.c.bf16 %v74_v32, %v73_v31  ;;  %v2285_v54 = vld [vmem:[%s3249_s4] ss:$0 sm:$0xff] }
  0x18   :  { %2392 = vmatprep.subr.bf16.mxu0 %v201_v30 }
  0x19   :  { %2393 = vmatpush3.bf16.msra.mxu0 %v201_v30 }
  0x1a   :  { %2394 = vmatprep.subr.bf16.mxu0 %v202_v33 }
  0x1c   :  { %v2286_v7 = vld [vmem:[%s3250_s22] ss:$0 sm:$0xff] }
  0x1d   :  { %2395 = vmatpush3.bf16.msra.mxu0 %v202_v33 }
  0x1e   :  { %2415 = vmatprep.subr.mxu0 %v2632_v6 }
  0x9c   :  { %v128_v8 = vpop.xlane.xlu0 %127  ;;  %v134_v9 = vpop.xlane.xlu1 %133 }
  0x9d   :  { %v139_v10 = vmul.f32 0.03125, %v128_v8  ;;  %v141_v11 = vmul.f32 0.03125, %v134_v9 }
  0x9f   :  { %v143_v12 = vsub.f32 %v2753_v0, %v139_v10  ;;  %v145_v13 = vsub.f32 %v2758_v1, %v141_v11 }
  0xa0   :  { %v131_v14 = vpop.xlane.xlu0 %130  ;;  %v137_v15 = vpop.xlane.xlu1 %136 }
  0xa1   :  { %v140_v16 = vmul.f32 0.03125, %v131_v14  ;;  %v142_v17 = vmul.f32 0.03125, %v137_v15  ;;  %v147_v18 = vmul.f32 %v143_v12, %v143_v12  ;;  %v149_v19 = vmul.f32 %v145_v13, %v145_v13 }
  0xa3   :  { %v144_v20 = vsub.f32 %v2763_v2, %v140_v16  ;;  %v146_v21 = vsub.f32 %v2772_v5, %v142_v17  ;;  %v151_v22 = vsel %vm125_vm0, %v147_v18, 0.0  ;;  %v157_v23 = vsel %vm125_vm0, %v149_v19, 0.0 }
  0xa4   :  { %152 = vadd.xlane.f32.xlu0 %v151_v22 }
  0xa5   :  { %v148_v24 = vmul.f32 %v144_v20, %v144_v20  ;;  %v150_v25 = vmul.f32 %v146_v21, %v146_v21 }
  0xa7   :  { %v154_v26 = vsel %vm125_vm0, %v148_v24, 0.0  ;;  %v160_v27 = vsel %vm125_vm0, %v150_v25, 0.0 }
  0xa8   :  { %158 = vadd.xlane.f32.xlu0 %v157_v23  ;;  %155 = vadd.xlane.f32.xlu1 %v154_v26 }
  0xac   :  { %161 = vadd.xlane.f32.xlu1 %v160_v27 }
 0x131   :  { %v153_v34 = vpop.xlane.xlu0 %152 }
 0x132   :  { %v163_v35 = vmul.f32 0.03125, %v153_v34  ;;  %v264_v34 = vlaneseq }
 0x134   :  { %v167_v36 = vadd.f32 1e-05, %v163_v35 }
 0x135   :  { %v156_v37 = vpop.xlane.xlu1 %155  ;;  %v159_v38 = vpop.xlane.xlu0 %158 }
 0x136   :  { %2540 = vrsqrt.f32 %v167_v36  ;;  %v164_v39 = vmul.f32 0.03125, %v156_v37  ;;  %v165_v40 = vmul.f32 0.03125, %v159_v38  ;;  %v2879_v37 = vand.u32 127, %v264_v34 }
 0x137   :  { %v2881_v38 = vshrl.u32 %v264_v34, 7 }
 0x138   :  { %v168_v41 = vadd.f32 1e-05, %v164_v39  ;;  %v169_v42 = vadd.f32 1e-05, %v165_v40  ;;  %vm1014_vm5 = vcmp.ge.s32.totalorder %v2879_v37, 16  ;;  %vm1015_vm6 = vcmp.lt.s32.totalorder %v2879_v37, 32 }
 0x139   :  { %v162_v43 = vpop.xlane.xlu1 %161  ;;  %vm2885_vm3 = vcmp.le.s32.totalorder %v2879_v37, %v2881_v38  ;;  %vm2939_vm7 = vmand %vm1014_vm5, %vm1015_vm6  ;;  %vm632_vm8 = vcmp.lt.s32.totalorder %v2879_v37, 16  ;;  %v78_v37 = vld [vmem:[%s3222_s6 + $0x10] sm:$0xff] }
 0x13a   :  { %2542 = vrsqrt.f32 %v168_v41  ;;  %v166_v44 = vmul.f32 0.03125, %v162_v43 }
 0x13b   :  { %2544 = vrsqrt.f32 %v169_v42 }
 0x13c   :  { %v170_v45 = vadd.f32 1e-05, %v166_v44 }
 0x13e   :  { %2546 = vrsqrt.f32 %v170_v45 }
 0x140   :  { %v2541_v46 = vpop.eup %2540 }
 0x141   :  { %v175_v47 = vmul.f32 %v2541_v46, %v143_v12 }
 0x143   :  { %v185_v52 = vmul.f32 %v2284_v48, %v175_v47 }
 0x144   :  { %v2543_v49 = vpop.eup %2542 }
 0x145   :  { %v2545_v50 = vpop.eup %2544  ;;  %v176_v51 = vmul.f32 %v2543_v49, %v144_v20  ;;  %v195_v58 = vadd.f32 %v2285_v54, %v185_v52 }
 0x146   :  { %v177_v53 = vmul.f32 %v2545_v50, %v145_v13 }
 0x147   :  { %v186_v55 = vmul.f32 %v2284_v48, %v176_v51 }
 0x148   :  { %v2547_v56 = vpop.eup %2546  ;;  %v187_v60 = vmul.f32 %v2284_v48, %v177_v53 }
 0x149   :  { %v178_v57 = vmul.f32 %v2547_v56, %v146_v21  ;;  %v196_v59 = vadd.f32 %v2285_v54, %v186_v55 }
 0x14a   :  { %v197_v63 = vadd.f32 %v2285_v54, %v187_v60 }
 0x14b   :  { %v199_v61 = vpack.c.bf16 %v196_v59, %v195_v58  ;;  %v188_v62 = vmul.f32 %v2284_v48, %v178_v57 }
 0x14d   :  { %2396 = vmatprep.mubr.msk.bf16.mxu0 %vm125_vm0, %v199_v61  ;;  %v198_v3 = vadd.f32 %v2285_v54, %v188_v62 }
 0x14f   :  { %v200_v4 = vpack.c.bf16 %v198_v3, %v197_v63 }
 0x151   :  { %2397 = vmatmul.mubr.msk.bf16.vlgmr.msra.gmra.mrb[0].mxu0 %vm125_vm0, %v200_v4 }
 0x152   :  { %2417 = vmatprep.mubr.msk.f32.mxu0 %vm2633_vm1, %v2632_v6 }
 0x224   :  { %v2398_v8 = vpop.f32.mrb[0].mxu0 }
 0x225   :  { %v2815_v9 = vadd.f32 %v2398_v8, %v2286_v7  ;;  %v249_v10 = vpop.f32.mrb[1].mxu0 }
 0x226   :  { %v2817_v11 = vadd.f32 %v2286_v7, %v249_v10  ;;  %v2399_v12 = vpop.f32.mrb[2].mxu0 }
 0x227   :  { %422 = vrot.lane.b32.xlu1 %v2815_v9, %s2634_s23  ;;  %v252_v13 = vpop.f32.mrb[3].mxu0  ;;  %v2821_v14 = vadd.f32 %v2399_v12, %v2286_v7 }
 0x228   :  { %267 = vrot.lane.b32.xlu0 %v2817_v11, %s2634_s23  ;;  %v2825_v15 = vadd.f32 %v2286_v7, %v252_v13 }
 0x22b   :  { %499 = vrot.lane.b32.xlu1 %v2821_v14, %s2634_s23 }
 0x22c   :  { %808 = vrot.lane.b32.xlu0 %v2815_v9, %s2635_s1 }
 0x22f   :  { %345 = vrot.lane.b32.xlu1 %v2825_v15, %s2634_s23 }
 0x230   :  { %652 = vrot.lane.b32.xlu0 %v2817_v11, %s2635_s1 }
 0x233   :  { %886 = vrot.lane.b32.xlu1 %v2821_v14, %s2635_s1 }
 0x234   :  { %650 = vrot.lane.b32.xlu0 %v2817_v11, %s2636_s24 }
 0x237   :  { %730 = vrot.lane.b32.xlu1 %v2825_v15, %s2635_s1 }
 0x238   :  { %806 = vrot.lane.b32.xlu0 %v2815_v9, %s2636_s24 }
 0x23b   :  { %728 = vrot.lane.b32.xlu1 %v2825_v15, %s2636_s24 }
 0x23f   :  { %884 = vrot.lane.b32.xlu1 %v2821_v14, %s2636_s24 }
 0x299   :  { %v423_v16 = vpop.permute.xlu1 %422 }
 0x29a   :  { %v268_v17 = vpop.permute.xlu0 %267 }
 0x29b   :  { %2401 = vmatpush3.xpose.msk.msra.mxu1 %vm269_vm2, %v268_v17 }
 0x29c   :  { %2405 = vmatprep.subr.mxu1 %v2632_v6 }
 0x29d   :  { %v500_v18 = vpop.permute.xlu1 %499 }
 0x29e   :  { %2403 = vmatmul.mubr.msk.f32.vlgmr.msra.gmra.mrb[0].mxu1 %vm269_vm2, %v2817_v11  ;;  %2416 = vmatpush3.xpose.msk.msra.mxu0 %vm269_vm2, %v500_v18  ;;  %v809_v19 = vpop.permute.xlu0 %808 }
 0x29f   :  { %2407 = vmatprep.mubr.msk.f32.mxu1 %vm2633_vm1, %v2632_v6  ;;  %2425 = vmatprep.subr.mxu0 %v2632_v6 }
 0x2a1   :  { %2418 = vmatmul.mubr.msk.f32.vlgmr.msra.gmra.mrb[4].mxu0 %vm269_vm2, %v2821_v14  ;;  %v346_v20 = vpop.permute.xlu1 %345 }
 0x2a2   :  { %2406 = vmatpush3.xpose.msk.msra.mxu1 %vm269_vm2, %v346_v20  ;;  %2427 = vmatprep.mubr.msk.f32.mxu0 %vm2633_vm1, %v2632_v6  ;;  %v653_v21 = vpop.permute.xlu0 %652 }
 0x2a3   :  { %2410 = vmatprep.subr.mxu1 %v2632_v6 }
 0x2a5   :  { %v887_v22 = vpop.permute.xlu1 %886  ;;  %2408 = vmatmul.mubr.msk.f32.vlgmr.msra.gmra.mrb[2].mxu1 %vm269_vm2, %v2825_v15 }
 0x2a6   :  { %2411 = vmatpush3.xpose.msk.msra.mxu1 %vm269_vm2, %v423_v16  ;;  %2412 = vmatprep.mubr.msk.f32.mxu1 %vm2633_vm1, %v2632_v6  ;;  %v651_v24 = vpop.permute.xlu0 %650 }
 0x2a7   :  { %2420 = vmatprep.subr.mxu1 %v2632_v6 }
 0x2a9   :  { %v731_v23 = vpop.permute.xlu1 %730  ;;  %2413 = vmatmul.mubr.msk.f32.vlgmr.msra.gmra.mrb[4].mxu1 %vm269_vm2, %v2815_v9 }
 0x2aa   :  { %2421 = vmatpush3.xpose.msk.msra.mxu1 %vm269_vm2, %v653_v21  ;;  %2426 = vmatpush3.xpose.msk.msra.mxu0 %vm269_vm2, %v731_v23  ;;  %v807_v26 = vpop.permute.xlu0 %806 }
 0x2ab   :  { %2422 = vmatprep.mubr.msk.f32.mxu1 %vm2633_vm1, %v2632_v6  ;;  %2435 = vmatprep.subr.mxu0 %v2632_v6 }
 0x2ac   :  { %2430 = vmatprep.subr.mxu1 %v2632_v6 }
 0x2ad   :  { %v729_v25 = vpop.permute.xlu1 %728  ;;  %2423 = vmatmul.mubr.msk.f32.vlgmr.msra.gmra.mrb[6].mxu1 %vm269_vm2, %v651_v24 }
 0x2ae   :  { %2428 = vmatmul.mubr.msk.f32.vlgmr.msra.gmra.mrb[6].mxu0 %vm269_vm2, %v729_v25  ;;  %2431 = vmatpush3.xpose.msk.msra.mxu1 %vm269_vm2, %v809_v19 }
 0x2af   :  { %2436 = vmatpush3.xpose.msk.msra.mxu0 %vm269_vm2, %v887_v22  ;;  %2432 = vmatprep.mubr.msk.f32.mxu1 %vm2633_vm1, %v2632_v6 }
 0x2b0   :  { %2437 = vmatprep.mubr.msk.f32.mxu0 %vm2633_vm1, %v2632_v6  ;;  %2445 = vmatprep.subr.mxu0 %v2632_v6 }
 0x2b1   :  { %v885_v27 = vpop.permute.xlu1 %884  ;;  %2433 = vmatmul.mubr.msk.f32.vlgmr.msra.gmra.mrb[8].mxu1 %vm269_vm2, %v807_v26  ;;  %2440 = vmatprep.subr.mxu1 %v2632_v6 }
 0x2b2   :  { %2438 = vmatmul.mubr.msk.f32.vlgmr.msra.gmra.mrb[8].mxu0 %vm269_vm2, %v885_v27  ;;  %2442 = vmatprep.mubr.msk.f32.mxu1 %vm2633_vm1, %v2632_v6 }
 0x2b3   :  { %2447 = vmatprep.mubr.msk.f32.mxu0 %vm2633_vm1, %v2632_v6 }
 0x371   :  { %v340_v28 = vpop.f32.mrb[0].mxu1 }
 0x372   :  { %v2404_v29 = vpop.f32.mrb[1].mxu1  ;;  %v575_v3 = vmul.f32 0.25, %v340_v28 }
 0x374   :  { %v571_v30 = vpop.f32.mrb[4].mxu0  ;;  %v582_v10 = vsel %vm2885_vm3, %v575_v3, -1e+30 }
 0x375   :  { %v2419_v31 = vpop.f32.mrb[5].mxu0  ;;  %v578_v51 = vmul.f32 0.25, %v571_v30  ;;  %v587_v12 = vsel %vm586_vm4, %v582_v10, -inf }
 0x377   :  { %v585_v60 = vsel %vm2885_vm3, %v578_v51, -1e+30 }
 0x378   :  { %v417_v32 = vpop.f32.mrb[2].mxu1  ;;  %v596_v62 = vsel %vm586_vm4, %v585_v60, -inf }
 0x379   :  { %v2409_v33 = vpop.f32.mrb[3].mxu1  ;;  %v576_v42 = vmul.f32 0.25, %v417_v32 }
 0x37b   :  { %v583_v55 = vsel %vm2885_vm3, %v576_v42, -1e+30 }
 0x37c   :  { %v494_v35 = vpop.f32.mrb[4].mxu1  ;;  %v590_v58 = vsel %vm586_vm4, %v583_v55, -inf }
 0x37d   :  { %v2414_v36 = vpop.f32.mrb[5].mxu1  ;;  %v577_v8 = vmul.f32 0.25, %v494_v35 }
 0x37f   :  { %v584_v13 = vsel %vm2885_vm3, %v577_v8, -1e+30 }
 0x380   :  { %v724_v39 = vpop.f32.mrb[6].mxu1  ;;  %v593_v16 = vsel %vm586_vm4, %v584_v13, -inf }
 0x381   :  { %v2424_v40 = vpop.f32.mrb[7].mxu1  ;;  %v802_v41 = vpop.f32.mrb[6].mxu0  ;;  %v962_v52 = vmul.f32 0.25, %v724_v39 }
 0x382   :  { %v963_v43 = vmul.f32 0.25, %v802_v41  ;;  %v2429_v44 = vpop.f32.mrb[7].mxu0 }
 0x383   :  { %v966_v61 = vsel %vm2885_vm3, %v962_v52, -1e+30 }
 0x384   :  { %v880_v46 = vpop.f32.mrb[8].mxu1  ;;  %v967_v47 = vsel %vm2885_vm3, %v963_v43, -1e+30  ;;  %v970_v63 = vsel %vm586_vm4, %v966_v61, -inf }
 0x385   :  { %v2434_v48 = vpop.f32.mrb[9].mxu1  ;;  %v958_v49 = vpop.f32.mrb[8].mxu0  ;;  %v973_v50 = vsel %vm586_vm4, %v967_v47, -inf  ;;  %v964_v59 = vmul.f32 0.25, %v880_v46 }
 0x386   :  { %v965_v53 = vmul.f32 0.25, %v958_v49  ;;  %974 = vmax.xlane.f32.xlu1 %v973_v50  ;;  %v2439_v54 = vpop.f32.mrb[9].mxu0 }
 0x387   :  { %v968_v4 = vsel %vm2885_vm3, %v964_v59, -1e+30 }
 0x388   :  { %v969_v56 = vsel %vm2885_vm3, %v965_v53, -1e+30  ;;  %v976_v7 = vsel %vm586_vm4, %v968_v4, -inf }
 0x389   :  { %v979_v57 = vsel %vm586_vm4, %v969_v56, -inf }
 0x38a   :  { %980 = vmax.xlane.f32.xlu0 %v979_v57  ;;  %591 = vmax.xlane.f32.xlu1 %v590_v58 }
 0x38e   :  { %597 = vmax.xlane.f32.xlu1 %v596_v62  ;;  %971 = vmax.xlane.f32.xlu0 %v970_v63 }
 0x392   :  { %977 = vmax.xlane.f32.xlu0 %v976_v7 }
 0x396   :  { %588 = vmax.xlane.f32.xlu0 %v587_v12 }
 0x39a   :  { %594 = vmax.xlane.f32.xlu0 %v593_v16 }
 0x413   :  { %v975_v17 = vpop.xlane.xlu1 %974 }
 0x414   :  { %v983_v24 = vsub.f32 %v967_v47, %v975_v17 }
 0x416   :  { %v988_v28 = vmul.f32 1.442695, %v983_v24 }
 0x417   :  { %v592_v18 = vpop.xlane.xlu1 %591  ;;  %v981_v19 = vpop.xlane.xlu0 %980 }
 0x418   :  { %v600_v20 = vsub.f32 %v583_v55, %v592_v18  ;;  %v985_v29 = vsub.f32 %v969_v56, %v981_v19 }
 0x41a   :  { %v605_v25 = vmul.f32 1.442695, %v600_v20  ;;  %v992_v32 = vmul.f32 1.442695, %v985_v29  ;;  %v76_v29 = vld [vmem:[%s3222_s6] sm:$0xff] }
 0x41b   :  { %v598_v21 = vpop.xlane.xlu1 %597  ;;  %v972_v22 = vpop.xlane.xlu0 %971 }
 0x41c   :  { %v602_v23 = vsub.f32 %v585_v60, %v598_v21  ;;  %v982_v33 = vsub.f32 %v966_v61, %v972_v22 }
 0x41e   :  { %v609_v26 = vmul.f32 1.442695, %v602_v23  ;;  %v986_v40 = vmul.f32 1.442695, %v982_v33 }
 0x41f   :  { %v978_v27 = vpop.xlane.xlu0 %977 }
 0x420   :  { %2548 = vpow2.f32 %v609_v26  ;;  %v984_v41 = vsub.f32 %v968_v4, %v978_v27 }
 0x421   :  { %2550 = vpow2.f32 %v605_v25 }
 0x422   :  { %2552 = vpow2.f32 %v988_v28  ;;  %v990_v45 = vmul.f32 1.442695, %v984_v41 }
 0x423   :  { %v589_v30 = vpop.xlane.xlu0 %588 }
 0x424   :  { %v599_v31 = vsub.f32 %v582_v10, %v589_v30  ;;  %v77_v30 = vld [vmem:[%s3222_s6 + $0x8] sm:$0xff] }
 0x426   :  { %v603_v34 = vmul.f32 1.442695, %v599_v31  ;;  %v1607_v31 = vpack.c.bf16 %v77_v30, %v76_v29 }
 0x427   :  { %v595_v35 = vpop.xlane.xlu0 %594 }
 0x428   :  { %2554 = vpow2.f32 %v603_v34  ;;  %v601_v36 = vsub.f32 %v584_v13, %v595_v35 }
 0x429   :  { %2556 = vpow2.f32 %v992_v32  ;;  %v79_v32 = vld [vmem:[%s3222_s6 + $0x18] sm:$0xff] }
 0x42a   :  { %v2913_v39 = vpop.eup %2548  ;;  %v607_v42 = vmul.f32 1.442695, %v601_v36  ;;  %v1608_v33 = vpack.c.bf16 %v79_v32, %v78_v37 }
 0x42b   :  { %v620_v43 = vsel %vm586_vm4, %v2913_v39, 0.0  ;;  %v2917_v44 = vpop.eup %2550 }
 0x42c   :  { %2558 = vpow2.f32 %v607_v42  ;;  %621 = vadd.xlane.f32.xlu1 %v620_v43  ;;  %v614_v46 = vsel %vm586_vm4, %v2917_v44, 0.0  ;;  %v2553_v47 = vpop.eup %2552 }
 0x42d   :  { %2560 = vpow2.f32 %v986_v40  ;;  %v997_v49 = vsel %vm586_vm4, %v2553_v47, 0.0 }
 0x42e   :  { %2562 = vpow2.f32 %v990_v45 }
 0x430   :  { %615 = vadd.xlane.f32.xlu1 %v614_v46 }
 0x432   :  { %v2921_v48 = vpop.eup %2554 }
 0x433   :  { %v611_v50 = vsel %vm586_vm4, %v2921_v48, 0.0  ;;  %v2557_v51 = vpop.eup %2556 }
 0x434   :  { %998 = vadd.xlane.f32.xlu1 %v997_v49  ;;  %612 = vadd.xlane.f32.xlu0 %v611_v50  ;;  %v1003_v53 = vsel %vm586_vm4, %v2557_v51, 0.0 }
 0x436   :  { %v2926_v52 = vpop.eup %2558 }
 0x437   :  { %v617_v54 = vsel %vm586_vm4, %v2926_v52, 0.0  ;;  %v2561_v55 = vpop.eup %2560 }
 0x438   :  { %1004 = vadd.xlane.f32.xlu1 %v1003_v53  ;;  %618 = vadd.xlane.f32.xlu0 %v617_v54  ;;  %v994_v56 = vsel %vm586_vm4, %v2561_v55, 0.0  ;;  %v2563_v57 = vpop.eup %2562 }
 0x439   :  { %v1000_v58 = vsel %vm586_vm4, %v2563_v57, 0.0 }
 0x43c   :  { %995 = vadd.xlane.f32.xlu0 %v994_v56 }
 0x440   :  { %1001 = vadd.xlane.f32.xlu0 %v1000_v58 }
 0x449   :  { %636 = vrot.lane.b32.xlu1 %v2825_v15, %s2637_s2 }
 0x44d   :  { %638 = vrot.lane.b32.xlu1 %v2815_v9, %s2637_s2 }
 0x451   :  { %640 = vrot.lane.b32.xlu1 %v2821_v14, %s2637_s2 }
 0x456   :  { %634 = vrot.lane.b32.xlu0 %v2817_v11, %s2637_s2 }
 0x4b9   :  { %v622_v59 = vpop.xlane.xlu1 %621 }
 0x4bd   :  { %v616_v60 = vpop.xlane.xlu1 %615 }
 0x4c1   :  { %v999_v61 = vpop.xlane.xlu1 %998  ;;  %v613_v62 = vpop.xlane.xlu0 %612 }
 0x4c2   :  { %2564 = vrcp.f32 %v999_v61 }
 0x4c5   :  { %v1005_v63 = vpop.xlane.xlu1 %1004  ;;  %v619_v3 = vpop.xlane.xlu0 %618 }
 0x4c6   :  { %2566 = vrcp.f32 %v1005_v63 }
 0x4c7   :  { %2568 = vrcp.f32 %v616_v60 }
 0x4c9   :  { %v637_v9 = vpop.permute.xlu1 %636  ;;  %v996_v14 = vpop.xlane.xlu0 %995 }
 0x4ca   :  { %2570 = vrcp.f32 %v996_v14  ;;  %2446 = vmatpush3.msk.msra.mxu0 %vm2939_vm7, %v637_v9 }
 0x4cb   :  { %2455 = vmatprep.subr.mxu0 %v2632_v6  ;;  %2572 = vrcp.f32 %v622_v59 }
 0x4cc   :  { %v2565_v11 = vpop.eup %2564 }
 0x4cd   :  { %v1009_v4 = vmul.f32 %v2565_v11, %v2553_v47  ;;  %v639_v7 = vpop.permute.xlu1 %638  ;;  %v1002_v8 = vpop.xlane.xlu0 %1001  ;;  %v2323_v47 = vld [vmem:[%s3223_s7] ss:$0 sm:$0xff] }
 0x4ce   :  { %2574 = vrcp.f32 %v1002_v8 }
 0x4cf   :  { %2448 = vmatmul.mubr.msk.f32.vlgmr.msra.gmra.mrb[10].mxu0 %vm586_vm4, %v1009_v4  ;;  %2576 = vrcp.f32 %v613_v62 }
 0x4d0   :  { %v2567_v10 = vpop.eup %2566  ;;  %2457 = vmatprep.mubr.msk.f32.mxu0 %vm2633_vm1, %v2632_v6  ;;  %2578 = vrcp.f32 %v619_v3 }
 0x4d1   :  { %v1013_v12 = vmul.f32 %v2567_v10, %v2557_v51  ;;  %v641_v13 = vpop.permute.xlu1 %640  ;;  %v635_v16 = vpop.permute.xlu0 %634 }
 0x4d2   :  { %v2569_v17 = vpop.eup %2568  ;;  %2441 = vmatpush3.msk.msra.mxu1 %vm2939_vm7, %v635_v16  ;;  %2456 = vmatpush3.msk.msra.mxu0 %vm2939_vm7, %v641_v13 }
 0x4d3   :  { %2458 = vmatmul.mubr.msk.f32.vlgmr.msra.gmra.mrb[12].mxu0 %vm586_vm4, %v1013_v12  ;;  %2465 = vmatprep.subr.mxu0 %v2632_v6  ;;  %v626_v19 = vmul.f32 %v2569_v17, %v2917_v44 }
 0x4d4   :  { %v2571_v18 = vpop.eup %2570  ;;  %2466 = vmatpush3.msk.msra.mxu0 %vm632_vm8, %v637_v9  ;;  %2450 = vmatprep.subr.mxu1 %v2632_v6 }
 0x4d5   :  { %v1007_v20 = vmul.f32 %v2571_v18, %v2561_v55  ;;  %2467 = vmatprep.mubr.msk.f32.mxu0 %vm2633_vm1, %v2632_v6  ;;  %2475 = vmatprep.subr.mxu0 %v2632_v6  ;;  %v2573_v21 = vpop.eup %2572 }
 0x4d6   :  { %v630_v23 = vmul.f32 %v2573_v21, %v2913_v39  ;;  %v84_v21 = vld [vmem:[%s3226_s10 + $0x8] sm:$0xff] }
 0x4d7   :  { %2443 = vmatmul.mubr.msk.f32.vlgmr.msra.gmra.mrb[10].mxu1 %vm586_vm4, %v1007_v20  ;;  %2468 = vmatmul.mubr.msk.f32.vlgmr.msra.gmra.mrb[10].mxu0 %vm586_vm4, %v626_v19  ;;  %v83_v20 = vld [vmem:[%s3226_s10] sm:$0xff] }
 0x4d8   :  { %v2575_v22 = vpop.eup %2574  ;;  %2451 = vmatpush3.msk.msra.mxu1 %vm2939_vm7, %v639_v7  ;;  %2476 = vmatpush3.msk.msra.mxu0 %vm632_vm8, %v641_v13 }
 0x4d9   :  { %v1011_v24 = vmul.f32 %v2575_v22, %v2563_v57  ;;  %2452 = vmatprep.mubr.msk.f32.mxu1 %vm2633_vm1, %v2632_v6  ;;  %2460 = vmatprep.subr.mxu1 %v2632_v6  ;;  %v2577_v25 = vpop.eup %2576  ;;  %v1752_v22 = vpack.c.bf16 %v84_v21, %v83_v20  ;;  %v102_v21 = vld [vmem:[%s3228_s12 + $0x70] sm:$0xff] }
 0x4da   :  { %2477 = vmatprep.mubr.msk.f32.mxu0 %vm2633_vm1, %v2632_v6  ;;  %v624_v26 = vmul.f32 %v2577_v25, %v2921_v48  ;;  %v2579_v27 = vpop.eup %2578 }
 0x4db   :  { %2453 = vmatmul.mubr.msk.f32.vlgmr.msra.gmra.mrb[12].mxu1 %vm586_vm4, %v1011_v24  ;;  %2478 = vmatmul.mubr.msk.f32.vlgmr.msra.gmra.mrb[12].mxu0 %vm586_vm4, %v630_v23  ;;  %v628_v28 = vmul.f32 %v2579_v27, %v2926_v52  ;;  %v85_v23 = vld [vmem:[%s3226_s10 + $0x10] sm:$0xff]  ;;  %v86_v24 = vld [vmem:[%s3226_s10 + $0x18] sm:$0xff] }
 0x4dc   :  { %2461 = vmatpush3.msk.msra.mxu1 %vm632_vm8, %v635_v16  ;;  %2462 = vmatprep.mubr.msk.f32.mxu1 %vm2633_vm1, %v2632_v6  ;;  %v1753_v25 = vpack.c.bf16 %v86_v24, %v85_v23  ;;  %v2326_v24 = vld [vmem:[%s3227_s11] ss:$0 sm:$0xff] }
 0x4dd   :  { %2470 = vmatprep.subr.mxu1 %v2632_v6  ;;  %2488 = vmatprep.subr.bf16.mxu0 %v1752_v22 }
 0x4de   :  { %2489 = vmatpush3.bf16.msra.mxu0 %v1752_v22  ;;  %v103_v22 = vld [vmem:[%s3228_s12 + $0x78] sm:$0xff] }
 0x4df   :  { %2463 = vmatmul.mubr.msk.f32.vlgmr.msra.gmra.mrb[10].mxu1 %vm586_vm4, %v624_v26  ;;  %2490 = vmatprep.subr.bf16.mxu0 %v1753_v25  ;;  %v1860_v23 = vpack.c.bf16 %v103_v22, %v102_v21 }
 0x4e0   :  { %2471 = vmatpush3.msk.msra.mxu1 %vm632_vm8, %v639_v7  ;;  %2472 = vmatprep.mubr.msk.f32.mxu1 %vm2633_vm1, %v2632_v6 }
 0x4e1   :  { %2480 = vmatprep.subr.bf16.mxu1 %v1607_v31 }
 0x4e2   :  { %2491 = vmatpush3.bf16.msra.mxu0 %v1753_v25 }
 0x4e3   :  { %2473 = vmatmul.mubr.msk.f32.vlgmr.msra.gmra.mrb[12].mxu1 %vm586_vm4, %v628_v28  ;;  %2516 = vmatprep.subr.bf16.mxu0 %v2632_v6 }
 0x4e4   :  { %2481 = vmatpush3.bf16.msra.mxu1 %v1607_v31 }
 0x4e5   :  { %2482 = vmatprep.subr.bf16.mxu1 %v1608_v33 }
 0x4e8   :  { %2483 = vmatpush3.bf16.msra.mxu1 %v1608_v33 }
 0x5aa   :  { %v1455_v34 = vpop.f32.mrb[10].mxu0 }
 0x5ab   :  { %v2469_v35 = vpop.f32.mrb[11].mxu0 }
 0x5ae   :  { %v1601_v36 = vpop.f32.mrb[12].mxu0 }
 0x5af   :  { %v2479_v39 = vpop.f32.mrb[13].mxu0 }
 0x5b2   :  { %v1382_v40 = vpop.f32.mrb[10].mxu1 }
 0x5b3   :  { %v1605_v41 = vpack.c.bf16 %v1455_v34, %v1382_v40  ;;  %v2464_v42 = vpop.f32.mrb[11].mxu1  ;;  %v2324_v40 = vld [vmem:[%s3224_s8] ss:$0 sm:$0xff] }
 0x5b5   :  { %2484 = vmatprep.mubr.msk.bf16.mxu1 %vm125_vm0, %v1605_v41 }
 0x5b6   :  { %v1528_v43 = vpop.f32.mrb[12].mxu1 }
 0x5b7   :  { %v1606_v44 = vpack.c.bf16 %v1601_v36, %v1528_v43  ;;  %v2474_v45 = vpop.f32.mrb[13].mxu1 }
 0x5b9   :  { %2485 = vmatmul.mubr.msk.bf16.vlgmr.msra.gmra.mrb[16].mxu1 %vm125_vm0, %v1606_v44 }
 0x68c   :  { %v2486_v46 = vpop.f32.mrb[16].mxu1 }
 0x68d   :  { %v1649_v48 = vpop.f32.mrb[17].mxu1  ;;  %v1666_v49 = vadd.f32 %v2486_v46, %v2758_v1  ;;  %v2325_v46 = vld [vmem:[%s3225_s9] ss:$0 sm:$0xff] }
 0x68e   :  { %v1664_v50 = vadd.f32 %v1649_v48, %v2753_v0  ;;  %v2487_v51 = vpop.f32.mrb[18].mxu1 }
 0x68f   :  { %v1652_v52 = vpop.f32.mrb[19].mxu1  ;;  %v3012_v55 = vadd.f32 %v2323_v47, %v1666_v49  ;;  %v1667_v56 = vadd.f32 %v2487_v51, %v2772_v5 }
 0x690   :  { %v3009_v53 = vadd.f32 %v2323_v47, %v1664_v50  ;;  %v1665_v54 = vadd.f32 %v1652_v52, %v2763_v2 }
 0x691   :  { %v3021_v0 = vadd.f32 %v2323_v47, %v1667_v56  ;;  %v1684_v59 = vsel %vm125_vm0, %v3012_v55, 0.0 }
 0x692   :  { %v3015_v57 = vadd.f32 %v2323_v47, %v1665_v54  ;;  %v1678_v58 = vsel %vm125_vm0, %v3009_v53, 0.0 }
 0x693   :  { %1679 = vadd.xlane.f32.xlu0 %v1678_v58  ;;  %v1687_v2 = vsel %vm125_vm0, %v3021_v0, 0.0 }
 0x694   :  { %v1681_v1 = vsel %vm125_vm0, %v3015_v57, 0.0 }
 0x695   :  { %1682 = vadd.xlane.f32.xlu1 %v1681_v1 }
 0x697   :  { %1685 = vadd.xlane.f32.xlu0 %v1684_v59 }
 0x69b   :  { %1688 = vadd.xlane.f32.xlu0 %v1687_v2 }
 0x720   :  { %v1680_v5 = vpop.xlane.xlu0 %1679 }
 0x721   :  { %v1690_v60 = vmul.f32 0.03125, %v1680_v5  ;;  %v88_v5 = vld [vmem:[%s3228_s12] sm:$0xff] }
 0x722   :  { %v1683_v61 = vpop.xlane.xlu1 %1682 }
 0x723   :  { %v1694_v62 = vsub.f32 %v3009_v53, %v1690_v60  ;;  %v1691_v63 = vmul.f32 0.03125, %v1683_v61  ;;  %v89_v60 = vld [vmem:[%s3228_s12 + $0x8] sm:$0xff] }
 0x724   :  { %v1686_v3 = vpop.xlane.xlu0 %1685  ;;  %v1853_v61 = vpack.c.bf16 %v89_v60, %v88_v5 }
 0x725   :  { %v1695_v15 = vsub.f32 %v3015_v57, %v1691_v63  ;;  %v1692_v9 = vmul.f32 0.03125, %v1686_v3  ;;  %v1698_v14 = vmul.f32 %v1694_v62, %v1694_v62  ;;  %v91_v63 = vld [vmem:[%s3228_s12 + $0x18] sm:$0xff] }
 0x726   :  { %2496 = vmatprep.subr.bf16.mxu1 %v1853_v61 }
 0x727   :  { %v1696_v11 = vsub.f32 %v3012_v55, %v1692_v9  ;;  %v1702_v4 = vsel %vm125_vm0, %v1698_v14, 0.0  ;;  %v1699_v7 = vmul.f32 %v1695_v15, %v1695_v15  ;;  %2497 = vmatpush3.bf16.msra.mxu1 %v1853_v61  ;;  %v93_v9 = vld [vmem:[%s3228_s12 + $0x28] sm:$0xff] }
 0x728   :  { %1703 = vadd.xlane.f32.xlu0 %v1702_v4  ;;  %v1689_v8 = vpop.xlane.xlu0 %1688  ;;  %v95_v4 = vld [vmem:[%s3228_s12 + $0x38] sm:$0xff] }
 0x729   :  { %v1693_v10 = vmul.f32 0.03125, %v1689_v8  ;;  %v1705_v12 = vsel %vm125_vm0, %v1699_v7, 0.0  ;;  %v1700_v13 = vmul.f32 %v1696_v11, %v1696_v11  ;;  %v96_v8 = vld [vmem:[%s3228_s12 + $0x40] sm:$0xff] }
 0x72a   :  { %1706 = vadd.xlane.f32.xlu1 %v1705_v12 }
 0x72b   :  { %v1697_v16 = vsub.f32 %v3021_v0, %v1693_v10  ;;  %v1708_v17 = vsel %vm125_vm0, %v1700_v13, 0.0  ;;  %v97_v10 = vld [vmem:[%s3228_s12 + $0x48] sm:$0xff]  ;;  %v98_v13 = vld [vmem:[%s3228_s12 + $0x50] sm:$0xff] }
 0x72c   :  { %1709 = vadd.xlane.f32.xlu0 %v1708_v17  ;;  %v1857_v12 = vpack.c.bf16 %v97_v10, %v96_v8 }
 0x72d   :  { %v1701_v18 = vmul.f32 %v1697_v16, %v1697_v16 }
 0x72f   :  { %v1711_v19 = vsel %vm125_vm0, %v1701_v18, 0.0  ;;  %v100_v18 = vld [vmem:[%s3228_s12 + $0x60] sm:$0xff] }
 0x730   :  { %1712 = vadd.xlane.f32.xlu1 %v1711_v19  ;;  %v101_v19 = vld [vmem:[%s3228_s12 + $0x68] sm:$0xff] }
 0x731   :  { %v1859_v20 = vpack.c.bf16 %v101_v19, %v100_v18 }
 0x7b5   :  { %v1704_v26 = vpop.xlane.xlu0 %1703 }
 0x7b6   :  { %v1714_v27 = vmul.f32 0.03125, %v1704_v26 }
 0x7b7   :  { %v1707_v28 = vpop.xlane.xlu1 %1706 }
 0x7b8   :  { %v1718_v29 = vadd.f32 1e-05, %v1714_v27  ;;  %v1715_v30 = vmul.f32 0.03125, %v1707_v28 }
 0x7b9   :  { %v1710_v31 = vpop.xlane.xlu0 %1709 }
 0x7ba   :  { %2580 = vrsqrt.f32 %v1718_v29  ;;  %v1719_v37 = vadd.f32 1e-05, %v1715_v30  ;;  %v1716_v32 = vmul.f32 0.03125, %v1710_v31 }
 0x7bc   :  { %2582 = vrsqrt.f32 %v1719_v37  ;;  %v1720_v33 = vadd.f32 1e-05, %v1716_v32 }
 0x7bd   :  { %v1713_v34 = vpop.xlane.xlu1 %1712 }
 0x7be   :  { %2584 = vrsqrt.f32 %v1720_v33  ;;  %v1717_v35 = vmul.f32 0.03125, %v1713_v34 }
 0x7c0   :  { %v1721_v36 = vadd.f32 1e-05, %v1717_v35 }
 0x7c2   :  { %2586 = vrsqrt.f32 %v1721_v36 }
 0x7c4   :  { %v2581_v39 = vpop.eup %2580 }
 0x7c5   :  { %v1726_v41 = vmul.f32 %v2581_v39, %v1694_v62  ;;  %v90_v62 = vld [vmem:[%s3228_s12 + $0x10] sm:$0xff] }
 0x7c6   :  { %v2583_v42 = vpop.eup %2582  ;;  %v1854_v3 = vpack.c.bf16 %v91_v63, %v90_v62 }
 0x7c7   :  { %v1727_v43 = vmul.f32 %v2583_v42, %v1695_v15  ;;  %v1736_v44 = vmul.f32 %v2324_v40, %v1726_v41  ;;  %v92_v15 = vld [vmem:[%s3228_s12 + $0x20] sm:$0xff] }
 0x7c8   :  { %v2585_v45 = vpop.eup %2584  ;;  %2498 = vmatprep.subr.bf16.mxu1 %v1854_v3  ;;  %v1855_v14 = vpack.c.bf16 %v93_v9, %v92_v15 }
 0x7c9   :  { %v1728_v47 = vmul.f32 %v2585_v45, %v1696_v11  ;;  %v1737_v48 = vmul.f32 %v2324_v40, %v1727_v43  ;;  %v1746_v49 = vadd.f32 %v2325_v46, %v1736_v44  ;;  %2499 = vmatpush3.bf16.msra.mxu1 %v1854_v3  ;;  %v94_v11 = vld [vmem:[%s3228_s12 + $0x30] sm:$0xff] }
 0x7ca   :  { %2500 = vmatprep.subr.bf16.mxu1 %v1855_v14  ;;  %v1856_v7 = vpack.c.bf16 %v95_v4, %v94_v11 }
 0x7cb   :  { %v1747_v50 = vadd.f32 %v2325_v46, %v1737_v48  ;;  %v1738_v52 = vmul.f32 %v2324_v40, %v1728_v47 }
 0x7cc   :  { %v2587_v51 = vpop.eup %2586 }
 0x7cd   :  { %v1729_v54 = vmul.f32 %v2587_v51, %v1697_v16  ;;  %v1750_v56 = vpack.c.bf16 %v1747_v50, %v1746_v49  ;;  %v1748_v1 = vadd.f32 %v2325_v46, %v1738_v52  ;;  %2501 = vmatpush3.bf16.msra.mxu1 %v1855_v14  ;;  %v99_v16 = vld [vmem:[%s3228_s12 + $0x58] sm:$0xff] }
 0x7ce   :  { %2502 = vmatprep.subr.bf16.mxu1 %v1856_v7  ;;  %v1858_v17 = vpack.c.bf16 %v99_v16, %v98_v13  ;;  %v2329_v13 = vld [vmem:[%s3229_s13] ss:$0 sm:$0xff] }
 0x7cf   :  { %v1739_v58 = vmul.f32 %v2324_v40, %v1729_v54  ;;  %2492 = vmatprep.mubr.msk.bf16.mxu0 %vm125_vm0, %v1750_v56 }
 0x7d1   :  { %v1749_v59 = vadd.f32 %v2325_v46, %v1739_v58  ;;  %2503 = vmatpush3.bf16.msra.mxu1 %v1856_v7 }
 0x7d2   :  { %2504 = vmatprep.subr.bf16.mxu1 %v1857_v12 }
 0x7d3   :  { %v1751_v2 = vpack.c.bf16 %v1749_v59, %v1748_v1 }
 0x7d5   :  { %2493 = vmatmul.mubr.msk.bf16.vlgmr.msra.gmra.mrb[16].mxu0 %vm125_vm0, %v1751_v2  ;;  %2505 = vmatpush3.bf16.msra.mxu1 %v1857_v12 }
 0x7d6   :  { %2520 = vmatprep.mubr.msk.bf16.mxu0 %vm2633_vm1, %v2632_v6  ;;  %2506 = vmatprep.subr.bf16.mxu1 %v1858_v17 }
 0x7d9   :  { %2507 = vmatpush3.bf16.msra.mxu1 %v1858_v17 }
 0x7da   :  { %2508 = vmatprep.subr.bf16.mxu1 %v1859_v20 }
 0x7dd   :  { %2509 = vmatpush3.bf16.msra.mxu1 %v1859_v20 }
 0x7de   :  { %2510 = vmatprep.subr.bf16.mxu1 %v1860_v23 }
 0x7e1   :  { %2511 = vmatpush3.bf16.msra.mxu1 %v1860_v23 }
 0x8a8   :  { %v2494_v25 = vpop.f32.mrb[16].mxu0 }
 0x8a9   :  { %v1809_v26 = vadd.f32 %v2494_v25, %v2326_v24  ;;  %v1800_v27 = vpop.f32.mrb[17].mxu0 }
 0x8aa   :  { %v1801_v28 = vadd.f32 %v2326_v24, %v1800_v27  ;;  %v2495_v29 = vpop.f32.mrb[18].mxu0 }
 0x8ab   :  { %v1817_v30 = vmul.f32 %v1809_v26, %v1809_v26  ;;  %v1812_v31 = vadd.f32 %v2495_v29, %v2326_v24  ;;  %v1803_v37 = vpop.f32.mrb[19].mxu0 }
 0x8ac   :  { %v1815_v32 = vmul.f32 %v1801_v28, %v1801_v28  ;;  %v1804_v33 = vadd.f32 %v2326_v24, %v1803_v37 }
 0x8ad   :  { %v1821_v34 = vmul.f32 %v1817_v30, %v1809_v26  ;;  %v1818_v35 = vmul.f32 %v1812_v31, %v1812_v31 }
 0x8ae   :  { %v1819_v36 = vmul.f32 %v1815_v32, %v1801_v28  ;;  %v1816_v39 = vmul.f32 %v1804_v33, %v1804_v33 }
 0x8af   :  { %v1825_v40 = vmul.f32 0.044715, %v1821_v34  ;;  %v1822_v41 = vmul.f32 %v1818_v35, %v1812_v31 }
 0x8b0   :  { %v1823_v42 = vmul.f32 0.044715, %v1819_v36  ;;  %v1820_v43 = vmul.f32 %v1816_v39, %v1804_v33 }
 0x8b1   :  { %v1829_v44 = vadd.f32 %v1825_v40, %v1809_v26  ;;  %v1826_v45 = vmul.f32 0.044715, %v1822_v41 }
 0x8b2   :  { %v1827_v46 = vadd.f32 %v1823_v42, %v1801_v28  ;;  %v1824_v47 = vmul.f32 0.044715, %v1820_v43 }
 0x8b3   :  { %v1833_v48 = vmul.f32 0.7978846, %v1829_v44  ;;  %v1830_v49 = vadd.f32 %v1826_v45, %v1812_v31 }
 0x8b4   :  { %v1831_v50 = vmul.f32 0.7978846, %v1827_v46  ;;  %v1828_v51 = vadd.f32 %v1824_v47, %v1804_v33 }
 0x8b5   :  { %2588 = vtanh.f32 %v1833_v48  ;;  %v1834_v52 = vmul.f32 0.7978846, %v1830_v49 }
 0x8b6   :  { %2590 = vtanh.f32 %v1831_v50  ;;  %v1832_v54 = vmul.f32 0.7978846, %v1828_v51  ;;  %v1999_v50 = vsub.s32 0, %v2881_v38  ;;  %v2013_v51 = vsub.s32 2, %v2881_v38 }
 0x8b7   :  { %2592 = vtanh.f32 %v1834_v52 }
 0x8b8   :  { %2594 = vtanh.f32 %v1832_v54 }
 0x8bf   :  { %v2589_v56 = vpop.eup %2588 }
 0x8c0   :  { %v2591_v58 = vpop.eup %2590  ;;  %v1841_v1 = vadd.f32 1.0, %v2589_v56  ;;  %v2020_v56 = vsub.s32 3, %v2881_v38 }
 0x8c1   :  { %v2593_v59 = vpop.eup %2592  ;;  %v1839_v2 = vadd.f32 1.0, %v2591_v58 }
 0x8c2   :  { %v2595_v5 = vpop.eup %2594  ;;  %v1845_v60 = vmul.f32 0.5, %v1841_v1  ;;  %v1842_v61 = vadd.f32 1.0, %v2593_v59  ;;  %v107_v1 = vld [vmem:[%s3232_s16] sm:$0xff]  ;;  %v108_v59 = vld [vmem:[%s3232_s16 + $0x8] sm:$0xff] }
 0x8c3   :  { %v1840_v62 = vadd.f32 1.0, %v2595_v5  ;;  %v1843_v63 = vmul.f32 0.5, %v1839_v2  ;;  %v2061_v2 = vpack.c.bf16 %v108_v59, %v107_v1  ;;  %v109_v5 = vld [vmem:[%s3232_s16 + $0x10] sm:$0xff] }
 0x8c4   :  { %v1846_v3 = vmul.f32 0.5, %v1842_v61  ;;  %v1849_v9 = vmul.f32 %v1845_v60, %v1809_v26  ;;  %v110_v60 = vld [vmem:[%s3232_s16 + $0x18] sm:$0xff] }
 0x8c5   :  { %v1844_v15 = vmul.f32 0.5, %v1840_v62  ;;  %v1847_v11 = vmul.f32 %v1843_v63, %v1801_v28  ;;  %2517 = vmatpush3.bf16.msra.mxu0 %v2061_v2  ;;  %v2062_v61 = vpack.c.bf16 %v110_v60, %v109_v5 }
 0x8c6   :  { %v1850_v14 = vmul.f32 %v1846_v3, %v1812_v31  ;;  %2518 = vmatprep.subr.bf16.mxu0 %v2632_v6 }
 0x8c7   :  { %v1848_v4 = vmul.f32 %v1844_v15, %v1804_v33 }
 0x8c8   :  { %v1852_v7 = vpack.c.bf16 %v1850_v14, %v1849_v9 }
 0x8c9   :  { %v1851_v8 = vpack.c.bf16 %v1848_v4, %v1847_v11  ;;  %2519 = vmatpush3.bf16.msra.mxu0 %v2062_v61 }
 0x8cb   :  { %2512 = vmatprep.mubr.bf16.mxu1 %v1851_v8 }
 0x8cc   :  { %2513 = vmatmul.mubr.bf16.vlgmr.msra.gmra.mrb[20].mxu1 %v1852_v7 }
 0x99f   :  { %v2514_v10 = vpop.f32.mrb[20].mxu1 }
 0x9a0   :  { %v1895_v12 = vpop.f32.mrb[21].mxu1  ;;  %v1912_v16 = vadd.f32 %v2514_v10, %v3012_v55 }
 0x9a1   :  { %v1910_v17 = vadd.f32 %v1895_v12, %v3009_v53  ;;  %v2515_v18 = vpop.f32.mrb[22].mxu1 }
 0x9a2   :  { %v1898_v19 = vpop.f32.mrb[23].mxu1  ;;  %v1913_v20 = vadd.f32 %v2515_v18, %v3021_v0  ;;  %v1922_v25 = vadd.f32 %v2329_v13, %v1912_v16  ;;  %v2006_v0 = vsub.s32 1, %v2881_v38  ;;  %v2330_v16 = vld [vmem:[%s3230_s14] ss:$0 sm:$0xff] }
 0x9a3   :  { %v1911_v21 = vadd.f32 %v1898_v19, %v3015_v57  ;;  %v1920_v22 = vadd.f32 %v2329_v13, %v1910_v17  ;;  %v1996_v57 = vld [vmem:[%s3255_s25] sm:$0xf] }
 0x9a4   :  { %v1923_v27 = vadd.f32 %v2329_v13, %v1913_v20  ;;  %v1930_v55 = vsel %vm125_vm0, %v1922_v25, 0.0  ;;  %v2007_v28 = vrot.slane %v1996_v57, %v2006_v0  ;;  %v2000_v52 = vrot.slane %v1996_v57, %v1999_v50  ;;  %v2331_v18 = vld [vmem:[%s3231_s15] ss:$0 sm:$0xff] }
 0x9a5   :  { %v1924_v23 = vsel %vm125_vm0, %v1920_v22, 0.0  ;;  %v1921_v24 = vadd.f32 %v2329_v13, %v1911_v21  ;;  %v2014_v54 = vrot.slane %v1996_v57, %v2013_v51  ;;  %v2021_v58 = vrot.slane %v1996_v57, %v2020_v56 }
 0x9a6   :  { %1925 = vadd.xlane.f32.xlu0 %v1924_v23  ;;  %v1933_v53 = vsel %vm125_vm0, %v1923_v27, 0.0 }
 0x9a7   :  { %v1927_v26 = vsel %vm125_vm0, %v1921_v24, 0.0 }
 0x9a8   :  { %1928 = vadd.xlane.f32.xlu1 %v1927_v26 }
 0x9aa   :  { %1931 = vadd.xlane.f32.xlu0 %v1930_v55 }
 0x9ac   :  { %1934 = vadd.xlane.f32.xlu1 %v1933_v53 }
 0x9bd   :  { %2009 = vbcast.lane.b32.xlu1 %v2007_v28, 256 }
 0xa33   :  { %v1926_v29 = vpop.xlane.xlu0 %1925 }
 0xa34   :  { %v1936_v30 = vmul.f32 0.03125, %v1926_v29 }
 0xa35   :  { %v1929_v31 = vpop.xlane.xlu1 %1928 }
 0xa36   :  { %v1940_v37 = vsub.f32 %v1920_v22, %v1936_v30  ;;  %v1937_v33 = vmul.f32 0.03125, %v1929_v31 }
 0xa37   :  { %v1932_v32 = vpop.xlane.xlu0 %1931 }
 0xa38   :  { %v1938_v34 = vmul.f32 0.03125, %v1932_v32  ;;  %v1944_v35 = vmul.f32 %v1940_v37, %v1940_v37  ;;  %v3127_v42 = vsub.f32 %v1921_v24, %v1937_v33 }
 0xa39   :  { %v1935_v36 = vpop.xlane.xlu1 %1934 }
 0xa3a   :  { %v1942_v39 = vsub.f32 %v1922_v25, %v1938_v34  ;;  %v1939_v40 = vmul.f32 0.03125, %v1935_v36  ;;  %v1948_v41 = vsel %vm125_vm0, %v1944_v35, 0.0  ;;  %v1945_v48 = vmul.f32 %v3127_v42, %v3127_v42 }
 0xa3b   :  { %1949 = vadd.xlane.f32.xlu0 %v1948_v41 }
 0xa3c   :  { %v1943_v43 = vsub.f32 %v1923_v27, %v1939_v40  ;;  %v1946_v44 = vmul.f32 %v1942_v39, %v1942_v39  ;;  %v1951_v49 = vsel %vm125_vm0, %v1945_v48, 0.0 }
 0xa3d   :  { %v2010_v3 = vpop.permute.xlu1 %2009 }
 0xa3e   :  { %v1954_v45 = vsel %vm125_vm0, %v1946_v44, 0.0  ;;  %v1947_v46 = vmul.f32 %v1943_v43, %v1943_v43 }
 0xa3f   :  { %1955 = vadd.xlane.f32.xlu0 %v1954_v45 }
 0xa40   :  { %v1957_v47 = vsel %vm125_vm0, %v1947_v46, 0.0 }
 0xa41   :  { %1958 = vadd.xlane.f32.xlu1 %v1957_v47 }
 0xa45   :  { %1952 = vadd.xlane.f32.xlu1 %v1951_v49 }
 0xa55   :  { %2002 = vbcast.lane.b32.xlu0 %v2000_v52, 256 }
 0xa56   :  { %2016 = vbcast.lane.b32.xlu1 %v2014_v54, 256 }
 0xa5a   :  { %2023 = vbcast.lane.b32.xlu1 %v2021_v58, 256 }
 0xac8   :  { %v1950_v62 = vpop.xlane.xlu0 %1949 }
 0xac9   :  { %v1960_v63 = vmul.f32 0.03125, %v1950_v62 }
 0xacb   :  { %v1964_v15 = vadd.f32 1e-05, %v1960_v63 }
 0xacc   :  { %v1956_v9 = vpop.xlane.xlu0 %1955 }
 0xacd   :  { %2596 = vrsqrt.f32 %v1964_v15  ;;  %v1962_v14 = vmul.f32 0.03125, %v1956_v9 }
 0xace   :  { %v1959_v11 = vpop.xlane.xlu1 %1958 }
 0xacf   :  { %v1966_v4 = vadd.f32 1e-05, %v1962_v14  ;;  %v1963_v6 = vmul.f32 0.03125, %v1959_v11 }
 0xad0   :  { %v2003_v21 = vpop.permute.xlu0 %2002 }
 0xad1   :  { %2598 = vrsqrt.f32 %v1966_v4  ;;  %v1967_v7 = vadd.f32 1e-05, %v1963_v6 }
 0xad2   :  { %v1953_v8 = vpop.xlane.xlu1 %1952 }
 0xad3   :  { %2600 = vrsqrt.f32 %v1967_v7  ;;  %v1961_v10 = vmul.f32 0.03125, %v1953_v8 }
 0xad5   :  { %v1965_v12 = vadd.f32 1e-05, %v1961_v10 }
 0xad6   :  { %v2017_v22 = vpop.permute.xlu1 %2016 }
 0xad7   :  { %v2597_v13 = vpop.eup %2596  ;;  %2602 = vrsqrt.f32 %v1965_v12 }
 0xad8   :  { %v1972_v17 = vmul.f32 %v2597_v13, %v1940_v37 }
 0xada   :  { %v1982_v19 = vmul.f32 %v2330_v16, %v1972_v17  ;;  %v2024_v31 = vpop.permute.xlu1 %2023 }
 0xadb   :  { %v2599_v20 = vpop.eup %2598 }
 0xadc   :  { %v1992_v23 = vadd.f32 %v2331_v18, %v1982_v19  ;;  %v1974_v24 = vmul.f32 %v2599_v20, %v1942_v39 }
 0xadd   :  { %v2601_v25 = vpop.eup %2600 }
 0xade   :  { %v2025_v26 = vmul.f32 %v2003_v21, %v1992_v23  ;;  %v1984_v27 = vmul.f32 %v2330_v16, %v1974_v24  ;;  %v1975_v55 = vmul.f32 %v2601_v25, %v1943_v43  ;;  %v112_v25 = vld [vmem:[%s3233_s17 + $0x8] sm:$0xff] }
 0xae0   :  { %v2029_v53 = vsel %vm125_vm0, %v2025_v26, 0.0  ;;  %v1994_v57 = vadd.f32 %v2331_v18, %v1984_v27  ;;  %v1985_v28 = vmul.f32 %v2330_v16, %v1975_v55  ;;  %v114_v26 = vld [vmem:[%s3233_s17 + $0x18] sm:$0xff]  ;;  %v111_v27 = vld [vmem:[%s3233_s17] sm:$0xff] }
 0xae1   :  { %v2603_v29 = vpop.eup %2602  ;;  %v2030_v30 = vrot.slane %v2029_v53, 4  ;;  %v2145_v55 = vpack.c.bf16 %v114_v26, %v112_v25 }
 0xae2   :  { %v1973_v37 = vmul.f32 %v2603_v29, %v3127_v42  ;;  %v2027_v32 = vmul.f32 %v2017_v22, %v1994_v57  ;;  %v1995_v33 = vadd.f32 %v2331_v18, %v1985_v28  ;;  %v116_v57 = vld [vmem:[%s3233_s17 + $0x28] sm:$0xff]  ;;  %v118_v28 = vld [vmem:[%s3233_s17 + $0x38] sm:$0xff]  ;;  %v2638_v29 = vmov 0  }
 0xae3   :  { %v2031_v34 = vadd.f32 %v2030_v30, %v2029_v53  ;;  %v113_v53 = vld [vmem:[%s3233_s17 + $0x10] sm:$0xff]  ;;  %2162 = vmatprep.subr.bf16.mxu0 %v2145_v55 }
 0xae4   :  { %v1983_v35 = vmul.f32 %v2330_v16, %v1973_v37  ;;  %v2043_v36 = vsel %vm125_vm0, %v2027_v32, 0.0  ;;  %v2028_v39 = vmul.f32 %v2024_v31, %v1995_v33  ;;  %v2144_v30 = vpack.c.bf16 %v113_v53, %v111_v27  ;;  %v115_v37 = vld [vmem:[%s3233_s17 + $0x20] sm:$0xff]  ;;  %v117_v32 = vld [vmem:[%s3233_s17 + $0x30] sm:$0xff] }
 0xae5   :  { %v2032_v40 = vrot.slane %v2031_v34, 2  ;;  %v2044_v41 = vrot.slane %v2043_v36, 4  ;;  %v2147_v31 = vpack.c.bf16 %v118_v28, %v116_v57  ;;  %v2146_v33 = vpack.c.bf16 %v117_v32, %v115_v37 }
 0xae6   :  { %v1993_v44 = vadd.f32 %v2331_v18, %v1983_v35  ;;  %v2050_v43 = vsel %vm125_vm0, %v2028_v39, 0.0 }
 0xae7   :  { %v2045_v45 = vadd.f32 %v2044_v41, %v2043_v36  ;;  %v2051_v46 = vrot.slane %v2050_v43, 4  ;;  %v2033_v48 = vadd.f32 %v2032_v40, %v2031_v34 }
 0xae8   :  { %v2026_v47 = vmul.f32 %v2010_v3, %v1993_v44 }
 0xae9   :  { %v2046_v49 = vrot.slane %v2045_v45, 2  ;;  %v2052_v51 = vadd.f32 %v2051_v46, %v2050_v43  ;;  %v2034_v58 = vrot.slane %v2033_v48, 1 }
 0xaea   :  { %v2036_v42 = vsel %vm125_vm0, %v2026_v47, 0.0 }
 0xaeb   :  { %v2037_v52 = vrot.slane %v2036_v42, 4  ;;  %v2047_v54 = vadd.f32 %v2046_v49, %v2045_v45  ;;  %v2053_v56 = vrot.slane %v2052_v51, 2  ;;  %v2035_v61 = vadd.f32 %v2034_v58, %v2033_v48  ;;  %v2333_v45 = vld [vmem:[%s3235_s19] ss:$0 sm:$0xff] }
 0xaec   :  { %v119_v49 = vld [vmem:[%s3234_s18] sm:$0x3]  ;;  %s2639_s18 = smov [#allocation2]  }
 0xaed   :  { %v2038_v1 = vadd.f32 %v2037_v52, %v2036_v42  ;;  %v2054_v59 = vadd.f32 %v2053_v56, %v2052_v51  ;;  %v2048_v2 = vrot.slane %v2047_v54, 1  ;;  %v2057_v14 = vpack.c.bf16 %v2035_v61, %v2035_v61  ;;  %s2274_s19 = sshll.u32 %s2639_s18, 4  ;;  %s2275_s19 = int_to_ptr.vmem [resolvable:$true] %s2274_s19 }
 0xaee   :  { %v2152_v51 = vrot.slane %v119_v49, %v1999_v50  ;;  %v2156_v42 = vrot.slane %v119_v49, %v2006_v0  ;;  %s2608_s9 = scalar_lea.vmem %s2275_s19, 16  ;;  %s2612_s28 = scalar_lea.vmem %s2275_s19, 32 }
 0xaef   :  { %v2039_v5 = vrot.slane %v2038_v1, 2  ;;  %v2055_v60 = vrot.slane %v2054_v59, 1  ;;  %v2049_v63 = vadd.f32 %v2048_v2, %v2047_v54  ;;  %v2067_v7 = vunpack.c.l.b16 %v2057_v14  ;;  %p2609_p0 = scmp.ne.s32.totalorder %s2275_s19, %s2608_s9  ;;  %p2613_p1 = scmp.lt.s32.totalorder %s2275_s19, %s2275_s19 }
 0xaf0   :  { %p2614_p2 = scmp.lt.s32.totalorder %s2612_s28, %s2608_s9 }
 0xaf1   :  { %v2040_v62 = vadd.f32 %v2039_v5, %v2038_v1  ;;  %v2056_v9 = vadd.f32 %v2055_v60, %v2054_v59  ;;  %v2059_v11 = vpack.c.bf16 %v2049_v63, %v2049_v63 }
 0xaf2   :  { %p2615_p3 = por %p2614_p2, %p2613_p1 }
 0xaf3   :  { %v2041_v15 = vrot.slane %v2040_v62, 1  ;;  %v2060_v6 = vpack.c.bf16 %v2056_v9, %v2056_v9  ;;  %v2069_v10 = vunpack.c.l.b16 %v2059_v11 }
 0xaf4   :  { %p2616_p4 = pnand %p2615_p3, %p2609_p0 }
 0xaf5   :  { %v2042_v3 = vadd.f32 %v2041_v15, %v2040_v62  ;;  %v2070_v13 = vunpack.c.l.b16 %v2060_v6 }
 0xaf7   :  { %v2058_v4 = vpack.c.bf16 %v2042_v3, %v2042_v3 }
 0xaf9   :  { %v2068_v8 = vunpack.c.l.b16 %v2058_v4 }
 0xafb   :  { %v2072_v12 = vsel %vm2071_vm9, %v2068_v8, %v2067_v7 }
 0xafc   :  { %v2074_v16 = vsel %vm2073_vm10, %v2069_v10, %v2072_v12 }
 0xafd   :  { %v2076_v17 = vsel %vm2075_vm11, %v2070_v13, %v2074_v16 }
 0xafe   :  { %v2077_v18 = vpack.c.b16 %v2076_v17, %v2076_v17 }
 0xb00   :  { %2521 = vmatmul.mubr.msk.bf16.vlgmr.msra.gmra.mrb[20].mxu0 %vm125_vm0, %v2077_v18 }
 0xb01   :  { %2194 = vmatprep.mubr.bf16.mxu0 %v2638_v29  ;;  %2163 = vmatpush1.bf16.msra.mxu0 %v2144_v30 }
 0xb02   :  { %2164 = vmatprep.subr.bf16.mxu0 %v2147_v31 }
 0xb05   :  { %2165 = vmatpush1.bf16.msra.mxu0 %v2146_v33 }
 0xb06   :  { %2207 = vmatprep.subr.bf16.mxu0 %v2145_v55 }
 0xbd3   :  { %v2115_v19 = vpop.f32.mrb[20].mxu0 }
 0xbd4   :  { %v2121_v20 = vmul.f32 %v2115_v19, %v2115_v19  ;;  %v2522_v21 = vpop.f32.mrb[21].mxu0 }
 0xbd5   :  { %v2118_v22 = vpop.f32.mrb[22].mxu0 }
 0xbd6   :  { %v2523_v23 = vpop.f32.mrb[23].mxu0  ;;  %v2123_v24 = vsel %vm2122_vm12, %v2121_v20, 0.0 }
 0xbd7   :  { %2124 = vadd.xlane.f32.xlu0 %v2123_v24 }
 0xc64   :  { %v2125_v34 = vpop.xlane.xlu0 %2124 }
 0xc65   :  { %2604 = vrsqrt.f32 %v2125_v34  ;;  %vm2128_vm13 = vcmp.eq.f32.partialorder %v2125_v34, inf  ;;  %v2131_v39 = vand.u32 2147483648, %v2125_v34  ;;  %vm2130_vm14 = vcmp.eq.f32.partialorder %v2125_v34, 0.0 }
 0xc6f   :  { %v2605_v35 = vpop.eup %2604 }
 0xc70   :  { %v2127_v36 = vmul.f32 %v2605_v35, %v2125_v34 }
 0xc72   :  { %v2129_v40 = vsel %vm2128_vm13, %v2125_v34, %v2127_v36 }
 0xc73   :  { %v2132_v41 = vsel %vm2130_vm14, %v2131_v39, %v2129_v40 }
 0xc74   :  { %v2133_v44 = vmax.f32 %v2132_v41, 1e-12 }
 0xc76   :  { %2606 = vrcp.f32 %v2133_v44 }
 0xc80   :  { %v2607_v43 = vpop.eup %2606 }
 0xc81   :  { %v2135_v46 = vmul.f32 %v2607_v43, %v2115_v19 }
 0xc83   :  { %v2142_v47 = vsub.f32 %v2135_v46, %v2333_v45 }
 0xc85   :  { %v2143_v48 = vpack.c.bf16 %v2142_v47, %v2142_v47 }
 0xc87   :  { %2334 = vmatmul.mubr.msk.bf16.vlgmr.msra.gmra.mrb[24].mxu0 %vm125_vm0, %v2143_v48  ;;  %vm2264_vm0 = vcmask 0  }
 0xc88   :  { %2208 = vmatpush1.bf16.xpose.msra.mxu0 %v2144_v30 }
 0xc89   :  { %2209 = vmatprep.subr.bf16.mxu0 %v2147_v31 }
 0xc90   :  { %2210 = vmatpush1.bf16.xpose.msra.mxu0 %v2146_v33 }
 0xd5a   :  { %v2196_v52 = vpop.f32.mrb[24].mxu0 }
 0xd5b   :  { %v2197_v54 = vadd.f32 %v2196_v52, %v2152_v51  ;;  %v2198_v56 = vpop.f32.mrb[25].mxu0 }
 0xd5c   :  { %v2199_v58 = vadd.f32 %v2198_v56, %v2156_v42  ;;  %v2200_v1 = vpop.f32.mrb[26].mxu0 }
 0xd5d   :  { %v2203_v59 = vmax.f32 %v2197_v54, 0.0  ;;  %v2201_v2 = vpop.f32.mrb[27].mxu0 }
 0xd5e   :  { %v2204_v5 = vmax.f32 %v2199_v58, 0.0 }
 0xd5f   :  { %v2248_v60 = vand.u32 2147483647, %v2203_v59  ;;  %v2205_v63 = vpack.c.bf16 %v2203_v59, %v2203_v59 }
 0xd60   :  { %v2206_v61 = vpack.c.bf16 %v2204_v5, %v2204_v5  ;;  %v2249_v62 = vand.u32 2147483647, %v2204_v5 }
 0xd61   :  { %v2251_v15 = vsel %vm2250_vm15, %v2248_v60, 0.0 }
 0xd62   :  { %2239 = vmatprep.mubr.bf16.mxu0 %v2206_v61  ;;  %v2252_v9 = vsel %vm2250_vm15, %v2249_v62, 0.0 }
 0xd63   :  { %2240 = vmatmul.mubr.bf16.vlgmr.msra.gmra.mrb[28].mxu0 %v2205_v63  ;;  %v2253_v50 = vadd.f32 %v2252_v9, %v2251_v15 }
 0xd65   :  { %2254 = vadd.xlane.f32.xlu1 %v2253_v50 }
 0xdf2   :  { %v2255_v38 = vpop.xlane.xlu1 %2254 }
 0xdf3   :  { %v2256_v0 = vsel %vm2250_vm15, %v2255_v38, 0.0 }
 0xdf4   :  { %v2257_v3 = vrot.slane %v2256_v0, 4 }
 0xdf6   :  { %v2258_v14 = vadd.f32 %v2257_v3, %v2256_v0 }
 0xdf8   :  { %v2259_v11 = vrot.slane %v2258_v14, 2 }
 0xdfa   :  { %v2260_v4 = vadd.f32 %v2259_v11, %v2258_v14 }
 0xdfc   :  { %v2261_v6 = vrot.slane %v2260_v4, 1 }
 0xdfe   :  { %v2262_v7 = vadd.f32 %v2261_v6, %v2260_v4 }
 0xe00   :  { %v2263_v8 = vmul.f32 0.0005, %v2262_v7 }
 0xe02   :  { %2265 = vst.msk [vmem:[#allocation2] sm:$0x1] %vm2264_vm0, %v2263_v8 }
 0xe03   :  { %2619 = shalt.err (!%p2616_p4)
}
 0xe04   :  { %s2620_s0 = scalar_lea.hbm %s3237_s21, 16 }
 0xe05   :  { %p2621_p5 = scmp.ne.s32.totalorder %s3237_s21, %s2620_s0  ;;  %p2624_p6 = scmp.lt.u32.totalorder %s2620_s0, %s3237_s21 }
 0xe07   :  { %p2626_p7 = pnand %p2624_p6, %p2621_p5 }
 0xe09   :  { %2629 = shalt.err (!%p2626_p7)
}
 0xe0a   :  { %2277 = dma.vmem_to_hbm [thread:$0]  %s2275_s19, 16, %s3237_s21, [#allocation3]  }
 0xe36   :  { %v2241_v10 = vpop.f32.mrb[28].mxu0 }
 0xe37   :  { %v2242_v12 = vadd.f32 %v2333_v45, %v2241_v10  ;;  %v2243_v13 = vpop.f32.mrb[29].mxu0 }
 0xe38   :  { %v2244_v16 = vpop.f32.mrb[30].mxu0 }
 0xe39   :  { %2247 = vst.msk [vmem:[%s3236_s20] sm:$0xf] %vm2122_vm12, %v2242_v12  ;;  %v2245_v17 = vpop.f32.mrb[31].mxu0 }
 0xe3a   :  { %2630 = dma.done.wait [#allocation3], 16  }
 0xe3b   :  { %2631 = vsyncadd [#allocation3], 4294967280 }
 0xe3c   :  { %2283 = vsyncpa [#allocation3], 1 }

// kernel: daclip_forward.2
= control target key start
LH: loop header
LB: loop body
LE: loop exit
PB: predicated region body
PF: predicated region fallthrough
CT: control target
= control target key end

     0   :  { %s6751_s6 = smov 1   ;;  %s6752_s10 = smov 2   ;;  %s8270_s0 = inlined_call_operand.smem [shape: u32[41], index: -1, kind: input, shape index: {}] }
   0x1   :  { %s6810_s5 = sld [smem:[%s8270_s0]]   ;;  %s6753_s14 = smov 3  }
   0x2   :  { %s6815_s9 = sld [smem:[%s8270_s0 + %s6751_s6]]   ;;  %s6754_s18 = smov 4  }
   0x3   :  { %s6820_s13 = sld [smem:[%s8270_s0 + %s6752_s10]]   ;;  %s6755_s22 = smov 5  }
   0x4   :  { %s6825_s17 = sld [smem:[%s8270_s0 + %s6753_s14]]   ;;  %s6756_s26 = smov 6  }
   0x5   :  { %s6830_s21 = sld [smem:[%s8270_s0 + %s6754_s18]]   ;;  %s6757_s30 = smov 7  }
   0x6   :  { %s6835_s25 = sld [smem:[%s8270_s0 + %s6755_s22]]   ;;  %s6758_s4 = smov 8  }
   0x7   :  { %s6840_s29 = sld [smem:[%s8270_s0 + %s6756_s26]]   ;;  %s6759_s10 = smov 9  }
   0x8   :  { %s6845_s3 = sld [smem:[%s8270_s0 + %s6757_s30]]   ;;  %s6760_s15 = smov 10  }
   0x9   :  { %s6850_s8 = sld [smem:[%s8270_s0 + %s6758_s4]]   ;;  %s6761_s20 = smov 11  }
   0xa   :  { %s6855_s14 = sld [smem:[%s8270_s0 + %s6759_s10]]   ;;  %s6762_s26 = smov 12  }
   0xb   :  { %s6860_s19 = sld [smem:[%s8270_s0 + %s6760_s15]]   ;;  %s6763_s1 = smov 13  }
   0xc   :  { %s6865_s24 = sld [smem:[%s8270_s0 + %s6761_s20]]   ;;  %s6764_s7 = smov 14  }
   0xd   :  { %s6870_s30 = sld [smem:[%s8270_s0 + %s6762_s26]]   ;;  %s6765_s15 = smov 15  }
   0xe   :  { %8314 = sst [smem:[#allocation9_spill]] %s6845_s3  ;;  %s6766_s22 = smov 16  }
   0xf   :  { %8315 = sst [smem:[#allocation10_spill]] %s6850_s8  ;;  %s6767_s28 = smov 17  }
  0x10   :  { %8316 = sst [smem:[#allocation11_spill]] %s6855_s14 }
  0x11   :  { %8317 = sst [smem:[#allocation12_spill]] %s6860_s19 }
  0x12   :  { %8318 = sst [smem:[#allocation13_spill]] %s6865_s24 }
  0x13   :  { %8319 = sst [smem:[#allocation14_spill]] %s6870_s30 }
  0x14   :  { %s6875_s6 = sld [smem:[%s8270_s0 + %s6763_s1]]  }
  0x15   :  { %s6880_s12 = sld [smem:[%s8270_s0 + %s6764_s7]]   ;;  %s6768_s7 = smov 18  }
  0x16   :  { %s6885_s20 = sld [smem:[%s8270_s0 + %s6765_s15]]   ;;  %s6769_s15 = smov 19  }
  0x17   :  { %s6890_s27 = sld [smem:[%s8270_s0 + %s6766_s22]]   ;;  %s6770_s22 = smov 20  }
  0x18   :  { %s6895_s4 = sld [smem:[%s8270_s0 + %s6767_s28]]   ;;  %s6771_s28 = smov 21  }
  0x19   :  { %s6915_s30 = sld [smem:[%s8270_s0 + %s6771_s28]]   ;;  %s6775_s28 = smov 25  }
  0x1a   :  { %8320 = sst [smem:[#allocation15_spill]] %s6875_s6 }
  0x1b   :  { %8321 = sst [smem:[#allocation16_spill]] %s6880_s12 }
  0x1c   :  { %8322 = sst [smem:[#allocation17_spill]] %s6885_s20 }
  0x1d   :  { %8323 = sst [smem:[#allocation18_spill]] %s6890_s27 }
  0x1e   :  { %s6900_s12 = sld [smem:[%s8270_s0 + %s6768_s7]]   ;;  %s6772_s7 = smov 22  }
  0x1f   :  { %s6905_s20 = sld [smem:[%s8270_s0 + %s6769_s15]]   ;;  %s6773_s15 = smov 23  }
  0x20   :  { %s6910_s27 = sld [smem:[%s8270_s0 + %s6770_s22]]   ;;  %s6774_s22 = smov 24  }
  0x21   :  { %s6920_s24 = sld [smem:[%s8270_s0 + %s6772_s7]]   ;;  %s6776_s7 = smov 26  }
  0x22   :  { %s6925_s6 = sld [smem:[%s8270_s0 + %s6773_s15]]   ;;  %s6777_s15 = smov 27  }
  0x23   :  { %s6930_s19 = sld [smem:[%s8270_s0 + %s6774_s22]]   ;;  %s6778_s22 = smov 28  }
  0x24   :  { %s6935_s14 = sld [smem:[%s8270_s0 + %s6775_s28]]   ;;  %s6779_s28 = smov 29  }
  0x25   :  { %s6940_s8 = sld [smem:[%s8270_s0 + %s6776_s7]]   ;;  %s6780_s7 = smov 30  }
  0x26   :  { %s6945_s3 = sld [smem:[%s8270_s0 + %s6777_s15]]   ;;  %s6781_s15 = smov 31  }
  0x28   :  { %8324 = sst [smem:[#allocation19_spill]] %s6925_s6 }
  0x29   :  { %8325 = sst [smem:[#allocation20_spill]] %s6930_s19 }
  0x2a   :  { %s6950_s19 = sld [smem:[%s8270_s0 + %s6778_s22]]   ;;  %s6782_s22 = smov 32  }
  0x2b   :  { %8326 = sst [smem:[#allocation21_spill]] %s6940_s8 }
  0x2c   :  { %8327 = sst [smem:[#allocation22_spill]] %s6945_s3 }
  0x2d   :  { %s6955_s6 = sld [smem:[%s8270_s0 + %s6779_s28]]   ;;  %s6783_s28 = smov 33  }
  0x2e   :  { %s6960_s8 = sld [smem:[%s8270_s0 + %s6780_s7]]   ;;  %s6784_s7 = smov 34  }
  0x2f   :  { %s6965_s3 = sld [smem:[%s8270_s0 + %s6781_s15]]   ;;  %s6785_s15 = smov 35  }
  0x30   :  { %8328 = sst [smem:[#allocation23_spill]] %s6950_s19 }
  0x31   :  { %s6970_s19 = sld [smem:[%s8270_s0 + %s6782_s22]]   ;;  %s6786_s22 = smov 36  }
  0x33   :  { %8329 = sst [smem:[#allocation24_spill]] %s6955_s6 }
  0x34   :  { %8330 = sst [smem:[#allocation25_spill]] %s6960_s8 }
  0x35   :  { %8331 = sst [smem:[#allocation26_spill]] %s6965_s3 }
  0x36   :  { %s6975_s6 = sld [smem:[%s8270_s0 + %s6783_s28]]   ;;  %s6787_s28 = smov 37  }
  0x37   :  { %8332 = sst [smem:[#allocation27_spill]] %s6970_s19 }
  0x38   :  { %s6980_s8 = sld [smem:[%s8270_s0 + %s6784_s7]]   ;;  %s6788_s7 = smov 38  }
  0x39   :  { %s6985_s3 = sld [smem:[%s8270_s0 + %s6785_s15]]   ;;  %s6789_s15 = smov 39  }
  0x3a   :  { %s6990_s19 = sld [smem:[%s8270_s0 + %s6786_s22]]   ;;  %s6790_s22 = smov 40  }
  0x3c   :  { %8333 = sst [smem:[#allocation28_spill]] %s6975_s6 }
  0x3d   :  { %s6995_s6 = sld [smem:[%s8270_s0 + %s6787_s28]]  }
  0x3e   :  { %8334 = sst [smem:[#allocation29_spill]] %s6980_s8 }
  0x3f   :  { %8335 = sst [smem:[#allocation30_spill]] %s6985_s3 }
  0x40   :  { %8336 = sst [smem:[#allocation31_spill]] %s6990_s19 }
  0x41   :  { %s7000_s8 = sld [smem:[%s8270_s0 + %s6788_s7]]  }
  0x42   :  { %s7005_s3 = sld [smem:[%s8270_s0 + %s6789_s15]]  }
  0x43   :  { %s7010_s19 = sld [smem:[%s8270_s0 + %s6790_s22]]  }
  0x44   :  { %87 = vsyncpa [#allocation3], 0  ;;  %v264_v0 = vld [vmem:[%s6815_s9] sm:$0xff]  ;;  %v265_v1 = vld [vmem:[%s6815_s9 + $0x8] sm:$0xff]  ;;  %v8279_v3 = vmov 0   ;;  %vm302_vm0 = vcmask 523264  }
  0x45   :  { %v266_v2 = vld [vmem:[%s6815_s9 + $0x10] sm:$0xff]  ;;  %306 = vmatprep.subr.bf16.mxu0 %v8279_v3  ;;  %v290_v4 = vpack.c.bf16 %v265_v1, %v264_v0  ;;  %v267_v5 = vld [vmem:[%s6815_s9 + $0x18] sm:$0xff]  ;;  %v268_v7 = vld [vmem:[%s6815_s9 + $0x20] sm:$0xff] }
  0x46   :  { %v291_v6 = vpack.c.bf16 %v267_v5, %v266_v2  ;;  %v269_v8 = vld [vmem:[%s6815_s9 + $0x28] sm:$0xff]  ;;  %v270_v10 = vld [vmem:[%s6815_s9 + $0x30] sm:$0xff]  ;;  %v271_v11 = vld [vmem:[%s6815_s9 + $0x38] sm:$0xff] }
  0x47   :  { %307 = vmatpush1.bf16.msra.mxu0 %v290_v4  ;;  %v292_v9 = vpack.c.bf16 %v269_v8, %v268_v7  ;;  %v261_v12 = vld [vmem:[%s6810_s5 + $0x8] sm:$0xff]  ;;  %v263_v13 = vld [vmem:[%s6810_s5 + $0x18] sm:$0x3] }
  0x48   :  { %308 = vmatprep.subr.bf16.mxu0 %v8279_v3  ;;  %v289_v14 = vpack.c.bf16 %v263_v13, %v261_v12 }
  0x4b   :  { %309 = vmatpush1.bf16.msra.mxu0 %v291_v6 }
  0x4c   :  { %310 = vmatprep.subr.bf16.mxu0 %v8279_v3 }
  0x4d   :  { %88 = vsyncpa [#allocation5], 0  ;;  %v293_v15 = vpack.c.bf16 %v271_v11, %v270_v10  ;;  %6226 = vmatprep.mubr.msk.bf16.mxu0 %vm302_vm0, %v289_v14  ;;  %v272_v16 = vld [vmem:[%s6815_s9 + $0x40] sm:$0xff]  ;;  %v273_v17 = vld [vmem:[%s6815_s9 + $0x48] sm:$0xff]  ;;  %v6792_v43 = vmov 1966171168   ;;  %v8280_v45 = vlaneseq }
  0x4e   :  { %v294_v18 = vpack.c.bf16 %v273_v17, %v272_v16  ;;  %v274_v19 = vld [vmem:[%s6815_s9 + $0x50] sm:$0xff]  ;;  %v275_v20 = vld [vmem:[%s6815_s9 + $0x58] sm:$0xff]  ;;  %v276_v22 = vld [vmem:[%s6815_s9 + $0x60] sm:$0xff]  ;;  %v351_v44 = vunpack.c.l.s4 %v6792_v43  ;;  %vm564_vm1 = vcmask 261120   ;;  %vm568_vm2 = vcmask 254976   ;;  %s6795_s0 = smov 96  }
  0x4f   :  { %311 = vmatpush1.bf16.msra.mxu0 %v292_v9  ;;  %v295_v21 = vpack.c.bf16 %v275_v20, %v274_v19  ;;  %v277_v23 = vld [vmem:[%s6815_s9 + $0x68] sm:$0xff]  ;;  %v278_v25 = vld [vmem:[%s6815_s9 + $0x70] sm:$0xff]  ;;  %v279_v26 = vld [vmem:[%s6815_s9 + $0x78] sm:$0xff]  ;;  %v7053_v47 = vshrl.u32 %v8280_v45, 7  ;;  %vm6794_vm3 = vmmov 0   ;;  %vm1636_vm4 = vcmask 130048  }
  0x50   :  { %312 = vmatprep.subr.bf16.mxu0 %v8279_v3  ;;  %v296_v24 = vpack.c.bf16 %v277_v23, %v276_v22  ;;  %v297_v27 = vpack.c.bf16 %v279_v26, %v278_v25  ;;  %v280_v28 = vld [vmem:[%s6815_s9 + $0x80] sm:$0xff]  ;;  %v281_v29 = vld [vmem:[%s6815_s9 + $0x88] sm:$0xff]  ;;  %v282_v31 = vld [vmem:[%s6815_s9 + $0x90] sm:$0xff]  ;;  %v352_v46 = vunpack.c.0.s8 %v351_v44  ;;  %vm1828_vm5 = vcmask 36864   ;;  %s8390_s28 = sld [smem:[#allocation14_spill]]  ;;  %s8391_s1 = sld [smem:[#allocation17_spill]] }
  0x51   :  { %v298_v30 = vpack.c.bf16 %v281_v29, %v280_v28  ;;  %v283_v32 = vld [vmem:[%s6815_s9 + $0x98] sm:$0xff]  ;;  %v284_v34 = vld [vmem:[%s6815_s9 + $0xa0] sm:$0xff]  ;;  %v285_v35 = vld [vmem:[%s6815_s9 + $0xa8] sm:$0xff]  ;;  %vm2051_vm9 = vcmask 1044480   ;;  %vm2047_vm10 = vcmask 39936   ;;  %s8392_s2 = sld [smem:[#allocation16_spill]] }
  0x52   :  { %v299_v33 = vpack.c.bf16 %v283_v32, %v282_v31  ;;  %v300_v36 = vpack.c.bf16 %v285_v35, %v284_v34  ;;  %v286_v37 = vld [vmem:[%s6815_s9 + $0xb0] sm:$0xff]  ;;  %v287_v38 = vld [vmem:[%s6815_s9 + $0xb8] sm:$0xff]  ;;  %v260_v40 = vld [vmem:[%s6810_s5] sm:$0xff]  ;;  %v7056_v48 = vsub.s32 %v352_v46, %v7053_v47  ;;  %v7084_v46 = vsub.s32 0, %v7053_v47  ;;  %s6797_s9 = smov 112   ;;  %s8393_s7 = sld [smem:[#allocation18_spill]] }
  0x53   :  { %313 = vmatpush1.bf16.msra.mxu0 %v293_v15  ;;  %v301_v39 = vpack.c.bf16 %v287_v38, %v286_v37  ;;  %v262_v41 = vld [vmem:[%s6810_s5 + $0x10] sm:$0x3]  ;;  %v430_v49 = vld [vmem:[%s6820_s13] sm:$0x1f]  ;;  %s6796_s5 = smov 80   ;;  %s6798_s13 = smov 64  }
  0x54   :  { %314 = vmatprep.subr.bf16.mxu0 %v8279_v3  ;;  %v288_v42 = vpack.c.bf16 %v262_v41, %v260_v40  ;;  %v439_v50 = vrot.slane %v430_v49, %v7056_v48  ;;  %v432_v51 = vcombine.high %v430_v49, %v430_v49  ;;  %8337 = vst [vmem:[#allocation32_spill] sm:$0xff] %v7084_v46  ;;  %v7087_v49 = vsub.s32 1, %v7053_v47  ;;  %s8394_s10 = sld [smem:[#allocation26_spill]]  ;;  %s8395_s11 = sld [smem:[#allocation27_spill]] }
  0x55   :  { %s8396_s15 = sld [smem:[#allocation28_spill]]  ;;  %s8397_s16 = sld [smem:[#allocation24_spill]]  ;;  %vm5750_vm12 = vcmask 1041409   ;;  %vm6129_vm15 = vcmask 1041408  }
  0x56   :  { %v447_v53 = vcombine.high %v439_v50, %v439_v50  ;;  %v446_v56 = vrot.slane %v432_v51, %v7056_v48  ;;  %v454_v58 = vrot.slane %v439_v50, %v7056_v48  ;;  %8338 = vst [vmem:[#allocation33_spill] sm:$0xff] %v7087_v49  ;;  %v7090_v50 = vsub.s32 2, %v7053_v47  ;;  %s8398_s18 = sld [smem:[#allocation25_spill]]  ;;  %s8399_s22 = sld [smem:[#allocation29_spill]] }
  0x57   :  { %315 = vmatpush1.bf16.msra.mxu0 %v294_v18  ;;  %v7093_v51 = vsub.s32 3, %v7053_v47  ;;  %s8400_s23 = sld [smem:[#allocation30_spill]]  ;;  %s8402_s26 = sld [smem:[#allocation31_spill]] }
  0x58   :  { %316 = vmatprep.subr.bf16.mxu0 %v8279_v3  ;;  %v468_v1 = vrot.slane %v447_v53, %v7056_v48  ;;  %v461_v6 = vrot.slane %v446_v56, %v7056_v48  ;;  %v469_v8 = vcombine.high %v454_v58, %v454_v58  ;;  %8339 = vst [vmem:[#allocation34_spill] sm:$0xff] %v7090_v50  ;;  %v7096_v53 = vsub.s32 4, %v7053_v47 }
  0x59   :  { %8340 = vst [vmem:[#allocation35_spill] sm:$0xff] %v7093_v51  ;;  %v7105_v56 = vsub.s32 7, %v7053_v47 }
  0x5a   :  { %v470_v16 = vcombine.high %v468_v1, %v468_v1  ;;  %8341 = vst [vmem:[#allocation36_spill] sm:$0xff] %v7096_v53 }
  0x5b   :  { %317 = vmatpush1.bf16.msra.mxu0 %v295_v21  ;;  %8344 = vst [vmem:[#allocation39_spill] sm:$0xff] %v7105_v56 }
  0x5c   :  { %318 = vmatprep.subr.bf16.mxu0 %v8279_v3 }
  0x5f   :  { %319 = vmatpush1.bf16.msra.mxu0 %v296_v24 }
  0x60   :  { %320 = vmatprep.subr.bf16.mxu0 %v8279_v3 }
  0x63   :  { %321 = vmatpush1.bf16.msra.mxu0 %v297_v27 }
  0x64   :  { %322 = vmatprep.subr.bf16.mxu0 %v8279_v3 }
  0x67   :  { %323 = vmatpush1.bf16.msra.mxu0 %v298_v30 }
  0x68   :  { %324 = vmatprep.subr.bf16.mxu0 %v8279_v3 }
  0x6b   :  { %325 = vmatpush1.bf16.msra.mxu0 %v299_v33 }
  0x6c   :  { %326 = vmatprep.subr.bf16.mxu0 %v8279_v3 }
  0x6f   :  { %327 = vmatpush1.bf16.msra.mxu0 %v300_v36 }
  0x70   :  { %328 = vmatprep.subr.bf16.mxu0 %v8279_v3 }
  0x73   :  { %329 = vmatpush1.bf16.msra.mxu0 %v301_v39 }
  0x76   :  { %339 = vmatmul.mubr.bf16.vlgmr.msra.gmra.mrb[0].mxu0 %v288_v42 }
 0x149   :  { %v340_v52 = vpop.f32.mrb[0].mxu0 }
 0x14a   :  { %v349_v54 = vcombine.high %v340_v52, %v340_v52  ;;  %v356_v55 = vrot.slane %v340_v52, %v7056_v48  ;;  %v342_v57 = vpop.f32.mrb[1].mxu0 }
 0x14b   :  { %v343_v59 = vpop.f32.mrb[2].mxu0 }
 0x14c   :  { %v363_v60 = vrot.slane %v349_v54, %v7056_v48  ;;  %v364_v61 = vcombine.high %v356_v55, %v356_v55  ;;  %v372_v62 = vrot.slane %v356_v55, %v7056_v48  ;;  %v404_v63 = vrot.slane %v343_v59, %v7056_v48  ;;  %v345_v0 = vpop.f32.mrb[3].mxu0 }
 0x14d   :  { %v7099_v54 = vsub.s32 5, %v7053_v47  ;;  %v7102_v55 = vsub.s32 6, %v7053_v47 }
 0x14e   :  { %v365_v2 = vcombine.high %v363_v60, %v363_v60  ;;  %v379_v4 = vrot.slane %v363_v60, %v7056_v48  ;;  %v386_v5 = vrot.slane %v364_v61, %v7056_v48  ;;  %v394_v7 = vcombine.high %v372_v62, %v372_v62 }
 0x14f   :  { %v405_v9 = vcombine.high %v404_v63, %v404_v63  ;;  %v476_v14 = vadd.f32 %v454_v58, %v372_v62  ;;  %v412_v20 = vrot.slane %v404_v63, %v7056_v48  ;;  %8342 = vst [vmem:[#allocation37_spill] sm:$0xff] %v7099_v54  ;;  %8343 = vst [vmem:[#allocation38_spill] sm:$0xff] %v7102_v55 }
 0x150   :  { %v393_v10 = vrot.slane %v365_v2, %v7056_v48  ;;  %v395_v11 = vcombine.high %v379_v4, %v379_v4  ;;  %v396_v12 = vcombine.high %v386_v5, %v386_v5  ;;  %v477_v13 = vadd.f32 %v468_v1, %v386_v5 }
 0x151   :  { %v419_v15 = vrot.slane %v405_v9, %v7056_v48  ;;  %v480_v18 = vadd.f32 %v461_v6, %v379_v4  ;;  %v478_v21 = vadd.f32 %v469_v8, %v394_v7  ;;  %v484_v29 = vadd.f32 %v470_v16, %v412_v20 }
 0x152   :  { %v397_v17 = vcombine.high %v393_v10, %v393_v10  ;;  %v481_v19 = vadd.f32 %v454_v58, %v393_v10  ;;  %v498_v22 = vcombine.low %v476_v14, %v477_v13  ;;  %v479_v23 = vadd.f32 %v470_v16, %v396_v12 }
 0x153   :  { %v482_v24 = vadd.f32 %v468_v1, %v395_v11  ;;  %v485_v25 = vadd.f32 %v461_v6, %v419_v15 }
 0x154   :  { %v483_v26 = vadd.f32 %v469_v8, %v397_v17  ;;  %v500_v27 = vcombine.low %v480_v18, %v481_v19  ;;  %v499_v28 = vcombine.low %v478_v21, %v479_v23  ;;  %v508_v31 = vrot.slane %v498_v22, %v7056_v48 }
 0x155   :  { %v547_v35 = vcombine.low %v484_v29, %v485_v25 }
 0x156   :  { %v501_v30 = vcombine.low %v482_v24, %v483_v26  ;;  %v515_v32 = vrot.slane %v499_v28, %v7056_v48  ;;  %v522_v33 = vrot.slane %v500_v27, %v7056_v48 }
 0x157   :  { %v554_v40 = vrot.slane %v547_v35, %v7056_v48 }
 0x158   :  { %v529_v34 = vrot.slane %v501_v30, %v7056_v48  ;;  %v530_v36 = vcombine.low %v508_v31, %v515_v32 }
 0x159   :  { %v561_v43 = vrot.slane %v554_v40, %v7056_v48 }
 0x15a   :  { %v531_v37 = vcombine.low %v522_v33, %v529_v34  ;;  %v538_v38 = vrot.slane %v530_v36, %v7056_v48 }
 0x15b   :  { %v569_v44 = vsel %vm568_vm2, %v561_v43, 0.0 }
 0x15c   :  { %v545_v39 = vrot.slane %v531_v37, %v7056_v48 }
 0x15e   :  { %v546_v41 = vcombine.low %v538_v38, %v545_v39 }
 0x160   :  { %v565_v42 = vsel %vm564_vm1, %v546_v41, 0.0 }
 0x161   :  { %566 = vadd.xlane.f32.xlu0 %v565_v42 }
 0x165   :  { %570 = vadd.xlane.f32.xlu0 %v569_v44  ;;  %v6227_v44 = vld [vmem:[%s6825_s17] ss:$0 sm:$0xff]  ;;  %s8371_s17 = sld [smem:[#allocation19_spill]] }
 0x1ee   :  { %v567_v52 = vpop.xlane.xlu0 %566 }
 0x1ef   :  { %v573_v57 = vmul.f32 0.03125, %v567_v52  ;;  %v6228_v52 = vld [vmem:[%s6830_s21] ss:$0 sm:$0xff]  ;;  %s8372_s21 = sld [smem:[#allocation20_spill]] }
 0x1f1   :  { %v580_v58 = vrot.slane %v573_v57, %v7084_v46  ;;  %v584_v59 = vrot.slane %v573_v57, %v7087_v49  ;;  %v588_v60 = vrot.slane %v573_v57, %v7090_v50  ;;  %v592_v61 = vrot.slane %v573_v57, %v7093_v51 }
 0x1f2   :  { %v571_v62 = vpop.xlane.xlu0 %570  ;;  %v596_v63 = vrot.slane %v573_v57, %v7096_v53  ;;  %v600_v0 = vrot.slane %v573_v57, %v7099_v54  ;;  %v604_v1 = vrot.slane %v573_v57, %v7102_v55  ;;  %v608_v2 = vrot.slane %v573_v57, %v7105_v56 }
 0x1f3   :  { %v574_v47 = vmul.f32 0.03125, %v571_v62  ;;  %v7115_v4 = vsub.f32 %v476_v14, %v580_v58  ;;  %v7117_v5 = vsub.f32 %v477_v13, %v584_v59  ;;  %v7119_v6 = vsub.f32 %v478_v21, %v588_v60 }
 0x1f4   :  { %v7121_v7 = vsub.f32 %v479_v23, %v592_v61  ;;  %v7123_v8 = vsub.f32 %v480_v18, %v596_v63  ;;  %v7125_v9 = vsub.f32 %v481_v19, %v600_v0  ;;  %v7127_v10 = vsub.f32 %v482_v24, %v604_v1 }
 0x1f5   :  { %v612_v11 = vrot.slane %v574_v47, %v7084_v46  ;;  %v616_v12 = vrot.slane %v574_v47, %v7087_v49  ;;  %v7131_v15 = vsub.f32 %v483_v26, %v608_v2  ;;  %v637_v13 = vmul.f32 %v7115_v4, %v7115_v4 }
 0x1f6   :  { %v638_v14 = vmul.f32 %v7117_v5, %v7117_v5  ;;  %v639_v16 = vmul.f32 %v7119_v6, %v7119_v6  ;;  %v640_v17 = vmul.f32 %v7121_v7, %v7121_v7  ;;  %v641_v18 = vmul.f32 %v7123_v8, %v7123_v8 }
 0x1f7   :  { %v7143_v19 = vsub.f32 %v484_v29, %v612_v11  ;;  %v7145_v20 = vsub.f32 %v485_v25, %v616_v12  ;;  %v642_v21 = vmul.f32 %v7125_v9, %v7125_v9  ;;  %v643_v22 = vmul.f32 %v7127_v10, %v7127_v10 }
 0x1f8   :  { %v644_v23 = vmul.f32 %v7131_v15, %v7131_v15  ;;  %v657_v24 = vcombine.low %v637_v13, %v638_v14  ;;  %v658_v26 = vcombine.low %v639_v16, %v640_v17  ;;  %v802_v57 = vcombine.high %v6227_v44, %v6227_v44 }
 0x1f9   :  { %v645_v27 = vmul.f32 %v7143_v19, %v7143_v19  ;;  %v646_v28 = vmul.f32 %v7145_v20, %v7145_v20  ;;  %v659_v29 = vcombine.low %v641_v18, %v642_v21  ;;  %v874_v58 = vcombine.high %v6228_v52, %v6228_v52 }
 0x1fa   :  { %v660_v25 = vcombine.low %v643_v22, %v644_v23  ;;  %v667_v30 = vrot.slane %v657_v24, %v7056_v48  ;;  %v674_v31 = vrot.slane %v658_v26, %v7056_v48  ;;  %v809_v61 = vrot.slane %v6227_v44, %v7056_v48 }
 0x1fb   :  { %v681_v32 = vrot.slane %v659_v29, %v7056_v48  ;;  %v706_v35 = vcombine.low %v645_v27, %v646_v28  ;;  %v816_v62 = vrot.slane %v802_v57, %v7056_v48  ;;  %v881_v0 = vrot.slane %v6228_v52, %v7056_v48 }
 0x1fc   :  { %v688_v33 = vrot.slane %v660_v25, %v7056_v48  ;;  %v689_v34 = vcombine.low %v667_v30, %v674_v31  ;;  %v888_v1 = vrot.slane %v874_v58, %v7056_v48  ;;  %v817_v11 = vcombine.high %v809_v61, %v809_v61 }
 0x1fd   :  { %v713_v39 = vrot.slane %v706_v35, %v7056_v48  ;;  %v818_v12 = vcombine.high %v816_v62, %v816_v62  ;;  %v889_v14 = vcombine.high %v881_v0, %v881_v0  ;;  %v825_v17 = vrot.slane %v809_v61, %v7056_v48 }
 0x1fe   :  { %v690_v36 = vcombine.low %v681_v32, %v688_v33  ;;  %v697_v37 = vrot.slane %v689_v34, %v7056_v48  ;;  %v890_v16 = vcombine.high %v888_v1, %v888_v1  ;;  %v832_v18 = vrot.slane %v816_v62, %v7056_v48 }
 0x1ff   :  { %v720_v42 = vrot.slane %v713_v39, %v7056_v48  ;;  %v839_v21 = vrot.slane %v817_v11, %v7056_v48  ;;  %v846_v22 = vrot.slane %v818_v12, %v7056_v48  ;;  %v897_v23 = vrot.slane %v881_v0, %v7056_v48 }
 0x200   :  { %v704_v38 = vrot.slane %v690_v36, %v7056_v48  ;;  %v904_v24 = vrot.slane %v888_v1, %v7056_v48  ;;  %v911_v26 = vrot.slane %v889_v14, %v7056_v48  ;;  %v918_v27 = vrot.slane %v890_v16, %v7056_v48 }
 0x201   :  { %v726_v43 = vsel %vm568_vm2, %v720_v42, 0.0  ;;  %v847_v28 = vcombine.high %v825_v17, %v825_v17  ;;  %v848_v29 = vcombine.high %v832_v18, %v832_v18  ;;  %v849_v25 = vcombine.high %v839_v21, %v839_v21 }
 0x202   :  { %v705_v40 = vcombine.low %v697_v37, %v704_v38  ;;  %v850_v30 = vcombine.high %v846_v22, %v846_v22  ;;  %v919_v32 = vcombine.high %v897_v23, %v897_v23  ;;  %v920_v33 = vcombine.high %v904_v24, %v904_v24 }
 0x203   :  { %v921_v34 = vcombine.high %v911_v26, %v911_v26  ;;  %v922_v35 = vcombine.high %v918_v27, %v918_v27 }
 0x204   :  { %v723_v41 = vsel %vm564_vm1, %v705_v40, 0.0 }
 0x205   :  { %724 = vadd.xlane.f32.xlu1 %v723_v41 }
 0x209   :  { %727 = vadd.xlane.f32.xlu1 %v726_v43 }
 0x292   :  { %v725_v59 = vpop.xlane.xlu1 %724 }
 0x293   :  { %v729_v60 = vmul.f32 0.03125, %v725_v59 }
 0x295   :  { %v731_v63 = vadd.f32 1e-05, %v729_v60 }
 0x296   :  { %v728_v2 = vpop.xlane.xlu1 %727 }
 0x297   :  { %6613 = vrsqrt.f32 %v731_v63  ;;  %v730_v47 = vmul.f32 0.03125, %v728_v2 }
 0x299   :  { %v732_v13 = vadd.f32 1e-05, %v730_v47 }
 0x29b   :  { %6615 = vrsqrt.f32 %v732_v13 }
 0x2a1   :  { %v6614_v31 = vpop.eup %6613 }
 0x2a2   :  { %v740_v36 = vrot.slane %v6614_v31, %v7084_v46  ;;  %v744_v37 = vrot.slane %v6614_v31, %v7087_v49  ;;  %v748_v38 = vrot.slane %v6614_v31, %v7090_v50  ;;  %v752_v39 = vrot.slane %v6614_v31, %v7093_v51 }
 0x2a3   :  { %v756_v40 = vrot.slane %v6614_v31, %v7096_v53  ;;  %v760_v41 = vrot.slane %v6614_v31, %v7099_v54  ;;  %v764_v42 = vrot.slane %v6614_v31, %v7102_v55  ;;  %v768_v43 = vrot.slane %v6614_v31, %v7105_v56 }
 0x2a4   :  { %v787_v44 = vmul.f32 %v740_v36, %v7115_v4  ;;  %v788_v52 = vmul.f32 %v744_v37, %v7117_v5  ;;  %v789_v57 = vmul.f32 %v748_v38, %v7119_v6  ;;  %v790_v58 = vmul.f32 %v752_v39, %v7121_v7 }
 0x2a5   :  { %v6616_v59 = vpop.eup %6615  ;;  %v791_v60 = vmul.f32 %v756_v40, %v7123_v8  ;;  %v792_v61 = vmul.f32 %v760_v41, %v7125_v9  ;;  %v793_v62 = vmul.f32 %v764_v42, %v7127_v10  ;;  %v794_v63 = vmul.f32 %v768_v43, %v7131_v15 }
 0x2a6   :  { %v772_v0 = vrot.slane %v6616_v59, %v7084_v46  ;;  %v776_v1 = vrot.slane %v6616_v59, %v7087_v49  ;;  %v859_v4 = vmul.f32 %v825_v17, %v787_v44  ;;  %v860_v2 = vmul.f32 %v839_v21, %v788_v52 }
 0x2a7   :  { %v861_v5 = vmul.f32 %v847_v28, %v789_v57  ;;  %v862_v47 = vmul.f32 %v849_v25, %v790_v58  ;;  %v863_v6 = vmul.f32 %v832_v18, %v791_v60  ;;  %v864_v11 = vmul.f32 %v846_v22, %v792_v61 }
 0x2a8   :  { %v795_v7 = vmul.f32 %v772_v0, %v7143_v19  ;;  %v796_v8 = vmul.f32 %v776_v1, %v7145_v20  ;;  %v865_v12 = vmul.f32 %v848_v29, %v793_v62  ;;  %v866_v9 = vmul.f32 %v850_v30, %v794_v63 }
 0x2a9   :  { %v7201_v13 = vadd.f32 %v897_v23, %v859_v4  ;;  %v7203_v10 = vadd.f32 %v911_v26, %v860_v2  ;;  %v7205_v15 = vadd.f32 %v919_v32, %v861_v5  ;;  %v7207_v14 = vadd.f32 %v921_v34, %v862_v47 }
 0x2aa   :  { %v7209_v16 = vadd.f32 %v904_v24, %v863_v6  ;;  %v7211_v28 = vadd.f32 %v918_v27, %v864_v11  ;;  %v7213_v18 = vadd.f32 %v920_v33, %v865_v12  ;;  %v7215_v22 = vadd.f32 %v922_v35, %v866_v9 }
 0x2ab   :  { %v951_v19 = vcombine.low %v7201_v13, %v7203_v10  ;;  %v952_v20 = vcombine.low %v7205_v15, %v7207_v14  ;;  %v867_v29 = vmul.f32 %v825_v17, %v795_v7  ;;  %v868_v25 = vmul.f32 %v839_v21, %v796_v8 }
 0x2ac   :  { %8345 = vst [vmem:[#allocation40_spill] sm:$0xff] %v7213_v18  ;;  %8346 = vst [vmem:[#allocation41_spill] sm:$0xff] %v7215_v22  ;;  %v953_v30 = vcombine.low %v7209_v16, %v7211_v28  ;;  %v954_v24 = vcombine.low %v7213_v18, %v7215_v22 }
 0x2ad   :  { %v961_v27 = vrot.slane %v951_v19, %v7056_v48  ;;  %v968_v31 = vrot.slane %v952_v20, %v7056_v48  ;;  %v7227_v32 = vadd.f32 %v897_v23, %v867_v29  ;;  %v7229_v33 = vadd.f32 %v911_v26, %v868_v25 }
 0x2ae   :  { %v975_v34 = vrot.slane %v953_v30, %v7056_v48  ;;  %v982_v35 = vrot.slane %v954_v24, %v7056_v48 }
 0x2af   :  { %8347 = vst [vmem:[#allocation42_spill] sm:$0xff] %v7227_v32  ;;  %8348 = vst [vmem:[#allocation43_spill] sm:$0xff] %v7229_v33  ;;  %v983_v17 = vcombine.low %v961_v27, %v968_v31  ;;  %v1000_v21 = vcombine.low %v7227_v32, %v7229_v33 }
 0x2b0   :  { %v984_v36 = vcombine.low %v975_v34, %v982_v35 }
 0x2b1   :  { %v991_v37 = vrot.slane %v983_v17, %v7056_v48  ;;  %v1007_v38 = vrot.slane %v1000_v21, %v7056_v48 }
 0x2b2   :  { %v998_v39 = vrot.slane %v984_v36, %v7056_v48 }
 0x2b3   :  { %v1014_v23 = vrot.slane %v1007_v38, %v7056_v48 }
 0x2b4   :  { %v999_v40 = vcombine.low %v991_v37, %v998_v39 }
 0x2b5   :  { %v1020_v26 = vsel %vm568_vm2, %v1014_v23, 0.0 }
 0x2b6   :  { %v1017_v41 = vsel %vm564_vm1, %v999_v40, 0.0  ;;  %1021 = vadd.xlane.f32.xlu1 %v1020_v26 }
 0x2b7   :  { %1018 = vadd.xlane.f32.xlu0 %v1017_v41 }
 0x343   :  { %v1022_v42 = vpop.xlane.xlu1 %1021 }
 0x344   :  { %v1024_v43 = vmul.f32 0.03125, %v1022_v42  ;;  %v1019_v44 = vpop.xlane.xlu0 %1018 }
 0x345   :  { %v1023_v52 = vmul.f32 0.03125, %v1019_v44 }
 0x346   :  { %v1062_v57 = vrot.slane %v1024_v43, %v7084_v46  ;;  %v1066_v58 = vrot.slane %v1024_v43, %v7087_v49 }
 0x347   :  { %v1030_v59 = vrot.slane %v1023_v52, %v7084_v46  ;;  %v1034_v60 = vrot.slane %v1023_v52, %v7087_v49  ;;  %v1038_v61 = vrot.slane %v1023_v52, %v7090_v50  ;;  %v1042_v62 = vrot.slane %v1023_v52, %v7093_v51 }
 0x348   :  { %v7248_v63 = vsub.f32 %v7227_v32, %v1062_v57  ;;  %v7251_v0 = vsub.f32 %v7229_v33, %v1066_v58  ;;  %v1046_v1 = vrot.slane %v1023_v52, %v7096_v53  ;;  %v1050_v4 = vrot.slane %v1023_v52, %v7099_v54 }
 0x349   :  { %v1054_v2 = vrot.slane %v1023_v52, %v7102_v55  ;;  %v1058_v5 = vrot.slane %v1023_v52, %v7105_v56  ;;  %v7258_v47 = vsub.f32 %v7201_v13, %v1030_v59  ;;  %v7261_v6 = vsub.f32 %v7203_v10, %v1034_v60 }
 0x34a   :  { %v1095_v11 = vmul.f32 %v7248_v63, %v7248_v63  ;;  %v1096_v7 = vmul.f32 %v7251_v0, %v7251_v0  ;;  %v7268_v8 = vsub.f32 %v7205_v15, %v1038_v61  ;;  %v7271_v12 = vsub.f32 %v7207_v14, %v1042_v62  ;;  %v204_v62 = vld [vmem:[%s6905_s20] sm:$0xff] }
 0x34b   :  { %v7274_v9 = vsub.f32 %v7209_v16, %v1046_v1  ;;  %v7277_v19 = vsub.f32 %v7211_v28, %v1050_v4  ;;  %v7280_v20 = vsub.f32 %v7213_v18, %v1054_v2  ;;  %v7283_v29 = vsub.f32 %v7215_v22, %v1058_v5  ;;  %v205_v1 = vld [vmem:[%s6905_s20 + $0x8] sm:$0xff]  ;;  %v206_v4 = vld [vmem:[%s6905_s20 + $0x10] sm:$0xff] }
 0x34c   :  { %v1156_v25 = vcombine.low %v1095_v11, %v1096_v7  ;;  %v1087_v30 = vmul.f32 %v7258_v47, %v7258_v47  ;;  %v1088_v24 = vmul.f32 %v7261_v6, %v7261_v6  ;;  %v1089_v27 = vmul.f32 %v7268_v8, %v7268_v8  ;;  %v207_v11 = vld [vmem:[%s6905_s20 + $0x18] sm:$0xff]  ;;  %s8379_s20 = sld [smem:[#allocation23_spill]] }
 0x34d   :  { %v1090_v31 = vmul.f32 %v7271_v12, %v7271_v12  ;;  %v1091_v34 = vmul.f32 %v7274_v9, %v7274_v9  ;;  %v1092_v35 = vmul.f32 %v7277_v19, %v7277_v19  ;;  %v1093_v17 = vmul.f32 %v7280_v20, %v7280_v20 }
 0x34e   :  { %v1163_v21 = vrot.slane %v1156_v25, %v7056_v48  ;;  %v1094_v36 = vmul.f32 %v7283_v29, %v7283_v29  ;;  %v1107_v37 = vcombine.low %v1087_v30, %v1088_v24  ;;  %v8281_v2 = vmov 0.0   ;;  %v6229_v30 = vld [vmem:[%s6895_s4] ss:$0 sm:$0xff]  ;;  %s8389_s4 = sld [smem:[#allocation13_spill]] }
 0x34f   :  { %v1108_v38 = vcombine.low %v1089_v27, %v1090_v31  ;;  %v1109_v39 = vcombine.low %v1091_v34, %v1092_v35  ;;  %6369 = vmatprep.subr.bf16.mxu1 %v8281_v2  ;;  %v1468_v5 = vpack.c.bf16 %v205_v1, %v204_v62  ;;  %6425 = vmatprep.subr.bf16.mxu0 %v8281_v2  ;;  %v6258_v24 = vld [vmem:[%s6835_s25] ss:$0 sm:$0xff]  ;;  %s8373_s25 = sld [smem:[#allocation9_spill]] }
 0x350   :  { %v1170_v23 = vrot.slane %v1163_v21, %v7056_v48  ;;  %v1110_v40 = vcombine.low %v1093_v17, %v1094_v36  ;;  %v1117_v26 = vrot.slane %v1107_v37, %v7056_v48  ;;  %v1469_v7 = vpack.c.bf16 %v207_v11, %v206_v4  ;;  %6373 = vmatprep.mubr.msk.bf16.mxu1 %vm6794_vm3, %v8281_v2  ;;  %v6230_v31 = vld [vmem:[%s6900_s12] ss:$0 sm:$0xff]  ;;  %s8378_s12 = sld [smem:[#allocation12_spill]] }
 0x351   :  { %v1124_v41 = vrot.slane %v1108_v38, %v7056_v48  ;;  %v1131_v42 = vrot.slane %v1109_v39, %v7056_v48  ;;  %6370 = vmatpush3.bf16.msra.mxu1 %v1468_v5  ;;  %6429 = vmatprep.mubr.msk.bf16.mxu0 %vm6794_vm3, %v8281_v2  ;;  %v6259_v34 = vld [vmem:[%s6840_s29] ss:$0 sm:$0xff]  ;;  %v1252_v17 = vcombine.high %v6229_v30, %v6229_v30  ;;  %s8374_s29 = sld [smem:[#allocation22_spill]] }
 0x352   :  { %v1176_v43 = vsel %vm568_vm2, %v1170_v23, 0.0  ;;  %v1138_v44 = vrot.slane %v1110_v40, %v7056_v48  ;;  %6371 = vmatprep.subr.bf16.mxu1 %v8281_v2  ;;  %v3443_v21 = vrot.slane %v6258_v24, %v7056_v48  ;;  %v1259_v36 = vrot.slane %v6229_v30, %v7056_v48 }
 0x353   :  { %1177 = vadd.xlane.f32.xlu1 %v1176_v43  ;;  %v1139_v52 = vcombine.low %v1117_v26, %v1124_v41  ;;  %v3436_v37 = vcombine.high %v6258_v24, %v6258_v24  ;;  %v1324_v38 = vcombine.high %v6230_v31, %v6230_v31  ;;  %v3508_v39 = vcombine.high %v6259_v34, %v6259_v34 }
 0x354   :  { %v1140_v57 = vcombine.low %v1131_v42, %v1138_v44  ;;  %v3515_v23 = vrot.slane %v6259_v34, %v7056_v48  ;;  %v1266_v40 = vrot.slane %v1252_v17, %v7056_v48  ;;  %v3451_v26 = vcombine.high %v3443_v21, %v3443_v21 }
 0x355   :  { %v1147_v58 = vrot.slane %v1139_v52, %v7056_v48  ;;  %6372 = vmatpush3.bf16.msra.mxu1 %v1469_v7  ;;  %v1267_v42 = vcombine.high %v1259_v36, %v1259_v36  ;;  %v3450_v43 = vrot.slane %v3436_v37, %v7056_v48  ;;  %v1338_v52 = vrot.slane %v1324_v38, %v7056_v48 }
 0x356   :  { %v1154_v59 = vrot.slane %v1140_v57, %v7056_v48  ;;  %6377 = vmatprep.subr.mxu1 %v8281_v2  ;;  %v3522_v57 = vrot.slane %v3508_v39, %v7056_v48  ;;  %v7336_v62 = vrot.slane %v1259_v36, %v7056_v48  ;;  %v7339_v1 = vrot.slane %v3443_v21, %v7056_v48 }
 0x357   :  { %v7342_v4 = vrot.slane %v3451_v26, %v7056_v48  ;;  %v7345_v5 = vrot.slane %v1266_v40, %v7056_v48  ;;  %v7348_v11 = vrot.slane %v1267_v42, %v7056_v48  ;;  %v3452_v7 = vcombine.high %v3450_v43, %v3450_v43 }
 0x358   :  { %v1155_v60 = vcombine.low %v1147_v58, %v1154_v59  ;;  %v3523_v58 = vcombine.high %v3515_v23, %v3515_v23  ;;  %v1297_v21 = vcombine.high %v7336_v62, %v7336_v62  ;;  %v1354_v26 = vrot.slane %v1338_v52, %v7056_v48 }
 0x359   :  { %v1298_v39 = vcombine.high %v7345_v5, %v7345_v5  ;;  %v7374_v42 = vrot.slane %v3452_v7, %v7056_v48 }
 0x35a   :  { %v1173_v61 = vsel %vm564_vm1, %v1155_v60, 0.0  ;;  %v1268_v60 = vcombine.high %v1266_v40, %v1266_v40 }
 0x35b   :  { %1174 = vadd.xlane.f32.xlu0 %v1173_v61  ;;  %v1331_v61 = vrot.slane %v6230_v31, %v7056_v48  ;;  %v3524_v31 = vcombine.high %v3522_v57, %v3522_v57 }
 0x35c   :  { %v1296_v17 = vrot.slane %v1268_v60, %v7056_v48 }
 0x35d   :  { %v1339_v36 = vcombine.high %v1331_v61, %v1331_v61  ;;  %v1347_v40 = vrot.slane %v1331_v61, %v7056_v48  ;;  %v7382_v60 = vrot.slane %v3524_v31, %v7056_v48 }
 0x35e   :  { %v1300_v61 = vcombine.high %v1296_v17, %v1296_v17 }
 0x3e0   :  { %v1178_v25 = vpop.xlane.xlu1 %1177 }
 0x3e1   :  { %v1180_v27 = vmul.f32 0.03125, %v1178_v25  ;;  %v1340_v25 = vcombine.high %v1338_v52, %v1338_v52  ;;  %v1361_v52 = vrot.slane %v1339_v36, %v7056_v48 }
 0x3e3   :  { %v1182_v35 = vadd.f32 1e-05, %v1180_v27  ;;  %v7355_v27 = vrot.slane %v3515_v23, %v7056_v48  ;;  %v7368_v23 = vrot.slane %v3450_v43, %v7056_v48  ;;  %v1299_v43 = vcombine.high %v7348_v11, %v7348_v11 }
 0x3e5   :  { %6617 = vrsqrt.f32 %v1182_v35  ;;  %v7358_v35 = vrot.slane %v3523_v58, %v7056_v48 }
 0x3e8   :  { %v1175_v41 = vpop.xlane.xlu0 %1174 }
 0x3e9   :  { %v1179_v44 = vmul.f32 0.03125, %v1175_v41  ;;  %v1368_v41 = vrot.slane %v1340_v25, %v7056_v48  ;;  %v1369_v25 = vcombine.high %v1347_v40, %v1347_v40 }
 0x3eb   :  { %v1181_v59 = vadd.f32 1e-05, %v1179_v44  ;;  %v1372_v31 = vcombine.high %v1368_v41, %v1368_v41 }
 0x3ed   :  { %6619 = vrsqrt.f32 %v1181_v59  ;;  %v7379_v59 = vrot.slane %v3522_v57, %v7056_v48  ;;  %v1370_v57 = vcombine.high %v1354_v26, %v1354_v26 }
 0x3ef   :  { %v6618_v34 = vpop.eup %6617 }
 0x3f0   :  { %v1222_v37 = vrot.slane %v6618_v34, %v7084_v46  ;;  %v1226_v38 = vrot.slane %v6618_v34, %v7087_v49 }
 0x3f2   :  { %v1245_v44 = vmul.f32 %v1222_v37, %v7248_v63  ;;  %v1246_v58 = vmul.f32 %v1226_v38, %v7251_v0  ;;  %v1371_v37 = vcombine.high %v1361_v52, %v1361_v52  ;;  %v3484_v38 = vcombine.high %v7374_v42, %v7374_v42 }
 0x3f4   :  { %v1317_v7 = vmul.f32 %v7336_v62, %v1245_v44  ;;  %v1318_v34 = vmul.f32 %v7348_v11, %v1246_v58  ;;  %v3501_v63 = vmul.f32 %v7339_v1, %v1245_v44  ;;  %v3502_v0 = vmul.f32 %v7342_v4, %v1246_v58 }
 0x3f6   :  { %v7404_v24 = vadd.f32 %v7355_v27, %v3501_v63  ;;  %v1389_v30 = vadd.f32 %v1347_v40, %v1317_v7  ;;  %v1390_v33 = vadd.f32 %v1361_v52, %v1318_v34 }
 0x3f7   :  { %v6620_v2 = vpop.eup %6619 }
 0x3f8   :  { %v1190_v22 = vrot.slane %v6620_v2, %v7084_v46  ;;  %v1194_v3 = vrot.slane %v6620_v2, %v7087_v49  ;;  %v1198_v36 = vrot.slane %v6620_v2, %v7090_v50  ;;  %v1202_v32 = vrot.slane %v6620_v2, %v7093_v51 }
 0x3f9   :  { %v1206_v45 = vrot.slane %v6620_v2, %v7096_v53  ;;  %v1210_v44 = vrot.slane %v6620_v2, %v7099_v54  ;;  %v1214_v18 = vrot.slane %v6620_v2, %v7102_v55  ;;  %v1218_v58 = vrot.slane %v6620_v2, %v7105_v56 }
 0x3fa   :  { %v1237_v63 = vmul.f32 %v1190_v22, %v7258_v47  ;;  %v1238_v7 = vmul.f32 %v1194_v3, %v7261_v6  ;;  %v1239_v34 = vmul.f32 %v1198_v36, %v7268_v8  ;;  %v1240_v49 = vmul.f32 %v1202_v32, %v7271_v12 }
 0x3fb   :  { %v1241_v50 = vmul.f32 %v1206_v45, %v7274_v9  ;;  %v1242_v51 = vmul.f32 %v1210_v44, %v7277_v19  ;;  %v1243_v53 = vmul.f32 %v1214_v18, %v7280_v20  ;;  %v1244_v54 = vmul.f32 %v1218_v58, %v7283_v29 }
 0x3fc   :  { %v1309_v55 = vmul.f32 %v7336_v62, %v1237_v63  ;;  %v1310_v2 = vmul.f32 %v7348_v11, %v1238_v7  ;;  %v1311_v56 = vmul.f32 %v1297_v21, %v1239_v34  ;;  %v1312_v22 = vmul.f32 %v1299_v43, %v1240_v49 }
 0x3fd   :  { %v1313_v3 = vmul.f32 %v7345_v5, %v1241_v50  ;;  %v1314_v47 = vmul.f32 %v1296_v17, %v1242_v51  ;;  %v1315_v6 = vmul.f32 %v1298_v39, %v1243_v53  ;;  %v1316_v8 = vmul.f32 %v1300_v61, %v1244_v54 }
 0x3fe   :  { %v1381_v32 = vadd.f32 %v1347_v40, %v1309_v55  ;;  %v1382_v12 = vadd.f32 %v1361_v52, %v1310_v2  ;;  %v1383_v45 = vadd.f32 %v1369_v25, %v1311_v56  ;;  %v1384_v9 = vadd.f32 %v1371_v37, %v1312_v22 }
 0x3ff   :  { %v1385_v19 = vadd.f32 %v1354_v26, %v1313_v3  ;;  %v1386_v36 = vadd.f32 %v1368_v41, %v1314_v47  ;;  %v1387_v18 = vadd.f32 %v1370_v57, %v1315_v6  ;;  %v1388_v20 = vadd.f32 %v1372_v31, %v1316_v8 }
 0x400   :  { %v1401_v29 = vcombine.low %v1381_v32, %v1382_v12  ;;  %v1402_v44 = vcombine.low %v1383_v45, %v1384_v9  ;;  %v1450_v62 = vcombine.low %v1389_v30, %v1390_v33  ;;  %v3493_v11 = vmul.f32 %v7339_v1, %v1237_v63 }
 0x401   :  { %v1403_v21 = vcombine.low %v1385_v19, %v1386_v36  ;;  %v1404_v43 = vcombine.low %v1387_v18, %v1388_v20  ;;  %v3494_v5 = vmul.f32 %v7342_v4, %v1238_v7  ;;  %v8349_v17 = vcombine.high %v7339_v1, %v7339_v1 }
 0x402   :  { %v3574_v56 = vadd.f32 %v7358_v35, %v3502_v0  ;;  %v1411_v39 = vrot.slane %v1401_v29, %v7056_v48  ;;  %v1418_v40 = vrot.slane %v1402_v44, %v7056_v48  ;;  %v8350_v26 = vcombine.high %v7342_v4, %v7342_v4 }
 0x403   :  { %v3495_v55 = vmul.f32 %v8349_v17, %v1239_v34  ;;  %v1425_v30 = vrot.slane %v1403_v21, %v7056_v48  ;;  %v1432_v41 = vrot.slane %v1404_v43, %v7056_v48  ;;  %v3497_v61 = vmul.f32 %v7368_v23, %v1241_v50 }
 0x404   :  { %v3496_v33 = vmul.f32 %v8350_v26, %v1240_v49  ;;  %v3498_v52 = vmul.f32 %v7374_v42, %v1242_v51  ;;  %v1433_v1 = vcombine.low %v1411_v39, %v1418_v40  ;;  %v1457_v25 = vrot.slane %v1450_v62, %v7056_v48 }
 0x405   :  { %v8351_v0 = vcombine.high %v7368_v23, %v7368_v23  ;;  %v3500_v37 = vmul.f32 %v3484_v38, %v1244_v54  ;;  %v1434_v31 = vcombine.low %v1425_v30, %v1432_v41  ;;  %v3565_v4 = vadd.f32 %v7355_v27, %v3493_v11  ;;  %v6231_v11 = vld [vmem:[%s6910_s27] ss:$0 sm:$0xff]  ;;  %s8388_s27 = sld [smem:[#allocation15_spill]] }
 0x406   :  { %v3566_v49 = vadd.f32 %v7358_v35, %v3494_v5  ;;  %v8352_v58 = vcombine.high %v7355_v27, %v7355_v27  ;;  %v1441_v50 = vrot.slane %v1433_v1, %v7056_v48  ;;  %v8353_v51 = vcombine.high %v7358_v35, %v7358_v35 }
 0x407   :  { %v3499_v57 = vmul.f32 %v8351_v0, %v1243_v53  ;;  %v3569_v7 = vadd.f32 %v7379_v59, %v3497_v61  ;;  %v3570_v53 = vadd.f32 %v7382_v60, %v3498_v52  ;;  %v1448_v54 = vrot.slane %v1434_v31, %v7056_v48 }
 0x408   :  { %v3567_v63 = vadd.f32 %v8352_v58, %v3495_v55  ;;  %v3568_v42 = vadd.f32 %v8353_v51, %v3496_v33  ;;  %v8354_v23 = vcombine.high %v7379_v59, %v7379_v59  ;;  %v8355_v27 = vcombine.high %v7382_v60, %v7382_v60 }
 0x409   :  { %v3585_v2 = vcombine.low %v3565_v4, %v3566_v49  ;;  %v3587_v3 = vcombine.low %v3569_v7, %v3570_v53  ;;  %v3634_v35 = vcombine.low %v7404_v24, %v3574_v56  ;;  %v1449_v47 = vcombine.low %v1441_v50, %v1448_v54 }
 0x40a   :  { %v3571_v38 = vadd.f32 %v8354_v23, %v3499_v57  ;;  %v3572_v34 = vadd.f32 %v8355_v27, %v3500_v37  ;;  %v3586_v22 = vcombine.low %v3567_v63, %v3568_v42  ;;  %v1464_v6 = vrot.slane %v1457_v25, %v7056_v48 }
 0x40b   :  { %v3595_v32 = vrot.slane %v3585_v2, %v7056_v48  ;;  %v3609_v59 = vrot.slane %v3587_v3, %v7056_v48  ;;  %v3641_v24 = vrot.slane %v3634_v35, %v7056_v48  ;;  %v8356_v36 = vmov 0.0  }
 0x40c   :  { %v3588_v8 = vcombine.low %v3571_v38, %v3572_v34  ;;  %v3602_v12 = vrot.slane %v3586_v22, %v7056_v48  ;;  %v1467_v45 = vpack.c.bf16 %v1464_v6, %v1449_v47 }
 0x40d   :  { %v3648_v44 = vrot.slane %v3641_v24, %v7056_v48 }
 0x40e   :  { %v3616_v60 = vrot.slane %v3588_v8, %v7056_v48  ;;  %v3617_v9 = vcombine.low %v3595_v32, %v3602_v12  ;;  %6374 = vmatmul.mubr.msk.bf16.vlgmr.msra.gmra.mrb[0].mxu1 %vm564_vm1, %v1467_v45 }
 0x40f   :  { %6379 = vmatprep.mubr.msk.f32.mxu1 %vm6794_vm3, %v8356_v36 }
 0x410   :  { %v3618_v19 = vcombine.low %v3609_v59, %v3616_v60  ;;  %v3625_v18 = vrot.slane %v3617_v9, %v7056_v48 }
 0x412   :  { %v3632_v20 = vrot.slane %v3618_v19, %v7056_v48 }
 0x414   :  { %v3633_v29 = vcombine.low %v3625_v18, %v3632_v20 }
 0x416   :  { %v7475_v62 = vpack.c.bf16 %v3648_v44, %v3633_v29 }
 0x4e1   :  { %v1513_v21 = vpop.f32.mrb[0].mxu1 }
 0x4e2   :  { %v1514_v43 = vadd.f32 %v6231_v11, %v1513_v21  ;;  %v6375_v5 = vpop.f32.mrb[1].mxu1 }
 0x4e3   :  { %v1516_v17 = vpop.f32.mrb[2].mxu1 }
 0x4e4   :  { %v1522_v55 = vcombine.high %v1514_v43, %v1514_v43  ;;  %v1529_v56 = vrot.slane %v1514_v43, %v7056_v48  ;;  %v1517_v39 = vadd.f32 %v6231_v11, %v1516_v17  ;;  %v6376_v40 = vpop.f32.mrb[3].mxu1 }
 0x4e6   :  { %v1536_v26 = vrot.slane %v1522_v55, %v7056_v48  ;;  %v1537_v33 = vcombine.high %v1529_v56, %v1529_v56  ;;  %v1577_v30 = vrot.slane %v1517_v39, %v7056_v48  ;;  %v1545_v41 = vrot.slane %v1529_v56, %v7056_v48 }
 0x4e8   :  { %v1538_v61 = vcombine.high %v1536_v26, %v1536_v26  ;;  %v1552_v52 = vrot.slane %v1536_v26, %v7056_v48  ;;  %v1559_v1 = vrot.slane %v1537_v33, %v7056_v48  ;;  %v1578_v25 = vcombine.high %v1577_v30, %v1577_v30 }
 0x4e9   :  { %v1585_v49 = vrot.slane %v1577_v30, %v7056_v48 }
 0x4ea   :  { %v1566_v0 = vrot.slane %v1538_v61, %v7056_v48  ;;  %v1568_v57 = vcombine.high %v1552_v52, %v1552_v52  ;;  %v1595_v37 = vcombine.low %v1545_v41, %v1559_v1  ;;  %v6233_v31 = vcombine.high %v1545_v41, %v1559_v1 }
 0x4eb   :  { %v1617_v4 = vrot.slane %v1552_v52, %v7056_v48  ;;  %v1592_v58 = vrot.slane %v1578_v25, %v7056_v48 }
 0x4ec   :  { %v1603_v63 = vrot.slane %v1595_v37, %v7056_v48  ;;  %v1610_v50 = vrot.slane %v6233_v31, %v7056_v48  ;;  %v1711_v51 = vcombine.low %v1566_v0, %v1568_v57  ;;  %v1570_v42 = vcombine.high %v1566_v0, %v1566_v0 }
 0x4ed   :  { %v1632_v54 = vrot.slane %v1617_v4, %v7056_v48  ;;  %v1733_v34 = vrot.slane %v1592_v58, %v7056_v48 }
 0x4ee   :  { %v1618_v7 = vcombine.low %v1603_v63, %v1610_v50  ;;  %v1712_v53 = vcombine.low %v1570_v42, %v1585_v49  ;;  %v1719_v38 = vrot.slane %v1711_v51, %v7056_v48 }
 0x4ef   :  { %v1748_v35 = vrot.slane %v1733_v34, %v7056_v48 }
 0x4f0   :  { %v1625_v23 = vrot.slane %v1618_v7, %v7056_v48  ;;  %v1726_v27 = vrot.slane %v1712_v53, %v7056_v48  ;;  %v8357_v7 = vlaneseq }
 0x4f2   :  { %v1734_v2 = vcombine.low %v1719_v38, %v1726_v27  ;;  %v7495_v22 = vcombine.low %v1625_v23, %v1632_v54  ;;  %v7548_v53 = vand.u32 127, %v8357_v7 }
 0x4f4   :  { %v1741_v3 = vrot.slane %v1734_v2, %v7056_v48  ;;  %1634 = vrot.lane.b32.xlu0 %v7495_v22, %s6795_s0  ;;  %vm2042_vm6 = vcmp.ge.s32.totalorder %v7548_v53, 16  ;;  %vm2043_vm7 = vcmp.lt.s32.totalorder %v7548_v53, 32  ;;  %vm1852_vm11 = vcmp.lt.s32.totalorder %v7548_v53, 16 }
 0x4f5   :  { %vm7552_vm8 = vmand %vm2042_vm6, %vm2043_vm7 }
 0x4f6   :  { %v7501_v47 = vcombine.low %v1741_v3, %v1748_v35 }
 0x4f8   :  { %1942 = vrot.lane.b32.xlu0 %v7501_v47, %s6796_s5  ;;  %1750 = vrot.lane.b32.xlu1 %v7501_v47, %s6795_s0 }
 0x4fc   :  { %1864 = vrot.lane.b32.xlu1 %v7495_v22, %s6796_s5 }
 0x500   :  { %1862 = vrot.lane.b32.xlu1 %v7495_v22, %s6797_s9 }
 0x504   :  { %1940 = vrot.lane.b32.xlu1 %v7501_v47, %s6797_s9 }
 0x566   :  { %v1635_v6 = vpop.permute.xlu0 %1634 }
 0x567   :  { %6378 = vmatpush3.xpose.msk.msra.mxu1 %vm1636_vm4, %v1635_v6 }
 0x568   :  { %6382 = vmatprep.subr.mxu1 %v8356_v36 }
 0x56a   :  { %6380 = vmatmul.mubr.msk.f32.vlgmr.msra.gmra.mrb[4].mxu1 %vm1636_vm4, %v7495_v22  ;;  %v1751_v8 = vpop.permute.xlu1 %1750  ;;  %v1943_v59 = vpop.permute.xlu0 %1942 }
 0x56b   :  { %6383 = vmatpush3.xpose.msk.msra.mxu1 %vm1636_vm4, %v1751_v8  ;;  %6384 = vmatprep.mubr.msk.f32.mxu1 %vm6794_vm3, %v8356_v36 }
 0x56c   :  { %6387 = vmatprep.subr.mxu1 %v8356_v36 }
 0x56e   :  { %6385 = vmatmul.mubr.msk.f32.vlgmr.msra.gmra.mrb[6].mxu1 %vm1636_vm4, %v7501_v47  ;;  %v1865_v32 = vpop.permute.xlu1 %1864 }
 0x56f   :  { %6388 = vmatpush3.xpose.msk.msra.mxu1 %vm1636_vm4, %v1865_v32  ;;  %6389 = vmatprep.mubr.msk.f32.mxu1 %vm6794_vm3, %v8356_v36 }
 0x570   :  { %6392 = vmatprep.subr.mxu1 %v8356_v36 }
 0x572   :  { %v1863_v12 = vpop.permute.xlu1 %1862 }
 0x573   :  { %6390 = vmatmul.mubr.msk.f32.vlgmr.msra.gmra.mrb[8].mxu1 %vm1636_vm4, %v1863_v12 }
 0x574   :  { %6393 = vmatpush3.xpose.msk.msra.mxu1 %vm1636_vm4, %v1943_v59  ;;  %6394 = vmatprep.mubr.msk.f32.mxu1 %vm6794_vm3, %v8356_v36 }
 0x575   :  { %6397 = vmatprep.subr.mxu1 %v8356_v36 }
 0x576   :  { %v1941_v45 = vpop.permute.xlu1 %1940 }
 0x577   :  { %6395 = vmatmul.mubr.msk.f32.vlgmr.msra.gmra.mrb[10].mxu1 %vm1636_vm4, %v1941_v45 }
 0x578   :  { %6399 = vmatprep.mubr.msk.f32.mxu1 %vm6794_vm3, %v8356_v36 }
 0x63d   :  { %v1707_v60 = vpop.f32.mrb[4].mxu1 }
 0x63e   :  { %v6381_v9 = vpop.f32.mrb[5].mxu1  ;;  %v1826_v44 = vmul.f32 0.25, %v1707_v60 }
 0x640   :  { %v1829_v55 = vsel %vm1828_vm5, %v1826_v44, -inf }
 0x641   :  { %v1822_v19 = vpop.f32.mrb[6].mxu1 }
 0x642   :  { %v6386_v24 = vpop.f32.mrb[7].mxu1  ;;  %v1827_v17 = vmul.f32 0.25, %v1822_v19 }
 0x643   :  { %v209_v24 = vld [vmem:[%s6915_s30] sm:$0xff] }
 0x644   :  { %v1832_v39 = vsel %vm1828_vm5, %v1827_v17, -inf }
 0x646   :  { %v1936_v18 = vpop.f32.mrb[8].mxu1 }
 0x647   :  { %v2018_v20 = vmul.f32 0.25, %v1936_v18  ;;  %v6391_v29 = vpop.f32.mrb[9].mxu1  ;;  %v210_v18 = vld [vmem:[%s6915_s30 + $0x8] sm:$0xff] }
 0x648   :  { %v2500_v29 = vpack.c.bf16 %v210_v18, %v209_v24 }
 0x649   :  { %v2020_v11 = vsel %vm1828_vm5, %v2018_v20, -inf }
 0x64a   :  { %2021 = vmax.xlane.f32.xlu0 %v2020_v11  ;;  %v2014_v21 = vpop.f32.mrb[10].mxu1 }
 0x64b   :  { %v2019_v43 = vmul.f32 0.25, %v2014_v21  ;;  %v6396_v5 = vpop.f32.mrb[11].mxu1 }
 0x64d   :  { %v2023_v56 = vsel %vm1828_vm5, %v2019_v43, -inf }
 0x64e   :  { %1830 = vmax.xlane.f32.xlu0 %v1829_v55  ;;  %2024 = vmax.xlane.f32.xlu1 %v2023_v56 }
 0x652   :  { %1833 = vmax.xlane.f32.xlu0 %v1832_v39 }
 0x6d7   :  { %v2022_v40 = vpop.xlane.xlu0 %2021 }
 0x6d8   :  { %v2026_v26 = vsub.f32 %v2018_v20, %v2022_v40  ;;  %v211_v20 = vld [vmem:[%s6915_s30 + $0x10] sm:$0xff] }
 0x6da   :  { %v2028_v61 = vmul.f32 1.442695, %v2026_v26 }
 0x6db   :  { %v1831_v33 = vpop.xlane.xlu0 %1830  ;;  %v2025_v30 = vpop.xlane.xlu1 %2024 }
 0x6dc   :  { %v1835_v41 = vsub.f32 %v1826_v44, %v1831_v33  ;;  %v2027_v1 = vsub.f32 %v2019_v43, %v2025_v30  ;;  %v212_v44 = vld [vmem:[%s6915_s30 + $0x18] sm:$0xff]  ;;  %s8377_s30 = sld [smem:[#allocation11_spill]] }
 0x6dd   :  { %v2501_v11 = vpack.c.bf16 %v212_v44, %v211_v20 }
 0x6de   :  { %v1837_v52 = vmul.f32 1.442695, %v1835_v41  ;;  %v2030_v57 = vmul.f32 1.442695, %v2027_v1 }
 0x6df   :  { %v1834_v25 = vpop.xlane.xlu0 %1833 }
 0x6e0   :  { %6621 = vpow2.f32 %v1837_v52  ;;  %v1836_v0 = vsub.f32 %v1827_v17, %v1834_v25 }
 0x6e1   :  { %6623 = vpow2.f32 %v2028_v61 }
 0x6e2   :  { %v1839_v37 = vmul.f32 1.442695, %v1836_v0 }
 0x6e4   :  { %6625 = vpow2.f32 %v1839_v37 }
 0x6e5   :  { %6627 = vpow2.f32 %v2030_v57 }
 0x6ea   :  { %v6622_v31 = vpop.eup %6621 }
 0x6eb   :  { %v1841_v4 = vsel %vm1828_vm5, %v6622_v31, 0.0  ;;  %v6624_v49 = vpop.eup %6623 }
 0x6ec   :  { %1842 = vadd.xlane.f32.xlu0 %v1841_v4  ;;  %v2032_v63 = vsel %vm1828_vm5, %v6624_v49, 0.0 }
 0x6ee   :  { %v6626_v58 = vpop.eup %6625 }
 0x6ef   :  { %v1844_v50 = vsel %vm1828_vm5, %v6626_v58, 0.0  ;;  %v6628_v51 = vpop.eup %6627 }
 0x6f0   :  { %2033 = vadd.xlane.f32.xlu0 %v2032_v63  ;;  %1845 = vadd.xlane.f32.xlu1 %v1844_v50  ;;  %v2035_v42 = vsel %vm1828_vm5, %v6628_v51, 0.0 }
 0x6f4   :  { %2036 = vadd.xlane.f32.xlu1 %v2035_v42 }
 0x705   :  { %1856 = vrot.lane.b32.xlu1 %v7501_v47, %s6798_s13 }
 0x706   :  { %1854 = vrot.lane.b32.xlu0 %v7495_v22, %s6798_s13 }
 0x779   :  { %v1843_v54 = vpop.xlane.xlu0 %1842 }
 0x77d   :  { %v2034_v23 = vpop.xlane.xlu0 %2033  ;;  %v1846_v38 = vpop.xlane.xlu1 %1845 }
 0x77e   :  { %6629 = vrcp.f32 %v2034_v23 }
 0x781   :  { %v1855_v34 = vpop.permute.xlu0 %1854  ;;  %v2037_v2 = vpop.xlane.xlu1 %2036 }
 0x782   :  { %v2045_v22 = vsel %vm7552_vm8, %v1855_v34, 0.0  ;;  %6631 = vrcp.f32 %v2037_v2  ;;  %v1860_v59 = vsel %vm1852_vm11, %v1855_v34, 0.0 }
 0x783   :  { %6398 = vmatpush3.msk.msra.mxu1 %vm2051_vm9, %v2045_v22  ;;  %6633 = vrcp.f32 %v1843_v54 }
 0x784   :  { %6402 = vmatprep.subr.mxu1 %v8356_v36  ;;  %6635 = vrcp.f32 %v1846_v38 }
 0x785   :  { %v1857_v35 = vpop.permute.xlu1 %1856 }
 0x786   :  { %v2046_v6 = vsel %vm7552_vm8, %v1857_v35, 0.0  ;;  %v1861_v9 = vsel %vm1852_vm11, %v1857_v35, 0.0 }
 0x788   :  { %v6630_v3 = vpop.eup %6629 }
 0x789   :  { %v2039_v47 = vmul.f32 %v6630_v3, %v6624_v49 }
 0x78b   :  { %6400 = vmatmul.mubr.msk.f32.vlgmr.msra.gmra.mrb[12].mxu1 %vm2047_vm10, %v2039_v47 }
 0x78c   :  { %v6632_v8 = vpop.eup %6631  ;;  %6403 = vmatpush3.msk.msra.mxu1 %vm2051_vm9, %v2046_v6  ;;  %6404 = vmatprep.mubr.msk.f32.mxu1 %vm6794_vm3, %v8356_v36  ;;  %v6252_v6 = vld [vmem:[%s6920_s24] ss:$0 sm:$0xff]  ;;  %s8376_s24 = sld [smem:[#allocation10_spill]] }
 0x78d   :  { %v2041_v32 = vmul.f32 %v6632_v8, %v6628_v51  ;;  %6407 = vmatprep.subr.mxu1 %v8356_v36  ;;  %v6634_v12 = vpop.eup %6633  ;;  %v2644_v8 = vcombine.high %v6252_v6, %v6252_v6 }
 0x78e   :  { %v1848_v45 = vmul.f32 %v6634_v12, %v6622_v31  ;;  %v6636_v60 = vpop.eup %6635 }
 0x78f   :  { %6405 = vmatmul.mubr.msk.f32.vlgmr.msra.gmra.mrb[14].mxu1 %vm2047_vm10, %v2041_v32  ;;  %v1850_v19 = vmul.f32 %v6636_v60, %v6626_v58  ;;  %v2651_v32 = vrot.slane %v6252_v6, %v7056_v48  ;;  %v2658_v12 = vrot.slane %v2644_v8, %v7056_v48  ;;  %v8363_v8 = vld [vmem:[#allocation43_spill] sm:$0xff] }
 0x790   :  { %6408 = vmatpush3.msk.msra.mxu1 %vm2051_vm9, %v1860_v59  ;;  %6409 = vmatprep.mubr.msk.f32.mxu1 %vm6794_vm3, %v8356_v36 }
 0x791   :  { %6412 = vmatprep.subr.mxu1 %v8356_v36  ;;  %v2659_v59 = vcombine.high %v2651_v32, %v2651_v32  ;;  %v2660_v60 = vcombine.high %v2658_v12, %v2658_v12 }
 0x793   :  { %6410 = vmatmul.mubr.msk.f32.vlgmr.msra.gmra.mrb[12].mxu1 %vm2047_vm10, %v1848_v45 }
 0x794   :  { %6413 = vmatpush3.msk.msra.mxu1 %vm2051_vm9, %v1861_v9  ;;  %6414 = vmatprep.mubr.msk.f32.mxu1 %vm6794_vm3, %v8356_v36  ;;  %v2667_v9 = vrot.slane %v2651_v32, %v7056_v48 }
 0x795   :  { %6417 = vmatprep.subr.bf16.mxu1 %v8356_v36 }
 0x797   :  { %6415 = vmatmul.mubr.msk.f32.vlgmr.msra.gmra.mrb[14].mxu1 %vm2047_vm10, %v1850_v19  ;;  %v2674_v19 = vrot.slane %v2658_v12, %v7056_v48 }
 0x798   :  { %6421 = vmatprep.mubr.msk.bf16.mxu1 %vm6794_vm3, %v8356_v36  ;;  %6418 = vmatpush3.bf16.msra.mxu1 %v2500_v29  ;;  %v2681_v29 = vrot.slane %v2659_v59, %v7056_v48 }
 0x799   :  { %6419 = vmatprep.subr.bf16.mxu1 %v8356_v36 }
 0x79c   :  { %6420 = vmatpush3.bf16.msra.mxu1 %v2501_v11 }
 0x79d   :  { %6433 = vmatprep.subr.bf16.mxu1 %v8356_v36 }
 0x866   :  { %v2273_v21 = vpop.f32.mrb[12].mxu1 }
 0x867   :  { %v2355_v43 = vcombine.high %v2273_v21, %v2273_v21  ;;  %v2362_v5 = vrot.slane %v2273_v21, %v7056_v48  ;;  %v6411_v17 = vpop.f32.mrb[13].mxu1 }
 0x869   :  { %v2370_v55 = vcombine.high %v2362_v5, %v2362_v5  ;;  %v2369_v56 = vrot.slane %v2355_v43, %v7056_v48  ;;  %v2377_v40 = vrot.slane %v2362_v5, %v7056_v48 }
 0x86a   :  { %v2349_v39 = vpop.f32.mrb[14].mxu1 }
 0x86b   :  { %v2391_v26 = vrot.slane %v2370_v55, %v7056_v48  ;;  %v2394_v33 = vcombine.high %v2349_v39, %v2349_v39  ;;  %v2401_v30 = vrot.slane %v2349_v39, %v7056_v48  ;;  %v6416_v41 = vpop.f32.mrb[15].mxu1  ;;  %v2384_v0 = vrot.slane %v2369_v56, %v7056_v48 }
 0x86c   :  { %v2688_v55 = vrot.slane %v2660_v60, %v7056_v48  ;;  %v2689_v56 = vcombine.high %v2667_v9, %v2667_v9  ;;  %v2690_v39 = vcombine.high %v2674_v19, %v2674_v19 }
 0x86d   :  { %v2433_v61 = vcombine.low %v2377_v40, %v2391_v26  ;;  %v6250_v52 = vcombine.high %v2377_v40, %v2391_v26  ;;  %v2408_v1 = vrot.slane %v2394_v33, %v7056_v48  ;;  %v2409_v25 = vcombine.high %v2401_v30, %v2401_v30 }
 0x86e   :  { %v2416_v57 = vrot.slane %v2401_v30, %v7056_v48 }
 0x86f   :  { %v2430_v37 = vrot.slane %v2409_v25, %v7056_v48  ;;  %v2443_v31 = vrot.slane %v2433_v61, %v7056_v48  ;;  %v2450_v4 = vrot.slane %v6250_v52, %v7056_v48  ;;  %v2423_v63 = vrot.slane %v2408_v1, %v7056_v48 }
 0x870   :  { %v2431_v49 = vcombine.high %v2416_v57, %v2416_v57  ;;  %v2435_v58 = vcombine.low %v2384_v0, %v2416_v57  ;;  %v2691_v61 = vcombine.high %v2681_v29, %v2681_v29 }
 0x871   :  { %v2432_v50 = vcombine.high %v2430_v37, %v2430_v37  ;;  %v2465_v7 = vcombine.low %v2443_v31, %v2450_v4 }
 0x872   :  { %v2436_v51 = vcombine.low %v2430_v37, %v2431_v49  ;;  %v2457_v54 = vrot.slane %v2435_v58, %v7056_v48  ;;  %v2692_v58 = vcombine.high %v2688_v55, %v2688_v55 }
 0x873   :  { %v2482_v42 = vcombine.low %v2432_v50, %v2423_v63  ;;  %v2473_v2 = vrot.slane %v2465_v7, %v7056_v48 }
 0x874   :  { %v2464_v23 = vrot.slane %v2436_v51, %v7056_v48 }
 0x875   :  { %v2489_v34 = vrot.slane %v2482_v42, %v7056_v48  ;;  %v8360_v42 = vld [vmem:[#allocation40_spill] sm:$0xff] }
 0x876   :  { %v2466_v38 = vcombine.low %v2457_v54, %v2464_v23 }
 0x877   :  { %v2496_v35 = vrot.slane %v2489_v34, %v7056_v48  ;;  %v8361_v34 = vld [vmem:[#allocation42_spill] sm:$0xff] }
 0x878   :  { %v2480_v22 = vrot.slane %v2466_v38, %v7056_v48 }
 0x87a   :  { %v2481_v3 = vcombine.low %v2473_v2, %v2480_v22  ;;  %v8362_v22 = vld [vmem:[#allocation41_spill] sm:$0xff] }
 0x87c   :  { %v2499_v47 = vpack.c.bf16 %v2496_v35, %v2481_v3 }
 0x87e   :  { %6422 = vmatmul.mubr.msk.bf16.vlgmr.msra.gmra.mrb[16].mxu1 %vm564_vm1, %v2499_v47 }
 0x87f   :  { %6449 = vmatprep.mubr.msk.bf16.mxu1 %vm6794_vm3, %v8356_v36 }
 0x951   :  { %v2539_v45 = vpop.f32.mrb[16].mxu1 }
 0x952   :  { %v2548_v24 = vcombine.high %v2539_v45, %v2539_v45  ;;  %v2555_v18 = vrot.slane %v2539_v45, %v7056_v48  ;;  %v6423_v20 = vpop.f32.mrb[17].mxu1 }
 0x953   :  { %v2542_v44 = vpop.f32.mrb[18].mxu1 }
 0x954   :  { %v2562_v11 = vrot.slane %v2548_v24, %v7056_v48  ;;  %v2563_v21 = vcombine.high %v2555_v18, %v2555_v18  ;;  %v2571_v43 = vrot.slane %v2555_v18, %v7056_v48  ;;  %v2603_v5 = vrot.slane %v2542_v44, %v7056_v48  ;;  %v6424_v17 = vpop.f32.mrb[19].mxu1 }
 0x956   :  { %v2564_v40 = vcombine.high %v2562_v11, %v2562_v11  ;;  %v2578_v26 = vrot.slane %v2562_v11, %v7056_v48  ;;  %v2585_v33 = vrot.slane %v2563_v21, %v7056_v48  ;;  %v2593_v30 = vcombine.high %v2571_v43, %v2571_v43 }
 0x957   :  { %v2629_v41 = vadd.f32 %v2571_v43, %v7201_v13  ;;  %v2604_v52 = vcombine.high %v2603_v5, %v2603_v5  ;;  %v2611_v1 = vrot.slane %v2603_v5, %v7056_v48 }
 0x958   :  { %v2592_v25 = vrot.slane %v2564_v40, %v7056_v48  ;;  %v2594_v0 = vcombine.high %v2578_v26, %v2578_v26  ;;  %v2595_v57 = vcombine.high %v2585_v33, %v2585_v33  ;;  %v2630_v37 = vadd.f32 %v2585_v33, %v7203_v10 }
 0x959   :  { %v2631_v31 = vadd.f32 %v2593_v30, %v7205_v15  ;;  %v2633_v4 = vadd.f32 %v2578_v26, %v7209_v16  ;;  %v2618_v49 = vrot.slane %v2604_v52, %v7056_v48  ;;  %v7635_v54 = vadd.f32 %v2667_v9, %v2629_v41  ;;  %v8364_v52 = vld [vmem:[#allocation33_spill] sm:$0xff] }
 0x95a   :  { %v2596_v63 = vcombine.high %v2592_v25, %v2592_v25  ;;  %v2632_v50 = vadd.f32 %v2595_v57, %v7207_v14  ;;  %v2634_v51 = vadd.f32 %v2592_v25, %v7211_v28  ;;  %v2635_v7 = vadd.f32 %v2594_v0, %v8360_v42 }
 0x95b   :  { %v2702_v23 = vadd.f32 %v2681_v29, %v2630_v37  ;;  %v2703_v38 = vadd.f32 %v2689_v56, %v2631_v31  ;;  %v2637_v2 = vadd.f32 %v2611_v1, %v8361_v34  ;;  %v2705_v47 = vadd.f32 %v2674_v19, %v2633_v4 }
 0x95c   :  { %v2636_v3 = vadd.f32 %v2596_v63, %v8362_v22  ;;  %v2704_v35 = vadd.f32 %v2691_v61, %v2632_v50  ;;  %v7639_v6 = vadd.f32 %v2688_v55, %v2634_v51  ;;  %v2638_v32 = vadd.f32 %v2618_v49, %v8363_v8  ;;  %v8365_v49 = vld [vmem:[#allocation34_spill] sm:$0xff]  ;;  %v8366_v63 = vld [vmem:[#allocation35_spill] sm:$0xff] }
 0x95d   :  { %v2721_v12 = vcombine.low %v7635_v54, %v2702_v23  ;;  %v2707_v59 = vadd.f32 %v2690_v39, %v2635_v7  ;;  %v2709_v18 = vadd.f32 %v2667_v9, %v2637_v2  ;;  %v8367_v2 = vld [vmem:[#allocation36_spill] sm:$0xff] }
 0x95e   :  { %v2708_v45 = vadd.f32 %v2692_v58, %v2636_v3  ;;  %v2722_v60 = vcombine.low %v2703_v38, %v2704_v35  ;;  %v2723_v24 = vcombine.low %v2705_v47, %v7639_v6  ;;  %v2710_v20 = vadd.f32 %v2681_v29, %v2638_v32  ;;  %v8368_v32 = vld [vmem:[#allocation37_spill] sm:$0xff] }
 0x95f   :  { %v2731_v11 = vrot.slane %v2721_v12, %v7056_v48 }
 0x960   :  { %v2724_v44 = vcombine.low %v2707_v59, %v2708_v45  ;;  %v2738_v21 = vrot.slane %v2722_v60, %v7056_v48  ;;  %v2770_v43 = vcombine.low %v2709_v18, %v2710_v20  ;;  %v2745_v19 = vrot.slane %v2723_v24, %v7056_v48  ;;  %v8369_v60 = vld [vmem:[#allocation38_spill] sm:$0xff] }
 0x962   :  { %v2752_v5 = vrot.slane %v2724_v44, %v7056_v48  ;;  %v2753_v17 = vcombine.low %v2731_v11, %v2738_v21  ;;  %v2777_v55 = vrot.slane %v2770_v43, %v7056_v48 }
 0x964   :  { %v2754_v56 = vcombine.low %v2745_v19, %v2752_v5  ;;  %v2784_v39 = vrot.slane %v2777_v55, %v7056_v48  ;;  %v2761_v40 = vrot.slane %v2753_v17, %v7056_v48 }
 0x966   :  { %v2768_v9 = vrot.slane %v2754_v56, %v7056_v48  ;;  %v2790_v29 = vsel %vm568_vm2, %v2784_v39, 0.0 }
 0x967   :  { %2791 = vadd.xlane.f32.xlu0 %v2790_v29 }
 0x968   :  { %v2769_v26 = vcombine.low %v2761_v40, %v2768_v9 }
 0x96a   :  { %v2787_v33 = vsel %vm564_vm1, %v2769_v26, 0.0 }
 0x96b   :  { %2788 = vadd.xlane.f32.xlu1 %v2787_v33 }
 0x9f4   :  { %v2792_v30 = vpop.xlane.xlu0 %2791 }
 0x9f5   :  { %v2794_v41 = vmul.f32 0.03125, %v2792_v30 }
 0x9f7   :  { %v2832_v61 = vrot.slane %v2794_v41, %v7084_v46  ;;  %v2836_v1 = vrot.slane %v2794_v41, %v8364_v52 }
 0x9f8   :  { %v2789_v25 = vpop.xlane.xlu1 %2788 }
 0x9f9   :  { %v2793_v0 = vmul.f32 0.03125, %v2789_v25  ;;  %v7656_v57 = vsub.f32 %v2709_v18, %v2832_v61  ;;  %v7658_v37 = vsub.f32 %v2710_v20, %v2836_v1  ;;  %v8370_v18 = vld [vmem:[#allocation39_spill] sm:$0xff] }
 0x9fb   :  { %v2800_v31 = vrot.slane %v2793_v0, %v7084_v46  ;;  %v2804_v4 = vrot.slane %v2793_v0, %v8364_v52  ;;  %v2808_v58 = vrot.slane %v2793_v0, %v8365_v49  ;;  %v2812_v50 = vrot.slane %v2793_v0, %v8366_v63 }
 0x9fc   :  { %v2865_v51 = vmul.f32 %v7656_v57, %v7656_v57  ;;  %v2866_v7 = vmul.f32 %v7658_v37, %v7658_v37  ;;  %v2816_v3 = vrot.slane %v2793_v0, %v8367_v2  ;;  %v2820_v12 = vrot.slane %v2793_v0, %v8368_v32 }
 0x9fd   :  { %v2824_v24 = vrot.slane %v2793_v0, %v8369_v60  ;;  %v2828_v20 = vrot.slane %v2793_v0, %v8370_v18  ;;  %v7673_v44 = vsub.f32 %v7635_v54, %v2800_v31  ;;  %v7675_v11 = vsub.f32 %v2702_v23, %v2804_v4 }
 0x9fe   :  { %v2926_v21 = vcombine.low %v2865_v51, %v2866_v7  ;;  %v7677_v43 = vsub.f32 %v2703_v38, %v2808_v58  ;;  %v7679_v19 = vsub.f32 %v2704_v35, %v2812_v50  ;;  %v7681_v5 = vsub.f32 %v2705_v47, %v2816_v3 }
 0x9ff   :  { %v7684_v17 = vsub.f32 %v7639_v6, %v2820_v12  ;;  %v7686_v55 = vsub.f32 %v2707_v59, %v2824_v24  ;;  %v7688_v56 = vsub.f32 %v2708_v45, %v2828_v20  ;;  %v2857_v39 = vmul.f32 %v7673_v44, %v7673_v44  ;;  %v216_v12 = vld [vmem:[%s6935_s14] sm:$0xff]  ;;  %v217_v24 = vld [vmem:[%s6935_s14 + $0x8] sm:$0xff]  ;;  %v218_v20 = vld [vmem:[%s6935_s14 + $0x10] sm:$0xff] }
 0xa00   :  { %v2933_v23 = vrot.slane %v2926_v21, %v7056_v48  ;;  %v2858_v38 = vmul.f32 %v7675_v11, %v7675_v11  ;;  %v2859_v35 = vmul.f32 %v7677_v43, %v7677_v43  ;;  %v2860_v47 = vmul.f32 %v7679_v19, %v7679_v19 }
 0xa01   :  { %v2861_v59 = vmul.f32 %v7681_v5, %v7681_v5  ;;  %v2862_v45 = vmul.f32 %v7684_v17, %v7684_v17  ;;  %v2863_v40 = vmul.f32 %v7686_v55, %v7686_v55  ;;  %v2864_v9 = vmul.f32 %v7688_v56, %v7688_v56 }
 0xa02   :  { %v2940_v29 = vrot.slane %v2933_v23, %v7056_v48  ;;  %v2877_v26 = vcombine.low %v2857_v39, %v2858_v38  ;;  %v2878_v33 = vcombine.low %v2859_v35, %v2860_v47  ;;  %v3238_v21 = vpack.c.bf16 %v217_v24, %v216_v12  ;;  %v219_v39 = vld [vmem:[%s6935_s14 + $0x18] sm:$0xff]  ;;  %s8375_s14 = sld [smem:[#allocation21_spill]] }
 0xa03   :  { %v2879_v30 = vcombine.low %v2861_v59, %v2862_v45  ;;  %v2880_v41 = vcombine.low %v2863_v40, %v2864_v9  ;;  %v3239_v23 = vpack.c.bf16 %v219_v39, %v218_v20  ;;  %v6253_v59 = vld [vmem:[%s8371_s17] ss:$0 sm:$0xff] }
 0xa04   :  { %v2946_v61 = vsel %vm568_vm2, %v2940_v29, 0.0  ;;  %v2887_v1 = vrot.slane %v2877_v26, %v7056_v48  ;;  %v2894_v25 = vrot.slane %v2878_v33, %v7056_v48  ;;  %6426 = vmatpush3.bf16.msra.mxu0 %v3238_v21  ;;  %v6254_v45 = vld [vmem:[%s8372_s21] ss:$0 sm:$0xff]  ;;  %v3022_v40 = vcombine.high %v6253_v59, %v6253_v59 }
 0xa05   :  { %2947 = vadd.xlane.f32.xlu1 %v2946_v61  ;;  %v2901_v0 = vrot.slane %v2879_v30, %v7056_v48  ;;  %v2908_v31 = vrot.slane %v2880_v41, %v7056_v48  ;;  %6427 = vmatprep.subr.bf16.mxu0 %v8356_v36  ;;  %v3029_v9 = vrot.slane %v6253_v59, %v7056_v48 }
 0xa06   :  { %v2909_v4 = vcombine.low %v2887_v1, %v2894_v25  ;;  %v3094_v29 = vcombine.high %v6254_v45, %v6254_v45  ;;  %v3036_v30 = vrot.slane %v3022_v40, %v7056_v48  ;;  %v3101_v41 = vrot.slane %v6254_v45, %v7056_v48 }
 0xa07   :  { %v2910_v58 = vcombine.low %v2901_v0, %v2908_v31  ;;  %v3037_v61 = vcombine.high %v3029_v9, %v3029_v9 }
 0xa08   :  { %v2917_v50 = vrot.slane %v2909_v4, %v7056_v48  ;;  %6428 = vmatpush3.bf16.msra.mxu0 %v3239_v23  ;;  %v3108_v25 = vrot.slane %v3094_v29, %v7056_v48  ;;  %v3038_v31 = vcombine.high %v3036_v30, %v3036_v30  ;;  %v3045_v4 = vrot.slane %v3029_v9, %v7056_v48 }
 0xa09   :  { %v2924_v51 = vrot.slane %v2910_v58, %v7056_v48  ;;  %6453 = vmatprep.subr.bf16.mxu0 %v8356_v36  ;;  %v3109_v58 = vcombine.high %v3101_v41, %v3101_v41  ;;  %v3117_v20 = vrot.slane %v3101_v41, %v7056_v48  ;;  %v3052_v39 = vrot.slane %v3036_v30, %v7056_v48 }
 0xa0a   :  { %v3066_v23 = vrot.slane %v3038_v31, %v7056_v48  ;;  %v3067_v45 = vcombine.high %v3045_v4, %v3045_v4 }
 0xa0b   :  { %v2925_v7 = vcombine.low %v2917_v50, %v2924_v51  ;;  %v3059_v50 = vrot.slane %v3037_v61, %v7056_v48  ;;  %v3131_v21 = vrot.slane %v3109_v58, %v7056_v48  ;;  %v3068_v9 = vcombine.high %v3052_v39, %v3052_v39 }
 0xa0c   :  { %v3139_v29 = vcombine.high %v3117_v20, %v3117_v20 }
 0xa0d   :  { %v2943_v3 = vsel %vm564_vm1, %v2925_v7, 0.0  ;;  %v3069_v40 = vcombine.high %v3059_v50, %v3059_v50 }
 0xa0e   :  { %2944 = vadd.xlane.f32.xlu0 %v2943_v3  ;;  %v3110_v3 = vcombine.high %v3108_v25, %v3108_v25 }
 0xa10   :  { %v3138_v59 = vrot.slane %v3110_v3, %v7056_v48 }
 0xa92   :  { %v2948_v38 = vpop.xlane.xlu1 %2947 }
 0xa93   :  { %v2950_v35 = vmul.f32 0.03125, %v2948_v38 }
 0xa95   :  { %v2952_v47 = vadd.f32 1e-05, %v2950_v35 }
 0xa97   :  { %6637 = vrsqrt.f32 %v2952_v47  ;;  %v3124_v47 = vrot.slane %v3108_v25, %v7056_v48 }
 0xa99   :  { %v3140_v61 = vcombine.high %v3124_v47, %v3124_v47 }
 0xa9b   :  { %v2945_v26 = vpop.xlane.xlu0 %2944 }
 0xa9c   :  { %v2949_v33 = vmul.f32 0.03125, %v2945_v26 }
 0xa9e   :  { %v2951_v1 = vadd.f32 1e-05, %v2949_v33 }
 0xaa0   :  { %6639 = vrsqrt.f32 %v2951_v1  ;;  %v3142_v1 = vcombine.high %v3138_v59, %v3138_v59 }
 0xaa1   :  { %v6638_v0 = vpop.eup %6637 }
 0xaa2   :  { %v2992_v51 = vrot.slane %v6638_v0, %v7084_v46  ;;  %v2996_v7 = vrot.slane %v6638_v0, %v8364_v52 }
 0xaa4   :  { %v3015_v12 = vmul.f32 %v2992_v51, %v7656_v57  ;;  %v3016_v24 = vmul.f32 %v2996_v7, %v7658_v37  ;;  %v3070_v57 = vcombine.high %v3066_v23, %v3066_v23  ;;  %v3141_v37 = vcombine.high %v3131_v21, %v3131_v21 }
 0xaa6   :  { %v3087_v38 = vmul.f32 %v3045_v4, %v3015_v12  ;;  %v3088_v35 = vmul.f32 %v3059_v50, %v3016_v24 }
 0xaa8   :  { %v3159_v33 = vadd.f32 %v3117_v20, %v3087_v38  ;;  %v3160_v41 = vadd.f32 %v3131_v21, %v3088_v35 }
 0xaaa   :  { %v6640_v26 = vpop.eup %6639 }
 0xaab   :  { %v2960_v30 = vrot.slane %v6640_v26, %v7084_v46  ;;  %v2964_v0 = vrot.slane %v6640_v26, %v8364_v52  ;;  %v2968_v31 = vrot.slane %v6640_v26, %v8365_v49  ;;  %v2972_v25 = vrot.slane %v6640_v26, %v8366_v63 }
 0xaac   :  { %v2976_v58 = vrot.slane %v6640_v26, %v8367_v2  ;;  %v2980_v51 = vrot.slane %v6640_v26, %v8368_v32  ;;  %v2984_v7 = vrot.slane %v6640_v26, %v8369_v60  ;;  %v2988_v3 = vrot.slane %v6640_v26, %v8370_v18 }
 0xaad   :  { %v3007_v12 = vmul.f32 %v2960_v30, %v7673_v44  ;;  %v3008_v24 = vmul.f32 %v2964_v0, %v7675_v11  ;;  %v3009_v38 = vmul.f32 %v2968_v31, %v7677_v43  ;;  %v3010_v35 = vmul.f32 %v2972_v25, %v7679_v19 }
 0xaae   :  { %v3011_v49 = vmul.f32 %v2976_v58, %v7681_v5  ;;  %v3012_v63 = vmul.f32 %v2980_v51, %v7684_v17  ;;  %v3013_v2 = vmul.f32 %v2984_v7, %v7686_v55  ;;  %v3014_v32 = vmul.f32 %v2988_v3, %v7688_v56  ;;  %v226_v7 = vld [vmem:[%s8374_s29 + $0x28] sm:$0xff] }
 0xaaf   :  { %v3079_v52 = vmul.f32 %v3045_v4, %v3007_v12  ;;  %v3080_v60 = vmul.f32 %v3059_v50, %v3008_v24  ;;  %v3081_v46 = vmul.f32 %v3067_v45, %v3009_v38  ;;  %v3082_v26 = vmul.f32 %v3069_v40, %v3010_v35  ;;  %v227_v12 = vld [vmem:[%s8374_s29 + $0x30] sm:$0xff]  ;;  %v228_v24 = vld [vmem:[%s8374_s29 + $0x38] sm:$0xff]  ;;  %v229_v35 = vld [vmem:[%s8374_s29 + $0x40] sm:$0xff] }
 0xab0   :  { %v3083_v18 = vmul.f32 %v3052_v39, %v3011_v49  ;;  %v3084_v44 = vmul.f32 %v3066_v23, %v3012_v63  ;;  %v3085_v30 = vmul.f32 %v3068_v9, %v3013_v2  ;;  %v3086_v11 = vmul.f32 %v3070_v57, %v3014_v32  ;;  %v169_v39 = vld [vmem:[%s8373_s25 + $0x8] sm:$0xff]  ;;  %v170_v9 = vld [vmem:[%s8373_s25 + $0x10] sm:$0xff]  ;;  %v171_v57 = vld [vmem:[%s8373_s25 + $0x18] sm:$0xff] }
 0xab1   :  { %v3151_v0 = vadd.f32 %v3117_v20, %v3079_v52  ;;  %v3152_v43 = vadd.f32 %v3131_v21, %v3080_v60  ;;  %v3153_v31 = vadd.f32 %v3139_v29, %v3081_v46  ;;  %v3154_v19 = vadd.f32 %v3141_v37, %v3082_v26  ;;  %v168_v21 = vld [vmem:[%s8373_s25] sm:$0xff]  ;;  %v230_v26 = vld [vmem:[%s8374_s29 + $0x48] sm:$0xff] }
 0xab2   :  { %v3155_v25 = vadd.f32 %v3124_v47, %v3083_v18  ;;  %v3156_v5 = vadd.f32 %v3138_v59, %v3084_v44  ;;  %v3157_v58 = vadd.f32 %v3140_v61, %v3085_v30  ;;  %v3158_v17 = vadd.f32 %v3142_v1, %v3086_v11  ;;  %v221_v37 = vld [vmem:[%s8374_s29] sm:$0xff]  ;;  %v223_v61 = vld [vmem:[%s8374_s29 + $0x10] sm:$0xff]  ;;  %v224_v1 = vld [vmem:[%s8374_s29 + $0x18] sm:$0xff] }
 0xab3   :  { %v3171_v55 = vcombine.low %v3151_v0, %v3152_v43  ;;  %v3172_v56 = vcombine.low %v3153_v31, %v3154_v19  ;;  %v3220_v45 = vcombine.low %v3159_v33, %v3160_v41  ;;  %v3652_v59 = vpack.c.bf16 %v169_v39, %v168_v21  ;;  %v222_v33 = vld [vmem:[%s8374_s29 + $0x8] sm:$0xff]  ;;  %v231_v30 = vld [vmem:[%s8374_s29 + $0x50] sm:$0xff]  ;;  %v232_v11 = vld [vmem:[%s8374_s29 + $0x58] sm:$0xff] }
 0xab4   :  { %v3173_v4 = vcombine.low %v3155_v25, %v3156_v5  ;;  %v3174_v50 = vcombine.low %v3157_v58, %v3158_v17  ;;  %v3653_v29 = vpack.c.bf16 %v171_v57, %v170_v9  ;;  %v3309_v41 = vpack.c.bf16 %v222_v33, %v221_v37  ;;  %v233_v43 = vld [vmem:[%s8374_s29 + $0x60] sm:$0xff]  ;;  %v234_v31 = vld [vmem:[%s8374_s29 + $0x68] sm:$0xff]  ;;  %v235_v25 = vld [vmem:[%s8374_s29 + $0x70] sm:$0xff] }
 0xab5   :  { %v3181_v49 = vrot.slane %v3171_v55, %v7056_v48  ;;  %v3188_v52 = vrot.slane %v3172_v56, %v7056_v48  ;;  %v3227_v60 = vrot.slane %v3220_v45, %v7056_v48  ;;  %v3310_v51 = vpack.c.bf16 %v224_v1, %v223_v61  ;;  %v236_v5 = vld [vmem:[%s8374_s29 + $0x78] sm:$0xff]  ;;  %v6255_v17 = vld [vmem:[%s8375_s14] ss:$0 sm:$0xff] }
 0xab6   :  { %v3195_v46 = vrot.slane %v3173_v4, %v7056_v48  ;;  %v3202_v63 = vrot.slane %v3174_v50, %v7056_v48  ;;  %6434 = vmatpush3.bf16.msra.mxu1 %v3309_v41  ;;  %v3312_v38 = vpack.c.bf16 %v228_v24, %v227_v12  ;;  %v3313_v44 = vpack.c.bf16 %v230_v26, %v229_v35 }
 0xab7   :  { %v3203_v2 = vcombine.low %v3181_v49, %v3188_v52  ;;  %v3234_v47 = vrot.slane %v3227_v60, %v7056_v48  ;;  %6435 = vmatprep.subr.bf16.mxu1 %v8356_v36  ;;  %v3314_v0 = vpack.c.bf16 %v232_v11, %v231_v30  ;;  %v3315_v19 = vpack.c.bf16 %v234_v31, %v233_v43 }
 0xab8   :  { %v3204_v32 = vcombine.low %v3195_v46, %v3202_v63  ;;  %v3316_v58 = vpack.c.bf16 %v236_v5, %v235_v25 }
 0xab9   :  { %v3211_v18 = vrot.slane %v3203_v2, %v7056_v48  ;;  %v6260_v2 = vld [vmem:[%s8376_s24] ss:$0 sm:$0xff] }
 0xaba   :  { %v3218_v20 = vrot.slane %v3204_v32, %v7056_v48  ;;  %6436 = vmatpush3.bf16.msra.mxu1 %v3310_v51 }
 0xabb   :  { %6437 = vmatprep.subr.bf16.mxu1 %v8356_v36 }
 0xabc   :  { %v3219_v23 = vcombine.low %v3211_v18, %v3218_v20 }
 0xabe   :  { %v3237_v40 = vpack.c.bf16 %v3234_v47, %v3219_v23 }
 0xac0   :  { %6430 = vmatmul.mubr.msk.bf16.vlgmr.msra.gmra.mrb[4].mxu0 %vm564_vm1, %v3237_v40 }
 0xac1   :  { %6454 = vmatpush3.bf16.msra.mxu0 %v3652_v59  ;;  %6457 = vmatprep.mubr.msk.bf16.mxu0 %vm6794_vm3, %v8356_v36 }
 0xac2   :  { %6455 = vmatprep.subr.bf16.mxu0 %v8356_v36 }
 0xac5   :  { %6456 = vmatpush3.bf16.msra.mxu0 %v3653_v29 }
 0xac6   :  { %6461 = vmatprep.subr.mxu0 %v8356_v36 }
 0xac8   :  { %6458 = vmatmul.mubr.msk.bf16.vlgmr.msra.gmra.mrb[8].mxu0 %vm564_vm1, %v7475_v62  ;;  %v225_v62 = vld [vmem:[%s8374_s29 + $0x20] sm:$0xff] }
 0xac9   :  { %6463 = vmatprep.mubr.msk.f32.mxu0 %vm6794_vm3, %v8356_v36  ;;  %v3311_v3 = vpack.c.bf16 %v226_v7, %v225_v62 }
 0xacb   :  { %6438 = vmatpush3.bf16.msra.mxu1 %v3311_v3 }
 0xacc   :  { %6439 = vmatprep.subr.bf16.mxu1 %v8356_v36 }
 0xacf   :  { %6440 = vmatpush3.bf16.msra.mxu1 %v3312_v38 }
 0xad0   :  { %6441 = vmatprep.subr.bf16.mxu1 %v8356_v36 }
 0xad3   :  { %6442 = vmatpush3.bf16.msra.mxu1 %v3313_v44 }
 0xad4   :  { %6443 = vmatprep.subr.bf16.mxu1 %v8356_v36 }
 0xad7   :  { %6444 = vmatpush3.bf16.msra.mxu1 %v3314_v0 }
 0xad8   :  { %6445 = vmatprep.subr.bf16.mxu1 %v8356_v36 }
 0xadb   :  { %6446 = vmatpush3.bf16.msra.mxu1 %v3315_v19 }
 0xadc   :  { %6447 = vmatprep.subr.bf16.mxu1 %v8356_v36 }
 0xadf   :  { %6448 = vmatpush3.bf16.msra.mxu1 %v3316_v58 }
 0xae0   :  { %6501 = vmatprep.subr.bf16.mxu1 %v8356_v36 }
 0xb93   :  { %v3283_v55 = vpop.f32.mrb[4].mxu0 }
 0xb94   :  { %v7802_v56 = vadd.f32 %v6255_v17, %v3283_v55  ;;  %v6431_v4 = vpop.f32.mrb[5].mxu0 }
 0xb95   :  { %v3286_v50 = vpop.f32.mrb[6].mxu0 }
 0xb96   :  { %v3290_v45 = vmul.f32 %v7802_v56, %v7802_v56  ;;  %v3287_v49 = vadd.f32 %v6255_v17, %v3286_v50  ;;  %v6432_v52 = vpop.f32.mrb[7].mxu0 }
 0xb98   :  { %v3292_v46 = vmul.f32 %v3290_v45, %v7802_v56  ;;  %v3291_v63 = vmul.f32 %v3287_v49, %v3287_v49 }
 0xb9a   :  { %v3294_v32 = vmul.f32 0.044715, %v3292_v46  ;;  %v3293_v60 = vmul.f32 %v3291_v63, %v3287_v49 }
 0xb9b   :  { %v3697_v18 = vpop.f32.mrb[8].mxu0 }
 0xb9c   :  { %v3296_v20 = vadd.f32 %v3294_v32, %v7802_v56  ;;  %v3295_v21 = vmul.f32 0.044715, %v3293_v60  ;;  %v3698_v39 = vadd.f32 %v6260_v2, %v3697_v18  ;;  %v6459_v23 = vpop.f32.mrb[9].mxu0 }
 0xb9d   :  { %v3700_v47 = vpop.f32.mrb[10].mxu0 }
 0xb9e   :  { %v3298_v59 = vmul.f32 0.7978846, %v3296_v20  ;;  %v3297_v40 = vadd.f32 %v3295_v21, %v3287_v49  ;;  %v3706_v9 = vcombine.high %v3698_v39, %v3698_v39  ;;  %v3713_v57 = vrot.slane %v3698_v39, %v7056_v48  ;;  %v6460_v29 = vpop.f32.mrb[11].mxu0 }
 0xb9f   :  { %v3701_v37 = vadd.f32 %v6260_v2, %v3700_v47 }
 0xba0   :  { %6641 = vtanh.f32 %v3298_v59  ;;  %v3299_v33 = vmul.f32 0.7978846, %v3297_v40  ;;  %v3720_v41 = vrot.slane %v3706_v9, %v7056_v48  ;;  %v3721_v61 = vcombine.high %v3713_v57, %v3713_v57 }
 0xba1   :  { %v3729_v1 = vrot.slane %v3713_v57, %v7056_v48  ;;  %v3761_v51 = vrot.slane %v3701_v37, %v7056_v48 }
 0xba2   :  { %6643 = vtanh.f32 %v3299_v33  ;;  %v3722_v62 = vcombine.high %v3720_v41, %v3720_v41  ;;  %v3736_v7 = vrot.slane %v3720_v41, %v7056_v48  ;;  %v3743_v3 = vrot.slane %v3721_v61, %v7056_v48 }
 0xba3   :  { %v3762_v12 = vcombine.high %v3761_v51, %v3761_v51  ;;  %v3769_v30 = vrot.slane %v3761_v51, %v7056_v48 }
 0xba4   :  { %v3750_v24 = vrot.slane %v3722_v62, %v7056_v48  ;;  %v3752_v38 = vcombine.high %v3736_v7, %v3736_v7  ;;  %v3777_v35 = vcombine.low %v3729_v1, %v3743_v3  ;;  %v6262_v26 = vcombine.high %v3729_v1, %v3743_v3 }
 0xba5   :  { %v3799_v44 = vrot.slane %v3736_v7, %v7056_v48  ;;  %v3776_v11 = vrot.slane %v3762_v12, %v7056_v48 }
 0xba6   :  { %v3785_v0 = vrot.slane %v3777_v35, %v7056_v48  ;;  %v3792_v43 = vrot.slane %v6262_v26, %v7056_v48  ;;  %v3892_v31 = vcombine.low %v3750_v24, %v3752_v38  ;;  %v3754_v19 = vcombine.high %v3750_v24, %v3750_v24 }
 0xba7   :  { %v3814_v58 = vrot.slane %v3799_v44, %v7056_v48  ;;  %v3914_v45 = vrot.slane %v3776_v11, %v7056_v48 }
 0xba8   :  { %v3800_v25 = vcombine.low %v3785_v0, %v3792_v43  ;;  %v3893_v5 = vcombine.low %v3754_v19, %v3769_v30  ;;  %v3900_v4 = vrot.slane %v3892_v31, %v7056_v48 }
 0xba9   :  { %v3929_v20 = vrot.slane %v3914_v45, %v7056_v48 }
 0xbaa   :  { %v6642_v17 = vpop.eup %6641  ;;  %v3807_v55 = vrot.slane %v3800_v25, %v7056_v48  ;;  %v3907_v50 = vrot.slane %v3893_v5, %v7056_v48 }
 0xbab   :  { %v3302_v52 = vadd.f32 1.0, %v6642_v17 }
 0xbac   :  { %v6644_v46 = vpop.eup %6643  ;;  %v3915_v63 = vcombine.low %v3900_v4, %v3907_v50  ;;  %v7826_v2 = vcombine.low %v3807_v55, %v3814_v58 }
 0xbad   :  { %v3304_v32 = vmul.f32 0.5, %v3302_v52  ;;  %v3303_v60 = vadd.f32 1.0, %v6644_v46 }
 0xbae   :  { %v3922_v18 = vrot.slane %v3915_v63, %v7056_v48  ;;  %3816 = vrot.lane.b32.xlu0 %v7826_v2, %s6795_s0 }
 0xbaf   :  { %v3305_v21 = vmul.f32 0.5, %v3303_v60  ;;  %v3306_v23 = vmul.f32 %v3304_v32, %v7802_v56 }
 0xbb0   :  { %v7832_v39 = vcombine.low %v3922_v18, %v3929_v20 }
 0xbb1   :  { %v3307_v47 = vmul.f32 %v3305_v21, %v3287_v49 }
 0xbb2   :  { %4119 = vrot.lane.b32.xlu0 %v7832_v39, %s6796_s5  ;;  %3931 = vrot.lane.b32.xlu1 %v7832_v39, %s6795_s0 }
 0xbb3   :  { %v3308_v59 = vpack.c.bf16 %v3307_v47, %v3306_v23 }
 0xbb5   :  { %6450 = vmatmul.mubr.bf16.vlgmr.msra.gmra.mrb[20].mxu1 %v3308_v59 }
 0xbb6   :  { %4041 = vrot.lane.b32.xlu1 %v7826_v2, %s6796_s5  ;;  %6505 = vmatprep.mubr.msk.bf16.mxu1 %vm6794_vm3, %v8356_v36 }
 0xbba   :  { %4039 = vrot.lane.b32.xlu1 %v7826_v2, %s6797_s9 }
 0xbbe   :  { %4117 = vrot.lane.b32.xlu1 %v7832_v39, %s6797_s9 }
 0xc20   :  { %v3817_v56 = vpop.permute.xlu0 %3816 }
 0xc21   :  { %6462 = vmatpush3.xpose.msk.msra.mxu0 %vm1636_vm4, %v3817_v56 }
 0xc22   :  { %6466 = vmatprep.subr.mxu0 %v8356_v36 }
 0xc24   :  { %6464 = vmatmul.mubr.msk.f32.vlgmr.msra.gmra.mrb[12].mxu0 %vm1636_vm4, %v7826_v2  ;;  %v3932_v49 = vpop.permute.xlu1 %3931  ;;  %v4120_v57 = vpop.permute.xlu0 %4119 }
 0xc25   :  { %6467 = vmatpush3.xpose.msk.msra.mxu0 %vm1636_vm4, %v3932_v49  ;;  %6468 = vmatprep.mubr.msk.f32.mxu0 %vm6794_vm3, %v8356_v36 }
 0xc26   :  { %6471 = vmatprep.subr.mxu0 %v8356_v36 }
 0xc28   :  { %6469 = vmatmul.mubr.msk.f32.vlgmr.msra.gmra.mrb[14].mxu0 %vm1636_vm4, %v7832_v39  ;;  %v4042_v40 = vpop.permute.xlu1 %4041 }
 0xc29   :  { %6472 = vmatpush3.xpose.msk.msra.mxu0 %vm1636_vm4, %v4042_v40  ;;  %6473 = vmatprep.mubr.msk.f32.mxu0 %vm6794_vm3, %v8356_v36 }
 0xc2a   :  { %6476 = vmatprep.subr.mxu0 %v8356_v36 }
 0xc2c   :  { %v4040_v9 = vpop.permute.xlu1 %4039 }
 0xc2d   :  { %6474 = vmatmul.mubr.msk.f32.vlgmr.msra.gmra.mrb[16].mxu0 %vm1636_vm4, %v4040_v9 }
 0xc2e   :  { %6477 = vmatpush3.xpose.msk.msra.mxu0 %vm1636_vm4, %v4120_v57  ;;  %6478 = vmatprep.mubr.msk.f32.mxu0 %vm6794_vm3, %v8356_v36 }
 0xc2f   :  { %6481 = vmatprep.subr.mxu0 %v8356_v36 }
 0xc30   :  { %v4118_v29 = vpop.permute.xlu1 %4117 }
 0xc31   :  { %6479 = vmatmul.mubr.msk.f32.vlgmr.msra.gmra.mrb[18].mxu0 %vm1636_vm4, %v4118_v29 }
 0xc32   :  { %6483 = vmatprep.mubr.msk.f32.mxu0 %vm6794_vm3, %v8356_v36 }
 0xc88   :  { %v7869_v37 = vpop.f32.mrb[20].mxu1 }
 0xc89   :  { %v6451_v33 = vpop.f32.mrb[21].mxu1 }
 0xc8a   :  { %v3354_v41 = vpop.f32.mrb[22].mxu1 }
 0xc8b   :  { %v6452_v61 = vpop.f32.mrb[23].mxu1 }
 0xcf7   :  { %v3888_v1 = vpop.f32.mrb[12].mxu0 }
 0xcf8   :  { %v6465_v51 = vpop.f32.mrb[13].mxu0  ;;  %v4007_v38 = vmul.f32 0.25, %v3888_v1 }
 0xcfa   :  { %v4009_v0 = vsel %vm1828_vm5, %v4007_v38, -inf }
 0xcfb   :  { %v4003_v62 = vpop.f32.mrb[14].mxu0 }
 0xcfc   :  { %v6470_v7 = vpop.f32.mrb[15].mxu0  ;;  %v4008_v11 = vmul.f32 0.25, %v4003_v62 }
 0xcfe   :  { %v4012_v31 = vsel %vm1828_vm5, %v4008_v11, -inf }
 0xd00   :  { %v4113_v3 = vpop.f32.mrb[16].mxu0 }
 0xd01   :  { %v4195_v12 = vmul.f32 0.25, %v4113_v3  ;;  %v6475_v24 = vpop.f32.mrb[17].mxu0 }
 0xd02   :  { %v173_v24 = vld [vmem:[%s8377_s30] sm:$0xff] }
 0xd03   :  { %v4197_v35 = vsel %vm1828_vm5, %v4195_v12, -inf }
 0xd04   :  { %4198 = vmax.xlane.f32.xlu0 %v4197_v35  ;;  %v4191_v26 = vpop.f32.mrb[18].mxu0  ;;  %v175_v35 = vld [vmem:[%s8377_s30 + $0x10] sm:$0xff] }
 0xd05   :  { %v4196_v44 = vmul.f32 0.25, %v4191_v26  ;;  %v6480_v30 = vpop.f32.mrb[19].mxu0  ;;  %v176_v26 = vld [vmem:[%s8377_s30 + $0x18] sm:$0xff] }
 0xd07   :  { %v4200_v43 = vsel %vm1828_vm5, %v4196_v44, -inf }
 0xd08   :  { %4010 = vmax.xlane.f32.xlu0 %v4009_v0  ;;  %4201 = vmax.xlane.f32.xlu1 %v4200_v43 }
 0xd0c   :  { %4013 = vmax.xlane.f32.xlu0 %v4012_v31 }
 0xd91   :  { %v4199_v19 = vpop.xlane.xlu0 %4198 }
 0xd92   :  { %v4203_v25 = vsub.f32 %v4195_v12, %v4199_v19 }
 0xd94   :  { %v4205_v55 = vmul.f32 1.442695, %v4203_v25 }
 0xd95   :  { %v4011_v5 = vpop.xlane.xlu0 %4010  ;;  %v4202_v58 = vpop.xlane.xlu1 %4201 }
 0xd96   :  { %v4015_v17 = vsub.f32 %v4007_v38, %v4011_v5  ;;  %v4204_v50 = vsub.f32 %v4196_v44, %v4202_v58  ;;  %v174_v38 = vld [vmem:[%s8377_s30 + $0x8] sm:$0xff]  ;;  %v4673_v44 = vpack.c.bf16 %v176_v26, %v175_v35 }
 0xd97   :  { %v4672_v53 = vpack.c.bf16 %v174_v38, %v173_v24 }
 0xd98   :  { %v4017_v4 = vmul.f32 1.442695, %v4015_v17  ;;  %v4207_v46 = vmul.f32 1.442695, %v4204_v50 }
 0xd99   :  { %v4014_v45 = vpop.xlane.xlu0 %4013  ;;  %6502 = vmatpush3.bf16.msra.mxu1 %v4672_v53 }
 0xd9a   :  { %6645 = vpow2.f32 %v4017_v4  ;;  %v4016_v52 = vsub.f32 %v4008_v11, %v4014_v45  ;;  %6503 = vmatprep.subr.bf16.mxu1 %v8356_v36 }
 0xd9b   :  { %6647 = vpow2.f32 %v4205_v55 }
 0xd9c   :  { %v4019_v63 = vmul.f32 1.442695, %v4016_v52 }
 0xd9d   :  { %6504 = vmatpush3.bf16.msra.mxu1 %v4673_v44 }
 0xd9e   :  { %6649 = vpow2.f32 %v4019_v63  ;;  %6509 = vmatprep.subr.bf16.mxu1 %v8356_v36 }
 0xd9f   :  { %6651 = vpow2.f32 %v4207_v46 }
 0xda4   :  { %v6646_v32 = vpop.eup %6645 }
 0xda5   :  { %v4021_v60 = vsel %vm1828_vm5, %v6646_v32, 0.0  ;;  %v6648_v18 = vpop.eup %6647 }
 0xda6   :  { %4022 = vadd.xlane.f32.xlu0 %v4021_v60  ;;  %v4209_v21 = vsel %vm1828_vm5, %v6648_v18, 0.0 }
 0xda8   :  { %v6650_v20 = vpop.eup %6649 }
 0xda9   :  { %v4024_v23 = vsel %vm1828_vm5, %v6650_v20, 0.0  ;;  %v6652_v47 = vpop.eup %6651 }
 0xdaa   :  { %4210 = vadd.xlane.f32.xlu0 %v4209_v21  ;;  %4025 = vadd.xlane.f32.xlu1 %v4024_v23  ;;  %v4212_v59 = vsel %vm1828_vm5, %v6652_v47, 0.0 }
 0xdae   :  { %4213 = vadd.xlane.f32.xlu1 %v4212_v59 }
 0xdbf   :  { %4033 = vrot.lane.b32.xlu1 %v7832_v39, %s6798_s13 }
 0xdc0   :  { %4031 = vrot.lane.b32.xlu0 %v7826_v2, %s6798_s13 }
 0xe33   :  { %v4023_v56 = vpop.xlane.xlu0 %4022 }
 0xe37   :  { %v4211_v49 = vpop.xlane.xlu0 %4210  ;;  %v4026_v40 = vpop.xlane.xlu1 %4025 }
 0xe38   :  { %6653 = vrcp.f32 %v4211_v49 }
 0xe3b   :  { %v4032_v9 = vpop.permute.xlu0 %4031  ;;  %v4214_v57 = vpop.xlane.xlu1 %4213 }
 0xe3c   :  { %v4219_v29 = vsel %vm7552_vm8, %v4032_v9, 0.0  ;;  %6655 = vrcp.f32 %v4214_v57  ;;  %v4037_v62 = vsel %vm1852_vm11, %v4032_v9, 0.0 }
 0xe3d   :  { %6482 = vmatpush3.msk.msra.mxu0 %vm2051_vm9, %v4219_v29  ;;  %6657 = vrcp.f32 %v4023_v56 }
 0xe3e   :  { %6486 = vmatprep.subr.mxu0 %v8356_v36  ;;  %6659 = vrcp.f32 %v4026_v40 }
 0xe3f   :  { %v4034_v39 = vpop.permute.xlu1 %4033 }
 0xe40   :  { %v4220_v2 = vsel %vm7552_vm8, %v4034_v39, 0.0  ;;  %v4038_v3 = vsel %vm1852_vm11, %v4034_v39, 0.0 }
 0xe42   :  { %v6654_v33 = vpop.eup %6653 }
 0xe43   :  { %v4216_v41 = vmul.f32 %v6654_v33, %v6648_v18 }
 0xe45   :  { %6484 = vmatmul.mubr.msk.f32.vlgmr.msra.gmra.mrb[20].mxu0 %vm2047_vm10, %v4216_v41 }
 0xe46   :  { %v6656_v61 = vpop.eup %6655  ;;  %6487 = vmatpush3.msk.msra.mxu0 %vm2051_vm9, %v4220_v2  ;;  %6488 = vmatprep.mubr.msk.f32.mxu0 %vm6794_vm3, %v8356_v36 }
 0xe47   :  { %v4218_v1 = vmul.f32 %v6656_v61, %v6652_v47  ;;  %6491 = vmatprep.subr.mxu0 %v8356_v36  ;;  %v6658_v51 = vpop.eup %6657 }
 0xe48   :  { %v4028_v27 = vmul.f32 %v6658_v51, %v6646_v32  ;;  %v6660_v7 = vpop.eup %6659  ;;  %v6281_v51 = vld [vmem:[%s8378_s12] ss:$0 sm:$0xff] }
 0xe49   :  { %6489 = vmatmul.mubr.msk.f32.vlgmr.msra.gmra.mrb[22].mxu0 %vm2047_vm10, %v4218_v1  ;;  %v4030_v12 = vmul.f32 %v6660_v7, %v6650_v20 }
 0xe4a   :  { %6492 = vmatpush3.msk.msra.mxu0 %vm2051_vm9, %v4037_v62  ;;  %6493 = vmatprep.mubr.msk.f32.mxu0 %vm6794_vm3, %v8356_v36  ;;  %v4816_v62 = vcombine.high %v6281_v51, %v6281_v51 }
 0xe4b   :  { %6496 = vmatprep.subr.mxu0 %v8356_v36 }
 0xe4c   :  { %v4830_v7 = vrot.slane %v4816_v62, %v7056_v48 }
 0xe4d   :  { %6494 = vmatmul.mubr.msk.f32.vlgmr.msra.gmra.mrb[20].mxu0 %vm2047_vm10, %v4028_v27  ;;  %v4823_v27 = vrot.slane %v6281_v51, %v7056_v48 }
 0xe4e   :  { %6497 = vmatpush3.msk.msra.mxu0 %vm2051_vm9, %v4038_v3  ;;  %6498 = vmatprep.mubr.msk.f32.mxu0 %vm6794_vm3, %v8356_v36  ;;  %v4832_v24 = vcombine.high %v4830_v7, %v4830_v7  ;;  %v4846_v35 = vrot.slane %v4830_v7, %v7056_v48 }
 0xe4f   :  { %6517 = vmatprep.subr.bf16.mxu0 %v8356_v36  ;;  %v4831_v3 = vcombine.high %v4823_v27, %v4823_v27  ;;  %v4839_v38 = vrot.slane %v4823_v27, %v7056_v48 }
 0xe51   :  { %6499 = vmatmul.mubr.msk.f32.vlgmr.msra.gmra.mrb[22].mxu0 %vm2047_vm10, %v4030_v12 }
 0xe52   :  { %6533 = vmatprep.mubr.msk.bf16.mxu0 %vm6794_vm3, %v8356_v36 }
 0xf20   :  { %v4445_v30 = vpop.f32.mrb[20].mxu0 }
 0xf21   :  { %v4527_v11 = vcombine.high %v4445_v30, %v4445_v30  ;;  %v4534_v0 = vrot.slane %v4445_v30, %v7056_v48  ;;  %v6495_v43 = vpop.f32.mrb[21].mxu0  ;;  %v4853_v30 = vrot.slane %v4831_v3, %v7056_v48 }
 0xf23   :  { %v4542_v31 = vcombine.high %v4534_v0, %v4534_v0  ;;  %v4541_v19 = vrot.slane %v4527_v11, %v7056_v48  ;;  %v4549_v5 = vrot.slane %v4534_v0, %v7056_v48 }
 0xf24   :  { %v4521_v25 = vpop.f32.mrb[22].mxu0 }
 0xf25   :  { %v4563_v58 = vrot.slane %v4542_v31, %v7056_v48  ;;  %v4566_v17 = vcombine.high %v4521_v25, %v4521_v25  ;;  %v4573_v55 = vrot.slane %v4521_v25, %v7056_v48  ;;  %v6500_v4 = vpop.f32.mrb[23].mxu0  ;;  %v4556_v63 = vrot.slane %v4541_v19, %v7056_v48 }
 0xf27   :  { %v4605_v50 = vcombine.low %v4549_v5, %v4563_v58  ;;  %v6279_v45 = vcombine.high %v4549_v5, %v4563_v58  ;;  %v4580_v52 = vrot.slane %v4566_v17, %v7056_v48  ;;  %v4581_v46 = vcombine.high %v4573_v55, %v4573_v55 }
 0xf28   :  { %v4588_v32 = vrot.slane %v4573_v55, %v7056_v48  ;;  %v4860_v5 = vrot.slane %v4832_v24, %v7056_v48  ;;  %v4861_v58 = vcombine.high %v4839_v38, %v4839_v38  ;;  %v4862_v17 = vcombine.high %v4846_v35, %v4846_v35 }
 0xf29   :  { %v4602_v60 = vrot.slane %v4581_v46, %v7056_v48  ;;  %v4615_v18 = vrot.slane %v4605_v50, %v7056_v48  ;;  %v4622_v20 = vrot.slane %v6279_v45, %v7056_v48  ;;  %v4595_v47 = vrot.slane %v4580_v52, %v7056_v48 }
 0xf2a   :  { %v4603_v21 = vcombine.high %v4588_v32, %v4588_v32  ;;  %v4607_v23 = vcombine.low %v4556_v63, %v4588_v32  ;;  %v4863_v46 = vcombine.high %v4853_v30, %v4853_v30 }
 0xf2b   :  { %v4604_v59 = vcombine.high %v4602_v60, %v4602_v60  ;;  %v4637_v40 = vcombine.low %v4615_v18, %v4622_v20 }
 0xf2c   :  { %v4608_v56 = vcombine.low %v4602_v60, %v4603_v21  ;;  %v4629_v9 = vrot.slane %v4607_v23, %v7056_v48 }
 0xf2d   :  { %v4654_v49 = vcombine.low %v4604_v59, %v4595_v47  ;;  %v4645_v39 = vrot.slane %v4637_v40, %v7056_v48 }
 0xf2e   :  { %v4636_v57 = vrot.slane %v4608_v56, %v7056_v48  ;;  %v4864_v56 = vcombine.high %v4860_v5, %v4860_v5 }
 0xf2f   :  { %v4661_v33 = vrot.slane %v4654_v49, %v7056_v48 }
 0xf30   :  { %v4638_v29 = vcombine.low %v4629_v9, %v4636_v57 }
 0xf31   :  { %v4668_v61 = vrot.slane %v4661_v33, %v7056_v48 }
 0xf32   :  { %v4652_v41 = vrot.slane %v4638_v29, %v7056_v48 }
 0xf34   :  { %v4653_v2 = vcombine.low %v4645_v39, %v4652_v41 }
 0xf36   :  { %v4671_v1 = vpack.c.bf16 %v4668_v61, %v4653_v2 }
 0xf38   :  { %6506 = vmatmul.mubr.msk.bf16.vlgmr.msra.gmra.mrb[24].mxu1 %vm564_vm1, %v4671_v1 }
 0xf39   :  { %6513 = vmatprep.mubr.msk.bf16.mxu1 %vm6794_vm3, %v8356_v36 }
0x100b   :  { %v4711_v12 = vpop.f32.mrb[24].mxu1 }
0x100c   :  { %v4720_v53 = vcombine.high %v4711_v12, %v4711_v12  ;;  %v4727_v26 = vrot.slane %v4711_v12, %v7056_v48  ;;  %v6507_v44 = vpop.f32.mrb[25].mxu1 }
0x100d   :  { %v4714_v11 = vpop.f32.mrb[26].mxu1 }
0x100e   :  { %v4734_v0 = vrot.slane %v4720_v53, %v7056_v48  ;;  %v4735_v43 = vcombine.high %v4727_v26, %v4727_v26  ;;  %v4743_v31 = vrot.slane %v4727_v26, %v7056_v48  ;;  %v4775_v19 = vrot.slane %v4714_v11, %v7056_v48  ;;  %v6508_v25 = vpop.f32.mrb[27].mxu1 }
0x1010   :  { %v4736_v55 = vcombine.high %v4734_v0, %v4734_v0  ;;  %v4750_v4 = vrot.slane %v4734_v0, %v7056_v48  ;;  %v4757_v50 = vrot.slane %v4735_v43, %v7056_v48  ;;  %v4765_v45 = vcombine.high %v4743_v31, %v4743_v31  ;;  %v6257_v43 = vld [vmem:[%s8379_s20] ss:$0 sm:$0xff] }
0x1011   :  { %v4801_v52 = vadd.f32 %v4743_v31, %v7201_v13  ;;  %v4776_v63 = vcombine.high %v4775_v19, %v4775_v19  ;;  %v4783_v32 = vrot.slane %v4775_v19, %v7056_v48  ;;  %v3358_v0 = vcombine.high %v7869_v37, %v7869_v37 }
0x1012   :  { %v4764_v60 = vrot.slane %v4736_v55, %v7056_v48  ;;  %v4766_v18 = vcombine.high %v4750_v4, %v4750_v4  ;;  %v4767_v20 = vcombine.high %v4757_v50, %v4757_v50  ;;  %v4802_v21 = vadd.f32 %v4757_v50, %v7203_v10 }
0x1013   :  { %v4803_v23 = vadd.f32 %v4765_v45, %v7205_v15  ;;  %v4805_v47 = vadd.f32 %v4750_v4, %v7209_v16  ;;  %v4790_v59 = vrot.slane %v4776_v63, %v7056_v48  ;;  %v7961_v57 = vadd.f32 %v4839_v38, %v4801_v52 }
0x1014   :  { %v4768_v49 = vcombine.high %v4764_v60, %v4764_v60  ;;  %v4804_v13 = vadd.f32 %v4767_v20, %v7207_v14  ;;  %v4806_v40 = vadd.f32 %v4764_v60, %v7211_v28  ;;  %v4807_v9 = vadd.f32 %v4766_v18, %v8360_v42 }
0x1015   :  { %v7963_v29 = vadd.f32 %v4853_v30, %v4802_v21  ;;  %v7965_v33 = vadd.f32 %v4861_v58, %v4803_v23  ;;  %v4809_v10 = vadd.f32 %v4783_v32, %v8361_v34  ;;  %v7971_v39 = vadd.f32 %v4846_v35, %v4805_v47  ;;  %v8380_v21 = vld [vmem:[#allocation32_spill] sm:$0xff]  ;;  %v8381_v47 = vld [vmem:[#allocation33_spill] sm:$0xff] }
0x1016   :  { %v4808_v15 = vadd.f32 %v4768_v49, %v8362_v22  ;;  %v7969_v16 = vadd.f32 %v4863_v46, %v4804_v13  ;;  %v7973_v41 = vadd.f32 %v4860_v5, %v4806_v40  ;;  %v4810_v14 = vadd.f32 %v4790_v59, %v8363_v8 }
0x1017   :  { %v4893_v28 = vcombine.low %v7961_v57, %v7963_v29  ;;  %v7978_v42 = vadd.f32 %v4862_v17, %v4807_v9  ;;  %v4881_v61 = vadd.f32 %v4839_v38, %v4809_v10  ;;  %v3372_v31 = vrot.slane %v3358_v0, %v7056_v48  ;;  %v8382_v10 = vld [vmem:[#allocation34_spill] sm:$0xff] }
0x1018   :  { %v7980_v2 = vadd.f32 %v4864_v56, %v4808_v15  ;;  %v4894_v34 = vcombine.low %v7965_v33, %v7969_v16  ;;  %v4895_v22 = vcombine.low %v7971_v39, %v7973_v41  ;;  %v4882_v1 = vadd.f32 %v4853_v30, %v4810_v14  ;;  %v8383_v14 = vld [vmem:[#allocation35_spill] sm:$0xff] }
0x1019   :  { %v4903_v8 = vrot.slane %v4893_v28, %v7056_v48  ;;  %v3397_v19 = vcombine.high %v6257_v43, %v6257_v43  ;;  %v3373_v25 = vcombine.high %v3372_v31, %v3372_v31  ;;  %v3365_v58 = vrot.slane %v7869_v37, %v7056_v48 }
0x101a   :  { %v4896_v51 = vcombine.low %v7978_v42, %v7980_v2  ;;  %v4910_v62 = vrot.slane %v4894_v34, %v7056_v48  ;;  %v4942_v27 = vcombine.low %v4881_v61, %v4882_v1  ;;  %v4917_v7 = vrot.slane %v4895_v22, %v7056_v48 }
0x101b   :  { %v3411_v5 = vrot.slane %v3397_v19, %v7056_v48  ;;  %v3387_v17 = vrot.slane %v3373_v25, %v7056_v48  ;;  %v3380_v4 = vrot.slane %v3365_v58, %v7056_v48  ;;  %v3404_v50 = vrot.slane %v6257_v43, %v7056_v48 }
0x101c   :  { %v4924_v3 = vrot.slane %v4896_v51, %v7056_v48  ;;  %v4925_v12 = vcombine.low %v4903_v8, %v4910_v62  ;;  %v4949_v24 = vrot.slane %v4942_v27, %v7056_v48  ;;  %v8386_v62 = vld [vmem:[#allocation38_spill] sm:$0xff] }
0x101d   :  { %v3412_v55 = vcombine.high %v3411_v5, %v3411_v5  ;;  %v3391_v45 = vadd.f32 %v3387_v17, %v7639_v6  ;;  %v3390_v46 = vadd.f32 %v3380_v4, %v7635_v54  ;;  %v3419_v63 = vrot.slane %v3404_v50, %v7056_v48 }
0x101e   :  { %v4926_v35 = vcombine.low %v4917_v7, %v4924_v3  ;;  %v4956_v38 = vrot.slane %v4949_v24, %v7056_v48  ;;  %v4933_v53 = vrot.slane %v4925_v12, %v7056_v48  ;;  %v8387_v7 = vld [vmem:[#allocation39_spill] sm:$0xff] }
0x101f   :  { %v3426_v52 = vrot.slane %v3412_v55, %v7056_v48  ;;  %v8014_v60 = vadd.f32 %v3419_v63, %v3390_v46 }
0x1020   :  { %v4940_v26 = vrot.slane %v4926_v35, %v7056_v48  ;;  %v4962_v44 = vsel %vm568_vm2, %v4956_v38, 0.0 }
0x1021   :  { %4963 = vadd.xlane.f32.xlu0 %v4962_v44  ;;  %v8012_v32 = vadd.f32 %v3426_v52, %v3391_v45 }
0x1022   :  { %v4941_v30 = vcombine.low %v4933_v53, %v4940_v26 }
0x1023   :  { %v5813_v20 = vcombine.low %v8014_v60, %v8012_v32 }
0x1024   :  { %v4959_v11 = vsel %vm564_vm1, %v4941_v30, 0.0 }
0x1025   :  { %4960 = vadd.xlane.f32.xlu1 %v4959_v11  ;;  %v5820_v13 = vrot.slane %v5813_v20, %v7056_v48 }
0x1027   :  { %v5827_v4 = vrot.slane %v5820_v13, %v7056_v48  ;;  %v181_v13 = vld [vmem:[%s8388_s27 + $0x8] sm:$0xff] }
0x10ae   :  { %v4964_v37 = vpop.xlane.xlu0 %4963 }
0x10af   :  { %v4966_v18 = vmul.f32 0.03125, %v4964_v37 }
0x10b1   :  { %v5004_v23 = vrot.slane %v4966_v18, %v8380_v21  ;;  %v5008_v59 = vrot.slane %v4966_v18, %v8381_v47  ;;  %v5829_v18 = vsel %vm568_vm2, %v5827_v4, 0.0 }
0x10b2   :  { %v4961_v6 = vpop.xlane.xlu1 %4960 }
0x10b3   :  { %v4965_v56 = vmul.f32 0.03125, %v4961_v6  ;;  %v8020_v49 = vsub.f32 %v4881_v61, %v5004_v23  ;;  %v8022_v54 = vsub.f32 %v4882_v1, %v5008_v59  ;;  %v8384_v61 = vld [vmem:[#allocation36_spill] sm:$0xff]  ;;  %v8385_v1 = vld [vmem:[#allocation37_spill] sm:$0xff] }
0x10b5   :  { %v4972_v40 = vrot.slane %v4965_v56, %v8380_v21  ;;  %v4976_v9 = vrot.slane %v4965_v56, %v8381_v47  ;;  %v4980_v15 = vrot.slane %v4965_v56, %v8382_v10  ;;  %v4984_v28 = vrot.slane %v4965_v56, %v8383_v14 }
0x10b6   :  { %v5037_v34 = vmul.f32 %v8020_v49, %v8020_v49  ;;  %v5038_v22 = vmul.f32 %v8022_v54, %v8022_v54  ;;  %v4988_v51 = vrot.slane %v4965_v56, %v8384_v61  ;;  %v4992_v8 = vrot.slane %v4965_v56, %v8385_v1 }
0x10b7   :  { %v4996_v27 = vrot.slane %v4965_v56, %v8386_v62  ;;  %v5000_v3 = vrot.slane %v4965_v56, %v8387_v7  ;;  %v8038_v12 = vsub.f32 %v7961_v57, %v4972_v40  ;;  %v8041_v24 = vsub.f32 %v7963_v29, %v4976_v9  ;;  %v180_v56 = vld [vmem:[%s8388_s27] sm:$0xff]  ;;  %v182_v40 = vld [vmem:[%s8388_s27 + $0x10] sm:$0xff] }
0x10b8   :  { %v5098_v35 = vcombine.low %v5037_v34, %v5038_v22  ;;  %v8044_v38 = vsub.f32 %v7965_v33, %v4980_v15  ;;  %v8047_v53 = vsub.f32 %v7969_v16, %v4984_v28  ;;  %v8050_v26 = vsub.f32 %v7971_v39, %v4988_v51  ;;  %v183_v15 = vld [vmem:[%s8388_s27 + $0x18] sm:$0xff] }
0x10b9   :  { %v8053_v44 = vsub.f32 %v7973_v41, %v4992_v8  ;;  %v8056_v30 = vsub.f32 %v7978_v42, %v4996_v27  ;;  %v8059_v11 = vsub.f32 %v7980_v2, %v5000_v3  ;;  %v5029_v29 = vmul.f32 %v8038_v12, %v8038_v12  ;;  %v6282_v27 = vld [vmem:[%s8389_s4] ss:$0 sm:$0xff] }
0x10ba   :  { %v5105_v33 = vrot.slane %v5098_v35, %v7056_v48  ;;  %v5030_v16 = vmul.f32 %v8041_v24, %v8041_v24  ;;  %v5031_v39 = vmul.f32 %v8044_v38, %v8044_v38  ;;  %v5032_v0 = vmul.f32 %v8047_v53, %v8047_v53  ;;  %v6283_v35 = vld [vmem:[%s8390_s28] ss:$0 sm:$0xff] }
0x10bb   :  { %v5033_v42 = vmul.f32 %v8050_v26, %v8050_v26  ;;  %v5034_v2 = vmul.f32 %v8053_v44, %v8053_v44  ;;  %v5035_v43 = vmul.f32 %v8056_v30, %v8056_v30  ;;  %v5036_v31 = vmul.f32 %v8059_v11, %v8059_v11 }
0x10bc   :  { %v5112_v19 = vrot.slane %v5105_v33, %v7056_v48  ;;  %v5049_v25 = vcombine.low %v5029_v29, %v5030_v16  ;;  %v5050_v5 = vcombine.low %v5031_v39, %v5032_v0  ;;  %v5410_v9 = vpack.c.bf16 %v181_v13, %v180_v56 }
0x10bd   :  { %v5051_v58 = vcombine.low %v5033_v42, %v5034_v2  ;;  %v5052_v17 = vcombine.low %v5035_v43, %v5036_v31  ;;  %v5411_v28 = vpack.c.bf16 %v183_v15, %v182_v40  ;;  %v5194_v29 = vcombine.high %v6282_v27, %v6282_v27 }
0x10be   :  { %v5118_v55 = vsel %vm568_vm2, %v5112_v19, 0.0  ;;  %v5059_v50 = vrot.slane %v5049_v25, %v7056_v48  ;;  %v5066_v45 = vrot.slane %v5050_v5, %v7056_v48  ;;  %6510 = vmatpush3.bf16.msra.mxu1 %v5410_v9  ;;  %v5201_v39 = vrot.slane %v6282_v27, %v7056_v48 }
0x10bf   :  { %5119 = vadd.xlane.f32.xlu1 %v5118_v55  ;;  %v5073_v52 = vrot.slane %v5051_v58, %v7056_v48  ;;  %v5080_v46 = vrot.slane %v5052_v17, %v7056_v48  ;;  %6511 = vmatprep.subr.bf16.mxu1 %v8356_v36  ;;  %v5266_v0 = vcombine.high %v6283_v35, %v6283_v35 }
0x10c0   :  { %v5081_v63 = vcombine.low %v5059_v50, %v5066_v45  ;;  %v5208_v19 = vrot.slane %v5194_v29, %v7056_v48  ;;  %v5273_v25 = vrot.slane %v6283_v35, %v7056_v48  ;;  %v5209_v17 = vcombine.high %v5201_v39, %v5201_v39 }
0x10c1   :  { %v5082_v37 = vcombine.low %v5073_v52, %v5080_v46  ;;  %v5280_v4 = vrot.slane %v5266_v0, %v7056_v48  ;;  %v5217_v46 = vrot.slane %v5201_v39, %v7056_v48 }
0x10c2   :  { %v5089_v20 = vrot.slane %v5081_v63, %v7056_v48  ;;  %6512 = vmatpush3.bf16.msra.mxu1 %v5411_v28  ;;  %v5210_v52 = vcombine.high %v5208_v19, %v5208_v19  ;;  %v5281_v63 = vcombine.high %v5273_v25, %v5273_v25  ;;  %v5289_v56 = vrot.slane %v5273_v25, %v7056_v48 }
0x10c3   :  { %5830 = vadd.xlane.f32.xlu1 %v5829_v18  ;;  %v5096_v23 = vrot.slane %v5082_v37, %v7056_v48  ;;  %6537 = vmatprep.subr.bf16.mxu1 %v8356_v36  ;;  %v5231_v18 = vrot.slane %v5209_v17, %v7056_v48  ;;  %v5224_v28 = vrot.slane %v5208_v19, %v7056_v48 }
0x10c4   :  { %v5303_v9 = vrot.slane %v5281_v63, %v7056_v48 }
0x10c5   :  { %v5097_v59 = vcombine.low %v5089_v20, %v5096_v23  ;;  %v5241_v35 = vcombine.high %v5231_v18, %v5231_v18 }
0x10c7   :  { %v5115_v6 = vsel %vm564_vm1, %v5097_v59, 0.0  ;;  %v5282_v59 = vcombine.high %v5280_v4, %v5280_v4 }
0x10c8   :  { %5116 = vadd.xlane.f32.xlu0 %v5115_v6 }
0x10c9   :  { %v5310_v27 = vrot.slane %v5282_v59, %v7056_v48 }
0x114c   :  { %v5120_v34 = vpop.xlane.xlu1 %5119 }
0x114d   :  { %v5122_v22 = vmul.f32 0.03125, %v5120_v34  ;;  %v5238_v34 = vrot.slane %v5210_v52, %v7056_v48 }
0x114f   :  { %v5124_v51 = vadd.f32 1e-05, %v5122_v22  ;;  %v5242_v29 = vcombine.high %v5238_v34, %v5238_v34 }
0x1150   :  { %v5831_v8 = vpop.xlane.xlu1 %5830 }
0x1151   :  { %6661 = vrsqrt.f32 %v5124_v51  ;;  %v5832_v3 = vmul.f32 0.03125, %v5831_v8  ;;  %v5296_v8 = vrot.slane %v5280_v4, %v7056_v48 }
0x1153   :  { %v5837_v33 = vrot.slane %v5832_v3, %v8380_v21  ;;  %v5841_v16 = vrot.slane %v5832_v3, %v8381_v47  ;;  %v5239_v3 = vcombine.high %v5217_v46, %v5217_v46 }
0x1155   :  { %v8101_v42 = vsub.f32 %v8014_v60, %v5837_v33  ;;  %v8104_v2 = vsub.f32 %v8012_v32, %v5841_v16  ;;  %v5117_v43 = vpop.xlane.xlu0 %5116  ;;  %v5313_v33 = vcombine.high %v5303_v9, %v5303_v9 }
0x1156   :  { %v5121_v31 = vmul.f32 0.03125, %v5117_v43  ;;  %v5312_v43 = vcombine.high %v5296_v8, %v5296_v8 }
0x1157   :  { %v5846_v5 = vmul.f32 %v8101_v42, %v8101_v42  ;;  %v5847_v58 = vmul.f32 %v8104_v2, %v8104_v2 }
0x1158   :  { %v5123_v55 = vadd.f32 1e-05, %v5121_v31  ;;  %v5314_v31 = vcombine.high %v5310_v27, %v5310_v27 }
0x1159   :  { %v5850_v50 = vcombine.low %v5846_v5, %v5847_v58 }
0x115a   :  { %6663 = vrsqrt.f32 %v5123_v55 }
0x115b   :  { %v6662_v45 = vpop.eup %6661  ;;  %v5857_v37 = vrot.slane %v5850_v50, %v7056_v48 }
0x115c   :  { %v5164_v20 = vrot.slane %v6662_v45, %v8380_v21  ;;  %v5168_v23 = vrot.slane %v6662_v45, %v8381_v47 }
0x115d   :  { %v5864_v6 = vrot.slane %v5857_v37, %v7056_v48 }
0x115e   :  { %v5187_v13 = vmul.f32 %v5164_v20, %v8020_v49  ;;  %v5188_v40 = vmul.f32 %v5168_v23, %v8022_v54  ;;  %v5240_v49 = vcombine.high %v5224_v28, %v5224_v28  ;;  %v5311_v54 = vcombine.high %v5289_v56, %v5289_v56 }
0x115f   :  { %v5866_v15 = vsel %vm568_vm2, %v5864_v6, 0.0 }
0x1160   :  { %v5259_v22 = vmul.f32 %v5217_v46, %v5187_v13  ;;  %v5260_v51 = vmul.f32 %v5231_v18, %v5188_v40  ;;  %5867 = vadd.xlane.f32.xlu1 %v5866_v15 }
0x1162   :  { %v5331_v39 = vadd.f32 %v5289_v56, %v5259_v22  ;;  %v5332_v0 = vadd.f32 %v5303_v9, %v5260_v51 }
0x1164   :  { %v6664_v16 = vpop.eup %6663 }
0x1165   :  { %v5132_v19 = vrot.slane %v6664_v16, %v8380_v21  ;;  %v5136_v25 = vrot.slane %v6664_v16, %v8381_v47  ;;  %v5140_v5 = vrot.slane %v6664_v16, %v8382_v10  ;;  %v5144_v58 = vrot.slane %v6664_v16, %v8383_v14 }
0x1166   :  { %v5148_v17 = vrot.slane %v6664_v16, %v8384_v61  ;;  %v5152_v55 = vrot.slane %v6664_v16, %v8385_v1  ;;  %v5156_v4 = vrot.slane %v6664_v16, %v8386_v62  ;;  %v5160_v50 = vrot.slane %v6664_v16, %v8387_v7 }
0x1167   :  { %v5179_v45 = vmul.f32 %v5132_v19, %v8038_v12  ;;  %v5180_v52 = vmul.f32 %v5136_v25, %v8041_v24  ;;  %v5181_v63 = vmul.f32 %v5140_v5, %v8044_v38  ;;  %v5182_v37 = vmul.f32 %v5144_v58, %v8047_v53  ;;  %v189_v25 = vld [vmem:[%s8391_s1 + $0x20] sm:$0xff]  ;;  %v190_v5 = vld [vmem:[%s8391_s1 + $0x28] sm:$0xff] }
0x1168   :  { %v5183_v10 = vmul.f32 %v5148_v17, %v8050_v26  ;;  %v5184_v14 = vmul.f32 %v5152_v55, %v8053_v44  ;;  %v5185_v61 = vmul.f32 %v5156_v4, %v8056_v30  ;;  %v5186_v1 = vmul.f32 %v5160_v50, %v8059_v11  ;;  %v191_v17 = vld [vmem:[%s8391_s1 + $0x30] sm:$0xff]  ;;  %v192_v55 = vld [vmem:[%s8391_s1 + $0x38] sm:$0xff]  ;;  %v193_v50 = vld [vmem:[%s8391_s1 + $0x40] sm:$0xff] }
0x1169   :  { %v5251_v20 = vmul.f32 %v5217_v46, %v5179_v45  ;;  %v5252_v62 = vmul.f32 %v5231_v18, %v5180_v52  ;;  %v5253_v23 = vmul.f32 %v5239_v3, %v5181_v63  ;;  %v5254_v7 = vmul.f32 %v5241_v35, %v5182_v37  ;;  %v194_v45 = vld [vmem:[%s8391_s1 + $0x48] sm:$0xff]  ;;  %v195_v63 = vld [vmem:[%s8391_s1 + $0x50] sm:$0xff]  ;;  %v196_v37 = vld [vmem:[%s8391_s1 + $0x58] sm:$0xff] }
0x116a   :  { %v5255_v59 = vmul.f32 %v5224_v28, %v5183_v10  ;;  %v5256_v12 = vmul.f32 %v5238_v34, %v5184_v14  ;;  %v5257_v6 = vmul.f32 %v5240_v49, %v5185_v61  ;;  %v5258_v24 = vmul.f32 %v5242_v29, %v5186_v1  ;;  %v197_v14 = vld [vmem:[%s8391_s1 + $0x60] sm:$0xff]  ;;  %v198_v61 = vld [vmem:[%s8391_s1 + $0x68] sm:$0xff] }
0x116b   :  { %v5323_v13 = vadd.f32 %v5289_v56, %v5251_v20  ;;  %v5324_v38 = vadd.f32 %v5303_v9, %v5252_v62  ;;  %v5325_v40 = vadd.f32 %v5311_v54, %v5253_v23  ;;  %v5326_v53 = vadd.f32 %v5313_v33, %v5254_v7  ;;  %v185_v33 = vld [vmem:[%s8391_s1] sm:$0xff]  ;;  %v199_v20 = vld [vmem:[%s8391_s1 + $0x70] sm:$0xff]  ;;  %v200_v62 = vld [vmem:[%s8391_s1 + $0x78] sm:$0xff] }
0x116c   :  { %v5327_v15 = vadd.f32 %v5296_v8, %v5255_v59  ;;  %v5328_v26 = vadd.f32 %v5310_v27, %v5256_v12  ;;  %v5329_v22 = vadd.f32 %v5312_v43, %v5257_v6  ;;  %v5330_v44 = vadd.f32 %v5314_v31, %v5258_v24  ;;  %v187_v43 = vld [vmem:[%s8391_s1 + $0x10] sm:$0xff]  ;;  %v188_v31 = vld [vmem:[%s8391_s1 + $0x18] sm:$0xff]  ;;  %v6284_v7 = vld [vmem:[%s8392_s2] ss:$0 sm:$0xff] }
0x116d   :  { %v5343_v51 = vcombine.low %v5323_v13, %v5324_v38  ;;  %v5344_v30 = vcombine.low %v5325_v40, %v5326_v53  ;;  %v5392_v46 = vcombine.low %v5331_v39, %v5332_v0  ;;  %v186_v39 = vld [vmem:[%s8391_s1 + $0x8] sm:$0xff]  ;;  %v5482_v19 = vpack.c.bf16 %v188_v31, %v187_v43 }
0x116e   :  { %v5345_v16 = vcombine.low %v5327_v15, %v5328_v26  ;;  %v5346_v11 = vcombine.low %v5329_v22, %v5330_v44  ;;  %v5481_v0 = vpack.c.bf16 %v186_v39, %v185_v33  ;;  %v5483_v58 = vpack.c.bf16 %v190_v5, %v189_v25 }
0x116f   :  { %v5353_v18 = vrot.slane %v5343_v51, %v7056_v48  ;;  %v5360_v28 = vrot.slane %v5344_v30, %v7056_v48  ;;  %v5399_v27 = vrot.slane %v5392_v46, %v7056_v48  ;;  %v5484_v4 = vpack.c.bf16 %v192_v55, %v191_v17 }
0x1170   :  { %v5367_v56 = vrot.slane %v5345_v16, %v7056_v48  ;;  %v5374_v9 = vrot.slane %v5346_v11, %v7056_v48  ;;  %6518 = vmatpush3.bf16.msra.mxu0 %v5481_v0  ;;  %v5485_v52 = vpack.c.bf16 %v194_v45, %v193_v50  ;;  %v5486_v10 = vpack.c.bf16 %v196_v37, %v195_v63 }
0x1171   :  { %v5375_v34 = vcombine.low %v5353_v18, %v5360_v28  ;;  %v5406_v29 = vrot.slane %v5399_v27, %v7056_v48  ;;  %6519 = vmatprep.subr.bf16.mxu0 %v8356_v36  ;;  %v5487_v1 = vpack.c.bf16 %v198_v61, %v197_v14  ;;  %v5488_v23 = vpack.c.bf16 %v200_v62, %v199_v20 }
0x1172   :  { %v5376_v8 = vcombine.low %v5367_v56, %v5374_v9 }
0x1173   :  { %v5383_v3 = vrot.slane %v5375_v34, %v7056_v48 }
0x1174   :  { %v5390_v35 = vrot.slane %v5376_v8, %v7056_v48  ;;  %6520 = vmatpush3.bf16.msra.mxu0 %v5482_v19 }
0x1175   :  { %6521 = vmatprep.subr.bf16.mxu0 %v8356_v36 }
0x1176   :  { %v5391_v49 = vcombine.low %v5383_v3, %v5390_v35  ;;  %v6286_v35 = vld [vmem:[%s8393_s7] ss:$0 sm:$0xff] }
0x1177   :  { %v5576_v0 = vrot.slane %v6286_v35, %v7056_v48 }
0x1178   :  { %v5409_v54 = vpack.c.bf16 %v5406_v29, %v5391_v49  ;;  %6522 = vmatpush3.bf16.msra.mxu0 %v5483_v58  ;;  %v5569_v49 = vcombine.high %v6286_v35, %v6286_v35  ;;  %v6288_v35 = vld [vmem:[%s8398_s18] ss:$0 sm:$0xff] }
0x1179   :  { %6523 = vmatprep.subr.bf16.mxu0 %v8356_v36 }
0x117a   :  { %6514 = vmatmul.mubr.msk.bf16.vlgmr.msra.gmra.mrb[28].mxu1 %vm564_vm1, %v5409_v54  ;;  %v5583_v29 = vrot.slane %v5569_v49, %v7056_v48 }
0x117b   :  { %6541 = vmatprep.mubr.msk.bf16.mxu1 %vm6794_vm3, %v8356_v36 }
0x117c   :  { %6524 = vmatpush3.bf16.msra.mxu0 %v5484_v4  ;;  %v5584_v5 = vcombine.high %v5583_v29, %v5583_v29  ;;  %v5591_v4 = vrot.slane %v5576_v0, %v7056_v48 }
0x117d   :  { %6525 = vmatprep.subr.bf16.mxu0 %v8356_v36 }
0x117e   :  { %v5598_v45 = vrot.slane %v5584_v5, %v7056_v48 }
0x1180   :  { %6526 = vmatpush3.bf16.msra.mxu0 %v5485_v52 }
0x1181   :  { %6527 = vmatprep.subr.bf16.mxu0 %v8356_v36 }
0x1184   :  { %6528 = vmatpush3.bf16.msra.mxu0 %v5486_v10 }
0x1185   :  { %6529 = vmatprep.subr.bf16.mxu0 %v8356_v36 }
0x1188   :  { %6530 = vmatpush3.bf16.msra.mxu0 %v5487_v1 }
0x1189   :  { %6531 = vmatprep.subr.bf16.mxu0 %v8356_v36 }
0x118c   :  { %6532 = vmatpush3.bf16.msra.mxu0 %v5488_v23 }
0x124d   :  { %v5455_v59 = vpop.f32.mrb[28].mxu1 }
0x124e   :  { %v5456_v12 = vadd.f32 %v6284_v7, %v5455_v59  ;;  %v6515_v6 = vpop.f32.mrb[29].mxu1 }
0x124f   :  { %v5458_v24 = vpop.f32.mrb[30].mxu1 }
0x1250   :  { %v5462_v13 = vmul.f32 %v5456_v12, %v5456_v12  ;;  %v5459_v38 = vadd.f32 %v6284_v7, %v5458_v24  ;;  %v6516_v40 = vpop.f32.mrb[31].mxu1 }
0x1251   :  { %v240_v40 = vld [vmem:[%s8394_s10] sm:$0xff] }
0x1252   :  { %v5464_v53 = vmul.f32 %v5462_v13, %v5456_v12  ;;  %v5463_v15 = vmul.f32 %v5459_v38, %v5459_v38 }
0x1254   :  { %v5466_v26 = vmul.f32 0.044715, %v5464_v53  ;;  %v5465_v22 = vmul.f32 %v5463_v15, %v5459_v38  ;;  %v241_v53 = vld [vmem:[%s8394_s10 + $0x8] sm:$0xff]  ;;  %v242_v15 = vld [vmem:[%s8394_s10 + $0x10] sm:$0xff] }
0x1256   :  { %v5468_v44 = vadd.f32 %v5466_v26, %v5456_v12  ;;  %v5467_v51 = vmul.f32 0.044715, %v5465_v22  ;;  %v5743_v26 = vpack.c.bf16 %v241_v53, %v240_v40  ;;  %v243_v22 = vld [vmem:[%s8394_s10 + $0x18] sm:$0xff] }
0x1258   :  { %v5470_v30 = vmul.f32 0.7978846, %v5468_v44  ;;  %v5469_v16 = vadd.f32 %v5467_v51, %v5459_v38  ;;  %6538 = vmatpush3.bf16.msra.mxu1 %v5743_v26  ;;  %v5744_v44 = vpack.c.bf16 %v243_v22, %v242_v15  ;;  %v5868_v51 = vpop.xlane.xlu1 %5867  ;;  %v249_v26 = vld [vmem:[%s8399_s22 + $0x18] sm:$0xff] }
0x1259   :  { %6539 = vmatprep.subr.bf16.mxu1 %v8356_v36 }
0x125a   :  { %6665 = vtanh.f32 %v5470_v30  ;;  %v5471_v11 = vmul.f32 0.7978846, %v5469_v16  ;;  %v5869_v30 = vmul.f32 0.03125, %v5868_v51 }
0x125c   :  { %6667 = vtanh.f32 %v5471_v11  ;;  %6540 = vmatpush3.bf16.msra.mxu1 %v5744_v44  ;;  %v5870_v16 = vadd.f32 1e-05, %v5869_v30  ;;  %v6290_v11 = vld [vmem:[%s8395_s11] ss:$0 sm:$0xff] }
0x125d   :  { %6545 = vmatprep.subr.bf16.mxu1 %v8356_v36 }
0x125e   :  { %6669 = vrsqrt.f32 %v5870_v16 }
0x1264   :  { %v6666_v46 = vpop.eup %6665 }
0x1265   :  { %v5474_v18 = vadd.f32 1.0, %v6666_v46 }
0x1266   :  { %v6668_v28 = vpop.eup %6667 }
0x1267   :  { %v5476_v56 = vmul.f32 0.5, %v5474_v18  ;;  %v5475_v9 = vadd.f32 1.0, %v6668_v28  ;;  %v5896_v28 = vrot.slane %v6290_v11, %v7056_v48  ;;  %v8401_v11 = vmov 0  }
0x1269   :  { %v5477_v34 = vmul.f32 0.5, %v5475_v9  ;;  %v5478_v8 = vmul.f32 %v5476_v56, %v5456_v12  ;;  %v6670_v9 = vpop.eup %6669 }
0x126b   :  { %v5479_v27 = vmul.f32 %v5477_v34, %v5459_v38  ;;  %v6291_v34 = vld [vmem:[%s8396_s15] ss:$0 sm:$0xff] }
0x126c   :  { %v5927_v49 = vrot.slane %v6291_v34, %v7056_v48 }
0x126d   :  { %v5480_v3 = vpack.c.bf16 %v5479_v27, %v5478_v8  ;;  %v6287_v8 = vld [vmem:[%s8397_s16] ss:$0 sm:$0xff]  ;;  %v5897_v27 = vcombine.high %v5896_v28, %v5896_v28 }
0x126e   :  { %v5690_v29 = vrot.slane %v6287_v8, %v7056_v48  ;;  %v5928_v0 = vcombine.high %v5927_v49, %v5927_v49  ;;  %v255_v8 = vld [vmem:[%s8400_s23 + $0x28] sm:$0xff] }
0x126f   :  { %6534 = vmatmul.mubr.bf16.vlgmr.msra.gmra.mrb[24].mxu0 %v5480_v3  ;;  %v5880_v3 = vrot.slane %v6670_v9, %v8381_v47 }
0x1342   :  { %v5523_v54 = vpop.f32.mrb[24].mxu0 }
0x1343   :  { %v5530_v33 = vcombine.high %v5523_v54, %v5523_v54  ;;  %v5537_v39 = vrot.slane %v5523_v54, %v7056_v48  ;;  %v6535_v43 = vpop.f32.mrb[25].mxu0  ;;  %v5721_v54 = vrot.slane %v6288_v35, %v7056_v48  ;;  %v256_v35 = vld [vmem:[%s8400_s23 + $0x30] sm:$0xff] }
0x1344   :  { %v5526_v31 = vpop.f32.mrb[26].mxu0  ;;  %v5691_v43 = vcombine.high %v5690_v29, %v5690_v29 }
0x1345   :  { %v5544_v19 = vrot.slane %v5530_v33, %v7056_v48  ;;  %v5552_v25 = vrot.slane %v5537_v39, %v7056_v48  ;;  %v6536_v58 = vpop.f32.mrb[27].mxu0  ;;  %v5911_v33 = vrot.slane %v5897_v27, %v7056_v48  ;;  %v5884_v39 = vmul.f32 %v5880_v3, %v8104_v2  ;;  %v254_v27 = vld [vmem:[%s8400_s23 + $0x20] sm:$0xff] }
0x1346   :  { %v5876_v31 = vrot.slane %v6670_v9, %v8380_v21  ;;  %v5942_v58 = vrot.slane %v5928_v0, %v7056_v48  ;;  %v252_v9 = vld [vmem:[%s8400_s23 + $0x10] sm:$0xff] }
0x1347   :  { %v5545_v17 = vcombine.high %v5544_v19, %v5544_v19  ;;  %v5562_v55 = vadd.f32 %v5552_v25, %v7961_v57  ;;  %v5722_v19 = vcombine.high %v5721_v54, %v5721_v54  ;;  %v5915_v5 = vmul.f32 %v5911_v33, %v5884_v39 }
0x1348   :  { %v5883_v2 = vmul.f32 %v5876_v31, %v8101_v42  ;;  %v6293_v31 = vld [vmem:[%s6995_s6] ss:$0 sm:$0xff]  ;;  %s6799_s6 = smov [#allocation2]  }
0x1349   :  { %v5559_v50 = vrot.slane %v5545_v17, %v7056_v48  ;;  %v5601_v63 = vadd.f32 %v5591_v4, %v5562_v55  ;;  %v5698_v17 = vrot.slane %v5690_v29, %v7056_v48  ;;  %v5705_v55 = vrot.slane %v5691_v43, %v7056_v48  ;;  %s6151_s0 = sshll.u32 %s6799_s6, 4  ;;  %s6152_s0 = int_to_ptr.vmem [resolvable:$true] %s6151_s0 }
0x134a   :  { %s6681_s5 = scalar_lea.vmem %s6152_s0, 32  ;;  %p6686_p1 = scmp.lt.s32.totalorder %s6152_s0, %s6152_s0 }
0x134b   :  { %v5563_v52 = vadd.f32 %v5559_v50, %v7973_v41  ;;  %v5603_v10 = vadd.f32 %v5601_v63, %v8014_v60  ;;  %p6682_p0 = scmp.ne.s32.totalorder %s6152_s0, %s6681_s5  ;;  %p6687_p2 = scmp.lt.s32.totalorder %s6681_s5, %s6681_s5 }
0x134d   :  { %v5602_v37 = vadd.f32 %v5598_v45, %v5563_v52  ;;  %v5904_v45 = vrot.slane %v5896_v28, %v7056_v48  ;;  %v250_v28 = vld [vmem:[%s8400_s23] sm:$0xff]  ;;  %p6688_p3 = por %p6687_p2, %p6686_p1 }
0x134e   :  { %v6009_v34 = vpack.c.bf16 %v252_v9, %v250_v28 }
0x134f   :  { %v5604_v14 = vadd.f32 %v5602_v37, %v8012_v32  ;;  %v5729_v37 = vrot.slane %v5721_v54, %v7056_v48  ;;  %p6689_p4 = pnand %p6688_p3, %p6682_p0 }
0x1351   :  { %v5607_v61 = vcombine.low %v5603_v10, %v5604_v14 }
0x1353   :  { %v5614_v1 = vrot.slane %v5607_v61, %v7056_v48 }
0x1355   :  { %v5621_v20 = vrot.slane %v5614_v1, %v7056_v48  ;;  %v5946_v1 = vadd.f32 %v5942_v58, %v5915_v5 }
0x1357   :  { %v5623_v57 = vsel %vm568_vm2, %v5621_v20, 0.0  ;;  %v5914_v20 = vmul.f32 %v5904_v45, %v5883_v2 }
0x1358   :  { %5624 = vadd.xlane.f32.xlu0 %v5623_v57 }
0x13e5   :  { %v5625_v62 = vpop.xlane.xlu0 %5624 }
0x13e6   :  { %v5626_v23 = vmul.f32 0.03125, %v5625_v62 }
0x13e8   :  { %v5631_v41 = vrot.slane %v5626_v23, %v8380_v21  ;;  %v5635_v60 = vrot.slane %v5626_v23, %v8381_v47  ;;  %v5935_v23 = vrot.slane %v5927_v49, %v7056_v48  ;;  %v6011_v49 = vpack.c.bf16 %v256_v35, %v254_v27 }
0x13ea   :  { %v5638_v7 = vsub.f32 %v5603_v10, %v5631_v41  ;;  %v5639_v32 = vsub.f32 %v5604_v14, %v5635_v60  ;;  %v5736_v10 = vrot.slane %v5722_v19, %v7056_v48  ;;  %v5948_v60 = vpack.c.bf16 %v5946_v1, %v5946_v1 }
0x13ec   :  { %v5640_v59 = vmul.f32 %v5638_v7, %v5638_v7  ;;  %v5641_v12 = vmul.f32 %v5639_v32, %v5639_v32 }
0x13ee   :  { %v5644_v6 = vcombine.low %v5640_v59, %v5641_v12  ;;  %v246_v59 = vld [vmem:[%s8399_s22] sm:$0xff]  ;;  %v247_v12 = vld [vmem:[%s8399_s22 + $0x8] sm:$0xff] }
0x13ef   :  { %v5949_v40 = vpack.c.bf16 %v247_v12, %v246_v59 }
0x13f0   :  { %v5651_v24 = vrot.slane %v5644_v6, %v7056_v48 }
0x13f2   :  { %v5658_v13 = vrot.slane %v5651_v24, %v7056_v48  ;;  %v248_v48 = vld [vmem:[%s8399_s22 + $0x10] sm:$0xff] }
0x13f3   :  { %v5950_v44 = vpack.c.bf16 %v249_v26, %v248_v48 }
0x13f4   :  { %v5660_v38 = vsel %vm568_vm2, %v5658_v13, 0.0  ;;  %v5954_v13 = vunpack.c.l.b16 %v5948_v60 }
0x13f5   :  { %5661 = vadd.xlane.f32.xlu0 %v5660_v38 }
0x13f6   :  { %v5955_v22 = vrot.slane %v5954_v13, 7 }
0x1482   :  { %v5662_v46 = vpop.xlane.xlu0 %5661 }
0x1483   :  { %v5663_v18 = vmul.f32 0.03125, %v5662_v46  ;;  %v251_v46 = vld [vmem:[%s8400_s23 + $0x8] sm:$0xff] }
0x1485   :  { %v5664_v56 = vadd.f32 1e-05, %v5663_v18  ;;  %v253_v18 = vld [vmem:[%s8400_s23 + $0x18] sm:$0xff] }
0x1487   :  { %6671 = vrsqrt.f32 %v5664_v56  ;;  %v6010_v56 = vpack.c.bf16 %v253_v18, %v251_v46 }
0x1491   :  { %v6672_v25 = vpop.eup %6671 }
0x1492   :  { %v5670_v4 = vrot.slane %v6672_v25, %v8380_v21  ;;  %v5674_v50 = vrot.slane %v6672_v25, %v8381_v47 }
0x1494   :  { %v5677_v52 = vmul.f32 %v5670_v4, %v5638_v7  ;;  %v5678_v63 = vmul.f32 %v5674_v50, %v5639_v32  ;;  %v5945_v32 = vadd.f32 %v5935_v23, %v5914_v20 }
0x1496   :  { %v5708_v14 = vmul.f32 %v5698_v17, %v5677_v52  ;;  %v5709_v61 = vmul.f32 %v5705_v55, %v5678_v63  ;;  %v5947_v53 = vpack.c.bf16 %v5945_v32, %v5945_v32 }
0x1498   :  { %v5739_v57 = vadd.f32 %v5729_v37, %v5708_v14  ;;  %v5740_v62 = vadd.f32 %v5736_v10, %v5709_v61  ;;  %v5953_v51 = vunpack.c.l.b16 %v5947_v53  ;;  %v258_v61 = vld [vmem:[%s8402_s26] sm:$0x3] }
0x1499   :  { %v6017_v1 = vrot.slane %v258_v61, %v8380_v21  ;;  %v6021_v20 = vrot.slane %v258_v61, %v8381_v47 }
0x149a   :  { %v5741_v41 = vpack.c.bf16 %v5739_v57, %v5739_v57  ;;  %v5742_v42 = vpack.c.bf16 %v5740_v62, %v5740_v62  ;;  %v5956_v30 = vsel %vm5750_vm12, %v5955_v22, %v5953_v51 }
0x149b   :  { %v5957_v16 = vpack.c.b16 %v5956_v30, %v5956_v30 }
0x149c   :  { %v5748_v7 = vunpack.c.l.b16 %v5742_v42  ;;  %v5747_v6 = vunpack.c.l.b16 %v5741_v41 }
0x149e   :  { %v5749_v24 = vrot.slane %v5748_v7, 7 }
0x14a0   :  { %v5751_v38 = vsel %vm5750_vm12, %v5749_v24, %v5747_v6 }
0x14a1   :  { %v5752_v15 = vpack.c.b16 %v5751_v38, %v5751_v38 }
0x14a3   :  { %6542 = vmatmul.mubr.msk.bf16.vlgmr.msra.gmra.mrb[32].mxu1 %vm564_vm1, %v5752_v15 }
0x14a4   :  { %6546 = vmatpush3.bf16.msra.mxu1 %v5949_v40  ;;  %6549 = vmatprep.mubr.msk.bf16.mxu1 %vm6794_vm3, %v8356_v36 }
0x14a5   :  { %6547 = vmatprep.subr.bf16.mxu1 %v8356_v36  ;;  %v257_v36 = vld [vmem:[%s8400_s23 + $0x38] sm:$0xff] }
0x14a6   :  { %v6012_v3 = vpack.c.bf16 %v257_v36, %v255_v8 }
0x14a8   :  { %6548 = vmatpush3.bf16.msra.mxu1 %v5950_v44 }
0x14a9   :  { %6027 = vmatprep.subr.bf16.mxu1 %v6010_v56 }
0x14ab   :  { %6550 = vmatmul.mubr.msk.bf16.vlgmr.msra.gmra.mrb[36].mxu1 %vm564_vm1, %v5957_v16 }
0x14ac   :  { %6059 = vmatprep.mubr.bf16.mxu1 %v8401_v11  ;;  %6028 = vmatpush1.bf16.msra.mxu1 %v6009_v34 }
0x14ad   :  { %6029 = vmatprep.subr.bf16.mxu1 %v6012_v3 }
0x14b0   :  { %6030 = vmatpush1.bf16.msra.mxu1 %v6011_v49 }
0x14b1   :  { %6072 = vmatprep.subr.bf16.mxu1 %v6010_v56 }
0x1576   :  { %v5790_v29 = vpop.f32.mrb[32].mxu1 }
0x1577   :  { %v5796_v54 = vmul.f32 %v5790_v29, %v5790_v29  ;;  %v6543_v33 = vpop.f32.mrb[33].mxu1 }
0x1578   :  { %v5793_v39 = vpop.f32.mrb[34].mxu1 }
0x1579   :  { %v6544_v0 = vpop.f32.mrb[35].mxu1  ;;  %v5797_v43 = vsel %vm568_vm2, %v5796_v54, 0.0 }
0x157a   :  { %5798 = vadd.xlane.f32.xlu1 %v5797_v43 }
0x157e   :  { %v5995_v19 = vpop.f32.mrb[36].mxu1 }
0x157f   :  { %v6007_v25 = vsub.f32 %v5995_v19, %v6293_v31  ;;  %v6551_v5 = vpop.f32.mrb[37].mxu1 }
0x1580   :  { %v5998_v58 = vpop.f32.mrb[38].mxu1 }
0x1581   :  { %v6008_v17 = vpack.c.bf16 %v6007_v25, %v6007_v25  ;;  %v6552_v55 = vpop.f32.mrb[39].mxu1 }
0x1583   :  { %6294 = vmatmul.mubr.msk.bf16.vlgmr.msra.gmra.mrb[40].mxu1 %vm564_vm1, %v6008_v17 }
0x1584   :  { %6073 = vmatpush1.bf16.xpose.msra.mxu1 %v6009_v34 }
0x1585   :  { %6074 = vmatprep.subr.bf16.mxu1 %v6012_v3 }
0x158c   :  { %6075 = vmatpush1.bf16.xpose.msra.mxu1 %v6011_v49 }
0x1607   :  { %v5799_v4 = vpop.xlane.xlu1 %5798 }
0x1608   :  { %6673 = vrsqrt.f32 %v5799_v4  ;;  %vm5802_vm13 = vcmp.eq.f32.partialorder %v5799_v4, inf  ;;  %v5805_v2 = vand.u32 2147483648, %v5799_v4  ;;  %vm5804_vm14 = vcmp.eq.f32.partialorder %v5799_v4, 0.0 }
0x1612   :  { %v6674_v50 = vpop.eup %6673 }
0x1613   :  { %v5801_v45 = vmul.f32 %v6674_v50, %v5799_v4 }
0x1615   :  { %v5803_v52 = vsel %vm5802_vm13, %v5799_v4, %v5801_v45 }
0x1616   :  { %v5806_v63 = vsel %vm5804_vm14, %v5805_v2, %v5803_v52 }
0x1617   :  { %v5807_v37 = vmax.f32 %v5806_v63, 1e-12 }
0x1619   :  { %6675 = vrcp.f32 %v5807_v37 }
0x1623   :  { %v6676_v10 = vpop.eup %6675 }
0x1624   :  { %v5809_v14 = vmul.f32 %v6676_v10, %v5790_v29 }
0x1626   :  { %5810 = vst.msk [vmem:[#allocation2] sm:$0x3] %vm568_vm2, %v5809_v14 }
0x1656   :  { %v6061_v57 = vpop.f32.mrb[40].mxu1 }
0x1657   :  { %v6062_v62 = vadd.f32 %v6061_v57, %v6017_v1  ;;  %v6063_v23 = vpop.f32.mrb[41].mxu1 }
0x1658   :  { %v6064_v41 = vadd.f32 %v6063_v23, %v6021_v20  ;;  %v6065_v42 = vpop.f32.mrb[42].mxu1 }
0x1659   :  { %v6068_v60 = vmax.f32 %v6062_v62, 0.0  ;;  %v6066_v7 = vpop.f32.mrb[43].mxu1 }
0x165a   :  { %v6069_v32 = vmax.f32 %v6064_v41, 0.0 }
0x165b   :  { %v6127_v59 = vand.u32 2147483647, %v6068_v60  ;;  %v6070_v24 = vpack.c.bf16 %v6068_v60, %v6068_v60 }
0x165c   :  { %v6071_v12 = vpack.c.bf16 %v6069_v32, %v6069_v32  ;;  %v6128_v6 = vand.u32 2147483647, %v6069_v32 }
0x165d   :  { %v6130_v13 = vsel %vm6129_vm15, %v6127_v59, 0.0 }
0x165e   :  { %6104 = vmatprep.mubr.bf16.mxu1 %v6071_v12  ;;  %v6131_v21 = vsel %vm6129_vm15, %v6128_v6, 0.0 }
0x165f   :  { %6105 = vmatmul.mubr.bf16.vlgmr.msra.gmra.mrb[44].mxu1 %v6070_v24  ;;  %v6132_v47 = vadd.f32 %v6131_v21, %v6130_v13 }
0x1732   :  { %v6106_v38 = vpop.f32.mrb[44].mxu1 }
0x1733   :  { %v6107_v40 = vadd.f32 %v6293_v31, %v6106_v38  ;;  %v6108_v53 = vpop.f32.mrb[45].mxu1 }
0x1734   :  { %v6109_v15 = vpop.f32.mrb[46].mxu1 }
0x1735   :  { %v6110_v48 = vpop.f32.mrb[47].mxu1  ;;  %v6112_v26 = vmul.f32 %v6107_v40, %v6107_v40 }
0x1737   :  { %v6113_v22 = vsel %vm568_vm2, %v6112_v26, 0.0 }
0x1738   :  { %6114 = vadd.xlane.f32.xlu0 %v6113_v22 }
0x173c   :  { %6133 = vadd.xlane.f32.xlu0 %v6132_v47 }
0x173d   :  { %6692 = shalt.err (!%p6689_p4)
}
0x173e   :  { %s6693_s9 = scalar_lea.hbm %s7000_s8, 32 }
0x173f   :  { %p6694_p5 = scmp.ne.s32.totalorder %s7000_s8, %s6693_s9  ;;  %p6697_p6 = scmp.lt.u32.totalorder %s6693_s9, %s7000_s8 }
0x1741   :  { %p6699_p7 = pnand %p6697_p6, %p6694_p5 }
0x1743   :  { %6702 = shalt.err (!%p6699_p7)
}
0x1744   :  { %6154 = dma.vmem_to_hbm [thread:$0]  %s6152_s0, 32, %s7000_s8, [#allocation3]   ;;  %vm6143_vm3 = vcmask 0  }
0x1745   :  { %s6800_s8 = smov [#allocation4]   ;;  %s6801_s17 = smov [#allocation6]  }
0x1746   :  { %s6161_s13 = sshll.u32 %s6800_s8, 4  ;;  %s6171_s21 = sshll.u32 %s6801_s17, 4  ;;  %s6162_s13 = int_to_ptr.vmem [resolvable:$true] %s6161_s13  ;;  %s6172_s21 = int_to_ptr.vmem [resolvable:$true] %s6171_s21 }
0x1747   :  { %s6703_s25 = scalar_lea.vmem %s6162_s13, 32  ;;  %p6708_p9 = scmp.lt.s32.totalorder %s6162_s13, %s6162_s13 }
0x1748   :  { %p6704_p8 = scmp.ne.s32.totalorder %s6162_s13, %s6703_s25  ;;  %p6709_p10 = scmp.lt.s32.totalorder %s6703_s25, %s6703_s25 }
0x174a   :  { %p6710_p11 = por %p6709_p10, %p6708_p9 }
0x174c   :  { %p6711_p12 = pnand %p6710_p11, %p6704_p8 }
0x17c5   :  { %v6115_v44 = vpop.xlane.xlu0 %6114 }
0x17c6   :  { %6677 = vrsqrt.f32 %v6115_v44  ;;  %vm6118_vm0 = vcmp.eq.f32.partialorder %v6115_v44, inf  ;;  %v6121_v9 = vand.u32 2147483648, %v6115_v44  ;;  %vm6120_vm1 = vcmp.eq.f32.partialorder %v6115_v44, 0.0 }
0x17c9   :  { %v6134_v51 = vpop.xlane.xlu0 %6133 }
0x17ca   :  { %v6135_v30 = vsel %vm6129_vm15, %v6134_v51, 0.0 }
0x17cb   :  { %v6136_v16 = vrot.slane %v6135_v30, 4 }
0x17cd   :  { %v6137_v11 = vadd.f32 %v6136_v16, %v6135_v30 }
0x17cf   :  { %v6138_v46 = vrot.slane %v6137_v11, 2 }
0x17d0   :  { %v6678_v18 = vpop.eup %6677 }
0x17d1   :  { %v6117_v28 = vmul.f32 %v6678_v18, %v6115_v44  ;;  %v6139_v56 = vadd.f32 %v6138_v46, %v6137_v11 }
0x17d3   :  { %v6119_v34 = vsel %vm6118_vm0, %v6115_v44, %v6117_v28  ;;  %v6140_v8 = vrot.slane %v6139_v56, 1 }
0x17d4   :  { %v6122_v36 = vsel %vm6120_vm1, %v6121_v9, %v6119_v34 }
0x17d5   :  { %v6123_v27 = vmax.f32 %v6122_v36, 1e-12  ;;  %v6141_v3 = vadd.f32 %v6140_v8, %v6139_v56 }
0x17d7   :  { %6679 = vrcp.f32 %v6123_v27  ;;  %v6142_v35 = vmul.f32 0.0005, %v6141_v3 }
0x17d9   :  { %6144 = vst.msk [vmem:[#allocation6] sm:$0x1] %vm6143_vm3, %v6142_v35 }
0x17e1   :  { %v6680_v49 = vpop.eup %6679 }
0x17e2   :  { %v6125_v29 = vmul.f32 %v6680_v49, %v6107_v40 }
0x17e4   :  { %6126 = vst.msk [vmem:[#allocation4] sm:$0x3] %vm568_vm2, %v6125_v29 }
0x17e5   :  { %6714 = shalt.err (!%p6711_p12)
}
0x17e6   :  { %s6715_s29 = scalar_lea.hbm %s7005_s3, 32 }
0x17e7   :  { %p6716_p13 = scmp.ne.s32.totalorder %s7005_s3, %s6715_s29  ;;  %p6719_p0 = scmp.lt.u32.totalorder %s6715_s29, %s7005_s3 }
0x17e9   :  { %p6721_p1 = pnand %p6719_p0, %p6716_p13 }
0x17eb   :  { %6724 = shalt.err (!%p6721_p1)
}
0x17ec   :  { %6164 = dma.vmem_to_hbm [thread:$0]  %s6162_s13, 32, %s7005_s3, [#allocation5]  }
0x17ed   :  { %s6725_s14 = scalar_lea.vmem %s6172_s21, 16  ;;  %s6729_s24 = scalar_lea.vmem %s6172_s21, 32 }
0x17ee   :  { %p6726_p2 = scmp.ne.s32.totalorder %s6172_s21, %s6725_s14  ;;  %p6730_p3 = scmp.lt.s32.totalorder %s6172_s21, %s6172_s21 }
0x17ef   :  { %p6731_p4 = scmp.lt.s32.totalorder %s6729_s24, %s6725_s14 }
0x17f1   :  { %p6732_p5 = por %p6731_p4, %p6730_p3 }
0x17f3   :  { %p6733_p6 = pnand %p6732_p5, %p6726_p2 }
0x17f5   :  { %6736 = shalt.err (!%p6733_p6)
}
0x17f6   :  { %s6737_s30 = scalar_lea.hbm %s7010_s19, 16 }
0x17f7   :  { %p6738_p7 = scmp.ne.s32.totalorder %s7010_s19, %s6737_s30  ;;  %p6741_p8 = scmp.lt.u32.totalorder %s6737_s30, %s7010_s19 }
0x17f9   :  { %p6743_p9 = pnand %p6741_p8, %p6738_p7 }
0x17fb   :  { %6746 = shalt.err (!%p6743_p9)
}
0x17fc   :  { %6174 = dma.vmem_to_hbm [thread:$0]  %s6172_s21, 16, %s7010_s19, [#allocation5]  }
0x17fd   :  { %6747 = dma.done.wait [#allocation3], 32  }
0x17fe   :  { %6748 = vsyncadd [#allocation3], 4294967264 }
0x17ff   :  { %6749 = dma.done.wait [#allocation5], 48  }
0x1800   :  { %6750 = vsyncadd [#allocation5], 4294967248 }
0x1801   :  { %6184 = vsyncpa [#allocation3], 1 }
0x1802   :  { %6185 = vsyncpa [#allocation5], 1 }

</bundles_post_ra>
